<compile_context>
chip_gen: v6e
topology: v6e:2x2x1
jax: 0.10.0
libtpu: 0.0.40
codegen_flags: <defaults>
</compile_context>

<pallas_src>
import jax
import jax.numpy as jnp
from jax.experimental import pallas as pl
from jax.experimental.pallas import tpu as pltpu

# Padded sizes (MXU / (8,128)-tile friendly)
C1_PAD, K1_PAD = 8, 32        # conv1: Cout 6 -> 8,   Cin*K*K 25  -> 32
C2_PAD, K2_PAD = 16, 160      # conv2: Cout 16,       Cin*K*K 150 -> 160
FC_PAD, FC_IN_PAD = 128, 512  # fc widths 120/84/10 -> 128 lanes, fc1 K 400 -> 512
MAX_TILE_L = 512              # lane tile for the conv grid (>= 512 when possible)


def _round_up(v, m):
    return (v + m - 1) // m * m


def _tiles(l):
    """(tile, padded_length) for the conv lane axis."""
    lp = _round_up(l, 128)
    tile = min(MAX_TILE_L, lp)
    return tile, _round_up(lp, tile)


def _full_spec(shape):
    # whole-array block (no grid): the (8,128) divisibility rule is waived
    return pl.BlockSpec(shape, lambda: (0,) * len(shape))


# ---------------------------------------------------------------------------
# Pallas kernels
# ---------------------------------------------------------------------------
def _conv_tanh_pool_kernel(p_ref, w_ref, b_ref, o_ref):
    """Fused conv (im2col matmul) + bias + tanh + 2x2 avg pool, channel-major.

    p_ref : (4, Kp, TL)  patches, one leading slot per pooling offset, bf16
    w_ref : (Cp, Kp)     weights (rows = output channels), bf16
    b_ref : (Cp, 1)      bias, f32
    o_ref : (Cp, TL)     pooled activations (batch*spatial on lanes -> lane-dense)
    """
    w = w_ref[...]
    b = b_ref[...]
    acc = jnp.zeros(o_ref.shape, jnp.float32)
    for d in range(4):  # 2x2 avg pool = mean of the four offset responses
        acc += jnp.tanh(jnp.dot(w, p_ref[d], preferred_element_type=jnp.float32) + b)
    o_ref[...] = (0.25 * acc).astype(o_ref.dtype)


def conv_tanh_pool_call(p, w, b, cp, tile):
    _, kp, lp = p.shape
    n_tiles = lp // tile
    return pl.pallas_call(
        _conv_tanh_pool_kernel,
        out_shape=jax.ShapeDtypeStruct((cp, lp), jnp.bfloat16),
        grid=(n_tiles,),
        in_specs=[pl.BlockSpec((4, kp, tile), lambda i: (0, 0, i)),
                  pl.BlockSpec((cp, kp), lambda i: (0, 0)),   # weights stay resident
                  pl.BlockSpec((cp, 1), lambda i: (0, 0))],
        out_specs=pl.BlockSpec((cp, tile), lambda i: (0, i)),
        compiler_params=pltpu.CompilerParams(
            dimension_semantics=("parallel",),
            allow_input_fusion=[True, False, False]),
    )(p, w, b)


def _mlp_kernel(x_ref, w1_ref, b1_ref, w2_ref, b2_ref, w3_ref, b3_ref, o_ref):
    """fc1(+tanh) -> fc2(+tanh) -> fc3, transposed (features x samples).

    Weights are in native PyTorch (out, in) layout; intermediates never leave VMEM.
    """
    h = jnp.tanh(jnp.dot(w1_ref[...], x_ref[...],
                         preferred_element_type=jnp.float32) + b1_ref[...])
    h = jnp.tanh(jnp.dot(w2_ref[...], h.astype(jnp.bfloat16),
                         preferred_element_type=jnp.float32) + b2_ref[...])
    o_ref[...] = (jnp.dot(w3_ref[...], h.astype(jnp.bfloat16),
                          preferred_element_type=jnp.float32) + b3_ref[...])


def mlp_call(x, w1, b1, w2, b2, w3, b3):
    n = x.shape[1]
    args = (x, w1, b1, w2, b2, w3, b3)
    return pl.pallas_call(
        _mlp_kernel,
        out_shape=jax.ShapeDtypeStruct((FC_PAD, n), jnp.float32),
        in_specs=[_full_spec(a.shape) for a in args],
        out_specs=_full_spec((FC_PAD, n)),
    )(*args)


# ---------------------------------------------------------------------------
# Glue: pooled-offset im2col (channel-major, sample-minor) + parameter packing
# ---------------------------------------------------------------------------
def _pooled_patch_blocks(a, ksize, k_pad, l_pad):
    """(C, H, W, N) channel-major activations -> (4, k_pad, l_pad) patch tensor.

    Leading dim = 2x2 pooling offset (dy, dx).  Row = cin*K*K + kh*K + kw
    (matches the OIHW weight reshape).  Column = (ph*PW + pw)*N + n, i.e.
    spatial-major / sample-minor, so downstream reshapes stay contiguous.
    """
    C, H, W, N = a.shape
    OH, OW = H - ksize + 1, W - ksize + 1
    PH, PW = OH // 2, OW // 2
    F, L = C * ksize * ksize, PH * PW * N
    blocks = []
    for dy in range(2):
        for dx in range(2):
            cols = []
            for kh in range(ksize):
                for kw in range(ksize):
                    cols.append(a[:, dy + kh: dy + kh + 2 * PH: 2,
                                  dx + kw: dx + kw + 2 * PW: 2, :])
            p = jnp.stack(cols, axis=1)          # (C, K*K, PH, PW, N)
            p = p.reshape(F, L)                  # contiguous: rows (c,kh,kw), cols (ph,pw,n)
            blocks.append(jnp.pad(p, ((0, k_pad - F), (0, l_pad - L))))
    return jnp.stack(blocks).astype(jnp.bfloat16)  # (4, k_pad, l_pad)


def prepare_params(params):
    """One-time packing of PyTorch-layout params into padded, MXU-ready matrices.

    The MLP weights keep their PyTorch (out, in) layout because the MLP kernel is
    transposed (features x samples) — the flatten permutation costs nothing here.
    """
    bf16 = jnp.bfloat16
    w1 = jnp.pad(params["conv1_w"].reshape(6, 25),
                 ((0, C1_PAD - 6), (0, K1_PAD - 25))).astype(bf16)
    b1 = jnp.pad(params["conv1_b"], (0, C1_PAD - 6)).reshape(C1_PAD, 1)
    w2 = jnp.pad(params["conv2_w"].reshape(16, 150),
                 ((0, C2_PAD - 16), (0, K2_PAD - 150))).astype(bf16)
    b2 = jnp.pad(params["conv2_b"], (0, C2_PAD - 16)).reshape(C2_PAD, 1)
    fw1 = jnp.pad(params["fc1_w"], ((0, FC_PAD - 120), (0, FC_IN_PAD - 400))).astype(bf16)
    fb1 = jnp.pad(params["fc1_b"], (0, FC_PAD - 120)).reshape(FC_PAD, 1)
    fw2 = jnp.pad(params["fc2_w"], ((0, FC_PAD - 84), (0, FC_PAD - 120))).astype(bf16)
    fb2 = jnp.pad(params["fc2_b"], (0, FC_PAD - 84)).reshape(FC_PAD, 1)
    fw3 = jnp.pad(params["fc3_w"], ((0, FC_PAD - 10), (0, FC_PAD - 84))).astype(bf16)
    fb3 = jnp.pad(params["fc3_b"], (0, FC_PAD - 10)).reshape(FC_PAD, 1)
    return {"w1": w1, "b1": b1, "w2": w2, "b2": b2,
            "fw1": fw1, "fb1": fb1, "fw2": fw2, "fb2": fb2,
            "fw3": fw3, "fb3": fb3}


def lenet5_forward(x_nchw, pp):
    N, _, H, W = x_nchw.shape
    # One tiny input relabel to channel-major, sample-minor (H, W, N); after this
    # every inter-stage reshape in the whole forward is a contiguous view.
    x = x_nchw[:, 0].transpose(1, 2, 0).astype(jnp.bfloat16)[None]   # (1, H, W, N)

    # conv1 + tanh + avgpool  -> (6, 14, 14, N) channel-major
    ph1, pw1 = (H - 4) // 2, (W - 4) // 2
    l1_real = N * ph1 * pw1
    t1, l1 = _tiles(l1_real)
    a1 = conv_tanh_pool_call(_pooled_patch_blocks(x, 5, K1_PAD, l1),
                             pp["w1"], pp["b1"], C1_PAD, t1)
    a1 = a1[:6, :l1_real].reshape(6, ph1, pw1, N)      # contiguous, no transpose

    # conv2 + tanh + avgpool  -> (16, 25*N), cols (ph, pw, n)
    ph2, pw2 = (ph1 - 4) // 2, (pw1 - 4) // 2
    l2_real = N * ph2 * pw2
    t2, l2 = _tiles(l2_real)
    a2 = conv_tanh_pool_call(_pooled_patch_blocks(a1, 5, K2_PAD, l2),
                             pp["w2"], pp["b2"], C2_PAD, t2)
    # PyTorch flatten (c, h, w) lands on rows via a contiguous reshape: (400, N)
    x_mlp = a2[:, :l2_real].reshape(16 * ph2 * pw2, N)
    x_mlp = jnp.pad(x_mlp, ((0, FC_IN_PAD - 16 * ph2 * pw2), (0, 0)))   # 400 -> 512

    # fc1 -> fc2 -> fc3 fused, transposed (features x samples)
    out = mlp_call(x_mlp, pp["fw1"], pp["fb1"], pp["fw2"], pp["fb2"],
                   pp["fw3"], pp["fb3"])
    return out[:10, :].T                                # (N, 10)


# ---------------------------------------------------------------------------
# Pure-JAX reference (f32) for a correctness sanity check
# ---------------------------------------------------------------------------
def _ref_forward(x_nchw, params):
    def conv(x, w, b):
        y = jax.lax.conv_general_dilated(
            x, w, window_strides=(1, 1), padding="VALID",
            dimension_numbers=("NCHW", "OIHW", "NCHW"))
        return y + b[None, :, None, None]

    def pool(x):
        N, C, H, W = x.shape
        return x.reshape(N, C, H // 2, 2, W // 2, 2).mean(axis=(3, 5))

    x = pool(jnp.tanh(conv(x_nchw, params["conv1_w"], params["conv1_b"])))
    x = pool(jnp.tanh(conv(x, params["conv2_w"], params["conv2_b"])))
    x = x.reshape(x.shape[0], -1)
    x = jnp.tanh(x @ params["fc1_w"].T + params["fc1_b"])
    x = jnp.tanh(x @ params["fc2_w"].T + params["fc2_b"])
    return x @ params["fc3_w"].T + params["fc3_b"]


# ---------------------------------------------------------------------------
# Deterministic parameter init (shapes from LeNet5.__init__)
# ---------------------------------------------------------------------------
def init_params(key):
    ks = jax.random.split(key, 10)
    f32 = jnp.float32
    return {
        "conv1_w": 0.1 * jax.random.normal(ks[0], (6, 1, 5, 5), f32),
        "conv1_b": 0.1 * jax.random.normal(ks[1], (6,), f32),
        "conv2_w": 0.1 * jax.random.normal(ks[2], (16, 6, 5, 5), f32),
        "conv2_b": 0.1 * jax.random.normal(ks[3], (16,), f32),
        "fc1_w": 0.05 * jax.random.normal(ks[4], (120, 400), f32),
        "fc1_b": 0.05 * jax.random.normal(ks[5], (120,), f32),
        "fc2_w": 0.05 * jax.random.normal(ks[6], (84, 120), f32),
        "fc2_b": 0.05 * jax.random.normal(ks[7], (84,), f32),
        "fc3_w": 0.05 * jax.random.normal(ks[8], (10, 84), f32),
        "fc3_b": 0.05 * jax.random.normal(ks[9], (10,), f32),
    }


if __name__ == "__main__":
    key = jax.random.PRNGKey(0)
    kx, kp = jax.random.split(key)
    # LeNet5 requires 32x32 single-channel inputs (so that 16*5*5 = 400 holds).
    x = jax.random.normal(kx, (2, 1, 32, 32), jnp.float32)   # NCHW, batch=2
    params = init_params(kp)
    prepped = prepare_params(params)          # one-time, outside the hot path

    fwd = jax.jit(lenet5_forward)
    out = jax.block_until_ready(fwd(x, prepped))
    assert out.shape == (2, 10), out.shape

    ref = jax.block_until_ready(_ref_forward(x, params))
    err = float(jnp.max(jnp.abs(out - ref)))
    # bf16 MXU operands / bf16 intermediate activations with f32 accumulation
    assert err < 4e-2, err

    print("KERNEL_OK")
</pallas_src>

<mosaic_0001>
module attributes {stable_mosaic.version = 11 : i64} {
  func.func @_conv_tanh_pool_kernel(%arg0: i32, %arg1: memref<4x32x512xbf16, #tpu.memory_space<vmem>>, %arg2: memref<8x32xbf16, #tpu.memory_space<vmem>>, %arg3: memref<8x1xf32, #tpu.memory_space<vmem>>, %arg4: memref<8x512xbf16, #tpu.memory_space<vmem>>) attributes {dimension_semantics = [#tpu.dimension_semantics<parallel>], iteration_bounds = array<i64: 1>, scalar_prefetch = 0 : i64, scratch_operands = 0 : i64, tpu.core_type = #tpu.core_type<tc>, window_params = [{transform_indices = @transform_0, window_bounds = array<i64: 4, 32, 512>}, {pipeline_mode = #tpu.pipeline_mode<synchronous>, transform_indices = @transform_1, window_bounds = array<i64: 8, 32>}, {pipeline_mode = #tpu.pipeline_mode<synchronous>, transform_indices = @transform_2, window_bounds = array<i64: 8, 1>}, {transform_indices = @transform_3, window_bounds = array<i64: 8, 512>}]} {
    %c0 = arith.constant 0 : index
    %c0_0 = arith.constant 0 : index
    %0 = vector.load %arg2[%c0, %c0_0] : memref<8x32xbf16, #tpu.memory_space<vmem>>, vector<8x32xbf16>
    %c0_1 = arith.constant 0 : index
    %c0_2 = arith.constant 0 : index
    %1 = vector.load %arg3[%c0_1, %c0_2] : memref<8x1xf32, #tpu.memory_space<vmem>>, vector<8x1xf32>
    %cst = arith.constant 0.000000e+00 : f32
    %2 = vector.broadcast %cst : f32 to vector<8x512xf32>
    %c0_3 = arith.constant 0 : index
    %c0_4 = arith.constant 0 : index
    %c0_5 = arith.constant 0 : index
    %3 = vector.load %arg1[%c0_3, %c0_4, %c0_5] : memref<4x32x512xbf16, #tpu.memory_space<vmem>>, vector<1x32x512xbf16>
    %4 = vector.shape_cast %3 : vector<1x32x512xbf16> to vector<32x512xbf16>
    %cst_6 = arith.constant dense<0.000000e+00> : vector<8x512xf32>
    %5 = tpu.matmul %0, %4, %cst_6 {dimension_numbers = #tpu.dot_dimension_numbers<[1], [0], [0], [1], [0, 0, 1, 1], [], []>} : vector<8x32xbf16>, vector<32x512xbf16>, vector<8x512xf32> -> vector<8x512xf32>
    %6 = vector.broadcast %1 : vector<8x1xf32> to vector<8x512xf32>
    %7 = arith.addf %5, %6 : vector<8x512xf32>
    %8 = math.tanh %7 : vector<8x512xf32>
    %9 = arith.addf %2, %8 : vector<8x512xf32>
    %c1 = arith.constant 1 : index
    %c0_7 = arith.constant 0 : index
    %c0_8 = arith.constant 0 : index
    %10 = vector.load %arg1[%c1, %c0_7, %c0_8] : memref<4x32x512xbf16, #tpu.memory_space<vmem>>, vector<1x32x512xbf16>
    %11 = vector.shape_cast %10 : vector<1x32x512xbf16> to vector<32x512xbf16>
    %cst_9 = arith.constant dense<0.000000e+00> : vector<8x512xf32>
    %12 = tpu.matmul %0, %11, %cst_9 {dimension_numbers = #tpu.dot_dimension_numbers<[1], [0], [0], [1], [0, 0, 1, 1], [], []>} : vector<8x32xbf16>, vector<32x512xbf16>, vector<8x512xf32> -> vector<8x512xf32>
    %13 = vector.broadcast %1 : vector<8x1xf32> to vector<8x512xf32>
    %14 = arith.addf %12, %13 : vector<8x512xf32>
    %15 = math.tanh %14 : vector<8x512xf32>
    %16 = arith.addf %9, %15 : vector<8x512xf32>
    %c2 = arith.constant 2 : index
    %c0_10 = arith.constant 0 : index
    %c0_11 = arith.constant 0 : index
    %17 = vector.load %arg1[%c2, %c0_10, %c0_11] : memref<4x32x512xbf16, #tpu.memory_space<vmem>>, vector<1x32x512xbf16>
    %18 = vector.shape_cast %17 : vector<1x32x512xbf16> to vector<32x512xbf16>
    %cst_12 = arith.constant dense<0.000000e+00> : vector<8x512xf32>
    %19 = tpu.matmul %0, %18, %cst_12 {dimension_numbers = #tpu.dot_dimension_numbers<[1], [0], [0], [1], [0, 0, 1, 1], [], []>} : vector<8x32xbf16>, vector<32x512xbf16>, vector<8x512xf32> -> vector<8x512xf32>
    %20 = vector.broadcast %1 : vector<8x1xf32> to vector<8x512xf32>
    %21 = arith.addf %19, %20 : vector<8x512xf32>
    %22 = math.tanh %21 : vector<8x512xf32>
    %23 = arith.addf %16, %22 : vector<8x512xf32>
    %c3 = arith.constant 3 : index
    %c0_13 = arith.constant 0 : index
    %c0_14 = arith.constant 0 : index
    %24 = vector.load %arg1[%c3, %c0_13, %c0_14] : memref<4x32x512xbf16, #tpu.memory_space<vmem>>, vector<1x32x512xbf16>
    %25 = vector.shape_cast %24 : vector<1x32x512xbf16> to vector<32x512xbf16>
    %cst_15 = arith.constant dense<0.000000e+00> : vector<8x512xf32>
    %26 = tpu.matmul %0, %25, %cst_15 {dimension_numbers = #tpu.dot_dimension_numbers<[1], [0], [0], [1], [0, 0, 1, 1], [], []>} : vector<8x32xbf16>, vector<32x512xbf16>, vector<8x512xf32> -> vector<8x512xf32>
    %27 = vector.broadcast %1 : vector<8x1xf32> to vector<8x512xf32>
    %28 = arith.addf %26, %27 : vector<8x512xf32>
    %29 = math.tanh %28 : vector<8x512xf32>
    %30 = arith.addf %23, %29 : vector<8x512xf32>
    %cst_16 = arith.constant 2.500000e-01 : f32
    %31 = vector.broadcast %cst_16 : f32 to vector<8x512xf32>
    %32 = arith.mulf %31, %30 : vector<8x512xf32>
    %33 = arith.truncf %32 : vector<8x512xf32> to vector<8x512xbf16>
    %c0_17 = arith.constant 0 : index
    %c0_18 = arith.constant 0 : index
    %34 = vector.load %arg4[%c0_17, %c0_18] : memref<8x512xbf16, #tpu.memory_space<vmem>>, vector<8x512xbf16>
    tpu.vector_store %arg4[%c0_17, %c0_18], %33 {strides = array<i32>} : memref<8x512xbf16, #tpu.memory_space<vmem>>, vector<8x512xbf16>,
    return
  }
  func.func @transform_0(%arg0: i32) -> (i32, i32, i32) {
    %c0_i32 = arith.constant 0 : i32
    %c0_i32_0 = arith.constant 0 : i32
    %c0_i32_1 = arith.constant 0 : i32
    return %c0_i32, %c0_i32_0, %arg0 : i32, i32, i32
  }
  func.func @transform_1(%arg0: i32) -> (i32, i32) {
    %c0_i32 = arith.constant 0 : i32
    %c0_i32_0 = arith.constant 0 : i32
    %c0_i32_1 = arith.constant 0 : i32
    return %c0_i32, %c0_i32_0 : i32, i32
  }
  func.func @transform_2(%arg0: i32) -> (i32, i32) {
    %c0_i32 = arith.constant 0 : i32
    %c0_i32_0 = arith.constant 0 : i32
    %c0_i32_1 = arith.constant 0 : i32
    return %c0_i32, %c0_i32_0 : i32, i32
  }
  func.func @transform_3(%arg0: i32) -> (i32, i32) {
    %c0_i32 = arith.constant 0 : i32
    %c0_i32_0 = arith.constant 0 : i32
    return %c0_i32, %arg0 : i32, i32
  }
}

module attributes {stable_mosaic.version = 11 : i64} {
  func.func @_conv_tanh_pool_kernel(%arg0: i32, %arg1: memref<4x160x128xbf16, #tpu.memory_space<vmem>>, %arg2: memref<16x160xbf16, #tpu.memory_space<vmem>>, %arg3: memref<16x1xf32, #tpu.memory_space<vmem>>, %arg4: memref<16x128xbf16, #tpu.memory_space<vmem>>) attributes {dimension_semantics = [#tpu.dimension_semantics<parallel>], iteration_bounds = array<i64: 1>, scalar_prefetch = 0 : i64, scratch_operands = 0 : i64, tpu.core_type = #tpu.core_type<tc>, window_params = [{transform_indices = @transform_0, window_bounds = array<i64: 4, 160, 128>}, {pipeline_mode = #tpu.pipeline_mode<synchronous>, transform_indices = @transform_1, window_bounds = array<i64: 16, 160>}, {pipeline_mode = #tpu.pipeline_mode<synchronous>, transform_indices = @transform_2, window_bounds = array<i64: 16, 1>}, {transform_indices = @transform_3, window_bounds = array<i64: 16, 128>}]} {
    %c0 = arith.constant 0 : index
    %c0_0 = arith.constant 0 : index
    %0 = vector.load %arg2[%c0, %c0_0] : memref<16x160xbf16, #tpu.memory_space<vmem>>, vector<16x160xbf16>
    %c0_1 = arith.constant 0 : index
    %c0_2 = arith.constant 0 : index
    %1 = vector.load %arg3[%c0_1, %c0_2] : memref<16x1xf32, #tpu.memory_space<vmem>>, vector<16x1xf32>
    %cst = arith.constant 0.000000e+00 : f32
    %2 = vector.broadcast %cst : f32 to vector<16x128xf32>
    %c0_3 = arith.constant 0 : index
    %c0_4 = arith.constant 0 : index
    %c0_5 = arith.constant 0 : index
    %3 = vector.load %arg1[%c0_3, %c0_4, %c0_5] : memref<4x160x128xbf16, #tpu.memory_space<vmem>>, vector<1x160x128xbf16>
    %4 = vector.shape_cast %3 : vector<1x160x128xbf16> to vector<160x128xbf16>
    %cst_6 = arith.constant dense<0.000000e+00> : vector<16x128xf32>
    %5 = tpu.matmul %0, %4, %cst_6 {dimension_numbers = #tpu.dot_dimension_numbers<[1], [0], [0], [1], [0, 0, 1, 1], [], []>} : vector<16x160xbf16>, vector<160x128xbf16>, vector<16x128xf32> -> vector<16x128xf32>
    %6 = vector.broadcast %1 : vector<16x1xf32> to vector<16x128xf32>
    %7 = arith.addf %5, %6 : vector<16x128xf32>
    %8 = math.tanh %7 : vector<16x128xf32>
    %9 = arith.addf %2, %8 : vector<16x128xf32>
    %c1 = arith.constant 1 : index
    %c0_7 = arith.constant 0 : index
    %c0_8 = arith.constant 0 : index
    %10 = vector.load %arg1[%c1, %c0_7, %c0_8] : memref<4x160x128xbf16, #tpu.memory_space<vmem>>, vector<1x160x128xbf16>
    %11 = vector.shape_cast %10 : vector<1x160x128xbf16> to vector<160x128xbf16>
    %cst_9 = arith.constant dense<0.000000e+00> : vector<16x128xf32>
    %12 = tpu.matmul %0, %11, %cst_9 {dimension_numbers = #tpu.dot_dimension_numbers<[1], [0], [0], [1], [0, 0, 1, 1], [], []>} : vector<16x160xbf16>, vector<160x128xbf16>, vector<16x128xf32> -> vector<16x128xf32>
    %13 = vector.broadcast %1 : vector<16x1xf32> to vector<16x128xf32>
    %14 = arith.addf %12, %13 : vector<16x128xf32>
    %15 = math.tanh %14 : vector<16x128xf32>
    %16 = arith.addf %9, %15 : vector<16x128xf32>
    %c2 = arith.constant 2 : index
    %c0_10 = arith.constant 0 : index
    %c0_11 = arith.constant 0 : index
    %17 = vector.load %arg1[%c2, %c0_10, %c0_11] : memref<4x160x128xbf16, #tpu.memory_space<vmem>>, vector<1x160x128xbf16>
    %18 = vector.shape_cast %17 : vector<1x160x128xbf16> to vector<160x128xbf16>
    %cst_12 = arith.constant dense<0.000000e+00> : vector<16x128xf32>
    %19 = tpu.matmul %0, %18, %cst_12 {dimension_numbers = #tpu.dot_dimension_numbers<[1], [0], [0], [1], [0, 0, 1, 1], [], []>} : vector<16x160xbf16>, vector<160x128xbf16>, vector<16x128xf32> -> vector<16x128xf32>
    %20 = vector.broadcast %1 : vector<16x1xf32> to vector<16x128xf32>
    %21 = arith.addf %19, %20 : vector<16x128xf32>
    %22 = math.tanh %21 : vector<16x128xf32>
    %23 = arith.addf %16, %22 : vector<16x128xf32>
    %c3 = arith.constant 3 : index
    %c0_13 = arith.constant 0 : index
    %c0_14 = arith.constant 0 : index
    %24 = vector.load %arg1[%c3, %c0_13, %c0_14] : memref<4x160x128xbf16, #tpu.memory_space<vmem>>, vector<1x160x128xbf16>
    %25 = vector.shape_cast %24 : vector<1x160x128xbf16> to vector<160x128xbf16>
    %cst_15 = arith.constant dense<0.000000e+00> : vector<16x128xf32>
    %26 = tpu.matmul %0, %25, %cst_15 {dimension_numbers = #tpu.dot_dimension_numbers<[1], [0], [0], [1], [0, 0, 1, 1], [], []>} : vector<16x160xbf16>, vector<160x128xbf16>, vector<16x128xf32> -> vector<16x128xf32>
    %27 = vector.broadcast %1 : vector<16x1xf32> to vector<16x128xf32>
    %28 = arith.addf %26, %27 : vector<16x128xf32>
    %29 = math.tanh %28 : vector<16x128xf32>
    %30 = arith.addf %23, %29 : vector<16x128xf32>
    %cst_16 = arith.constant 2.500000e-01 : f32
    %31 = vector.broadcast %cst_16 : f32 to vector<16x128xf32>
    %32 = arith.mulf %31, %30 : vector<16x128xf32>
    %33 = arith.truncf %32 : vector<16x128xf32> to vector<16x128xbf16>
    %c0_17 = arith.constant 0 : index
    %c0_18 = arith.constant 0 : index
    %34 = vector.load %arg4[%c0_17, %c0_18] : memref<16x128xbf16, #tpu.memory_space<vmem>>, vector<16x128xbf16>
    tpu.vector_store %arg4[%c0_17, %c0_18], %33 {strides = array<i32>} : memref<16x128xbf16, #tpu.memory_space<vmem>>, vector<16x128xbf16>,
    return
  }
  func.func @transform_0(%arg0: i32) -> (i32, i32, i32) {
    %c0_i32 = arith.constant 0 : i32
    %c0_i32_0 = arith.constant 0 : i32
    %c0_i32_1 = arith.constant 0 : i32
    return %c0_i32, %c0_i32_0, %arg0 : i32, i32, i32
  }
  func.func @transform_1(%arg0: i32) -> (i32, i32) {
    %c0_i32 = arith.constant 0 : i32
    %c0_i32_0 = arith.constant 0 : i32
    %c0_i32_1 = arith.constant 0 : i32
    return %c0_i32, %c0_i32_0 : i32, i32
  }
  func.func @transform_2(%arg0: i32) -> (i32, i32) {
    %c0_i32 = arith.constant 0 : i32
    %c0_i32_0 = arith.constant 0 : i32
    %c0_i32_1 = arith.constant 0 : i32
    return %c0_i32, %c0_i32_0 : i32, i32
  }
  func.func @transform_3(%arg0: i32) -> (i32, i32) {
    %c0_i32 = arith.constant 0 : i32
    %c0_i32_0 = arith.constant 0 : i32
    return %c0_i32, %arg0 : i32, i32
  }
}

module attributes {stable_mosaic.version = 11 : i64} {
  func.func @_mlp_kernel(%arg0: memref<512x2xbf16, #tpu.memory_space<vmem>>, %arg1: memref<128x512xbf16, #tpu.memory_space<vmem>>, %arg2: memref<128x1xf32, #tpu.memory_space<vmem>>, %arg3: memref<128x128xbf16, #tpu.memory_space<vmem>>, %arg4: memref<128x1xf32, #tpu.memory_space<vmem>>, %arg5: memref<128x128xbf16, #tpu.memory_space<vmem>>, %arg6: memref<128x1xf32, #tpu.memory_space<vmem>>, %arg7: memref<128x2xf32, #tpu.memory_space<vmem>>) attributes {dimension_semantics = [], scalar_prefetch = 0 : i64, scratch_operands = 0 : i64, tpu.core_type = #tpu.core_type<tc>} {
    %c0 = arith.constant 0 : index
    %c0_0 = arith.constant 0 : index
    %0 = vector.load %arg1[%c0, %c0_0] : memref<128x512xbf16, #tpu.memory_space<vmem>>, vector<128x512xbf16>
    %c0_1 = arith.constant 0 : index
    %c0_2 = arith.constant 0 : index
    %1 = vector.load %arg0[%c0_1, %c0_2] : memref<512x2xbf16, #tpu.memory_space<vmem>>, vector<512x2xbf16>
    %cst = arith.constant dense<0.000000e+00> : vector<128x2xf32>
    %2 = tpu.matmul %0, %1, %cst {dimension_numbers = #tpu.dot_dimension_numbers<[1], [0], [0], [1], [0, 0, 1, 1], [], []>} : vector<128x512xbf16>, vector<512x2xbf16>, vector<128x2xf32> -> vector<128x2xf32>
    %c0_3 = arith.constant 0 : index
    %c0_4 = arith.constant 0 : index
    %3 = vector.load %arg2[%c0_3, %c0_4] : memref<128x1xf32, #tpu.memory_space<vmem>>, vector<128x1xf32>
    %4 = vector.broadcast %3 : vector<128x1xf32> to vector<128x2xf32>
    %5 = arith.addf %2, %4 : vector<128x2xf32>
    %6 = math.tanh %5 : vector<128x2xf32>
    %c0_5 = arith.constant 0 : index
    %c0_6 = arith.constant 0 : index
    %7 = vector.load %arg3[%c0_5, %c0_6] : memref<128x128xbf16, #tpu.memory_space<vmem>>, vector<128x128xbf16>
    %8 = arith.truncf %6 : vector<128x2xf32> to vector<128x2xbf16>
    %cst_7 = arith.constant dense<0.000000e+00> : vector<128x2xf32>
    %9 = tpu.matmul %7, %8, %cst_7 {dimension_numbers = #tpu.dot_dimension_numbers<[1], [0], [0], [1], [0, 0, 1, 1], [], []>} : vector<128x128xbf16>, vector<128x2xbf16>, vector<128x2xf32> -> vector<128x2xf32>
    %c0_8 = arith.constant 0 : index
    %c0_9 = arith.constant 0 : index
    %10 = vector.load %arg4[%c0_8, %c0_9] : memref<128x1xf32, #tpu.memory_space<vmem>>, vector<128x1xf32>
    %11 = vector.broadcast %10 : vector<128x1xf32> to vector<128x2xf32>
    %12 = arith.addf %9, %11 : vector<128x2xf32>
    %13 = math.tanh %12 : vector<128x2xf32>
    %c0_10 = arith.constant 0 : index
    %c0_11 = arith.constant 0 : index
    %14 = vector.load %arg5[%c0_10, %c0_11] : memref<128x128xbf16, #tpu.memory_space<vmem>>, vector<128x128xbf16>
    %15 = arith.truncf %13 : vector<128x2xf32> to vector<128x2xbf16>
    %cst_12 = arith.constant dense<0.000000e+00> : vector<128x2xf32>
    %16 = tpu.matmul %14, %15, %cst_12 {dimension_numbers = #tpu.dot_dimension_numbers<[1], [0], [0], [1], [0, 0, 1, 1], [], []>} : vector<128x128xbf16>, vector<128x2xbf16>, vector<128x2xf32> -> vector<128x2xf32>
    %c0_13 = arith.constant 0 : index
    %c0_14 = arith.constant 0 : index
    %17 = vector.load %arg6[%c0_13, %c0_14] : memref<128x1xf32, #tpu.memory_space<vmem>>, vector<128x1xf32>
    %18 = vector.broadcast %17 : vector<128x1xf32> to vector<128x2xf32>
    %19 = arith.addf %16, %18 : vector<128x2xf32>
    %c0_15 = arith.constant 0 : index
    %c0_16 = arith.constant 0 : index
    %20 = vector.load %arg7[%c0_15, %c0_16] : memref<128x2xf32, #tpu.memory_space<vmem>>, vector<128x2xf32>
    tpu.vector_store %arg7[%c0_15, %c0_16], %19 {strides = array<i32>} : memref<128x2xf32, #tpu.memory_space<vmem>>, vector<128x2xf32>,
    return
  }
}

</mosaic_0001>

<bundles_post_ra>
// kernel: lenet5_forward.7
= control target key start
LH: loop header
LB: loop body
LE: loop exit
PB: predicated region body
PF: predicated region fallthrough
CT: control target
= control target key end

     0   :  { %s3550_s0 = inlined_call_operand.vmem [shape: bf16[8,32], index: 0, kind: input, shape index: {}]   ;;  %s3551_s1 = inlined_call_operand.vmem [shape: f32[8,1], index: 1, kind: input, shape index: {}]   ;;  %s3552_s2 = inlined_call_operand.vmem [shape: bf16[1,32,512], index: 2, kind: input, shape index: {}]   ;;  %s3553_s3 = inlined_call_operand.<no memory space> [shape: bf16[], index: 3, kind: input, shape index: {}]   ;;  %s3554_s4 = inlined_call_operand.vmem [shape: bf16[1,32,512], index: 4, kind: input, shape index: {}]   ;;  %s3555_s5 = inlined_call_operand.vmem [shape: bf16[1,32,512], index: 5, kind: input, shape index: {}]   ;;  %s3556_s6 = inlined_call_operand.vmem [shape: bf16[1,32,512], index: 6, kind: input, shape index: {}]   ;;  %s3557_s7 = inlined_call_operand.vmem [shape: bf16[8,512], index: 7, kind: output, shape index: {}]  }
   0x1   :  { %v12_v0 = vstv %s3553_s3 }
   0x2   :  { %v3201_v1 = vunpack.i.l.bf16 %v12_v0 }
   0x3   :  { %v3000_v2 = vld [vmem:[%s3556_s6 + $0x20] sm:$0xff]   ;;  %v3016_v3 = vld [vmem:[%s3556_s6 + $0x30] sm:$0xff]   ;;  %v3008_v4 = vld [vmem:[%s3556_s6 + $0x28] sm:$0xff]   ;;  %v3156_v10 = vmov 0   ;;  %v3157_v41 = vmov 0.0   ;;  %vm2414_vm0 = vcmask 261120  }
   0x4   :  { %v842_v5 = vunpack.c.l.bf16 %v3000_v2  ;;  %v920_v6 = vunpack.c.h.bf16 %v3000_v2  ;;  %v1154_v7 = vunpack.c.l.bf16 %v3016_v3  ;;  %v1232_v8 = vunpack.c.h.bf16 %v3016_v3  ;;  %v3024_v9 = vld [vmem:[%s3556_s6 + $0x38] sm:$0xff]   ;;  %2450 = vmatprep.mubr.bf16.mxu0 %v3156_v10  ;;  %2491 = vmatprep.mubr.bf16.mxu1 %v3156_v10  ;;  %v218_v39 = vld [vmem:[%s3556_s6] sm:$0xff]   ;;  %v2984_v40 = vld [vmem:[%s3556_s6 + $0x10] sm:$0xff]  }
   0x5   :  { %v998_v11 = vunpack.c.l.bf16 %v3008_v4  ;;  %v1076_v12 = vunpack.c.h.bf16 %v3008_v4  ;;  %v1310_v13 = vunpack.c.l.bf16 %v3024_v9  ;;  %v1388_v14 = vunpack.c.h.bf16 %v3024_v9  ;;  %3075 = vset.pattern.permute.xlu0 %v3156_v10  ;;  %v2976_v46 = vld [vmem:[%s3556_s6 + $0x8] sm:$0xff]   ;;  %v2992_v47 = vld [vmem:[%s3556_s6 + $0x18] sm:$0xff]   ;;  %v2360_v56 = vld [vmem:[%s3551_s1] sm:$0xff] }
   0x6   :  { %v846_v15 = vmax.f32 %v842_v5, %v3201_v1  ;;  %v924_v16 = vmax.f32 %v920_v6, %v3201_v1  ;;  %v1158_v17 = vmax.f32 %v1154_v7, %v3201_v1  ;;  %v1236_v18 = vmax.f32 %v1232_v8, %v3201_v1  ;;  %2371 = vperm.xlu0 %3075, %v2360_v56  }
   0x7   :  { %v1002_v19 = vmax.f32 %v998_v11, %v3201_v1  ;;  %v1080_v20 = vmax.f32 %v1076_v12, %v3201_v1  ;;  %v1314_v21 = vmax.f32 %v1310_v13, %v3201_v1  ;;  %v1392_v22 = vmax.f32 %v1388_v14, %v3201_v1 }
   0x8   :  { %v850_v23 = vmax.f32 %v846_v15, %v3201_v1  ;;  %v928_v24 = vmax.f32 %v924_v16, %v3201_v1  ;;  %v1162_v25 = vmax.f32 %v1158_v17, %v3201_v1  ;;  %v1240_v26 = vmax.f32 %v1236_v18, %v3201_v1  ;;  %v2999_v15 = vld [vmem:[%s3555_s5 + $0x20] sm:$0xff]  }
   0x9   :  { %v1006_v27 = vmax.f32 %v1002_v19, %v3201_v1  ;;  %v1084_v28 = vmax.f32 %v1080_v20, %v3201_v1  ;;  %v1318_v29 = vmax.f32 %v1314_v21, %v3201_v1  ;;  %v1396_v30 = vmax.f32 %v1392_v22, %v3201_v1  ;;  %v3015_v20 = vld [vmem:[%s3555_s5 + $0x30] sm:$0xff]   ;;  %v3007_v21 = vld [vmem:[%s3555_s5 + $0x28] sm:$0xff]   ;;  %v3023_v22 = vld [vmem:[%s3555_s5 + $0x38] sm:$0xff]  }
   0xa   :  { %v854_v31 = vmax.f32 %v850_v23, %v3201_v1  ;;  %v932_v32 = vmax.f32 %v928_v24, %v3201_v1  ;;  %v1166_v33 = vmax.f32 %v1162_v25, %v3201_v1  ;;  %v1244_v34 = vmax.f32 %v1240_v26, %v3201_v1 }
   0xb   :  { %v1010_v35 = vmax.f32 %v1006_v27, %v3201_v1  ;;  %v1088_v36 = vmax.f32 %v1084_v28, %v3201_v1  ;;  %v1322_v37 = vmax.f32 %v1318_v29, %v3201_v1  ;;  %v1400_v38 = vmax.f32 %v1396_v30, %v3201_v1 }
   0xc   :  { %v857_v42 = vpack.c.bf16 %v3157_v41, %v854_v31  ;;  %v935_v43 = vpack.c.bf16 %v3157_v41, %v932_v32  ;;  %v1169_v44 = vpack.c.bf16 %v3157_v41, %v1166_v33  ;;  %v1247_v45 = vpack.c.bf16 %v3157_v41, %v1244_v34 }
   0xd   :  { %v1013_v48 = vpack.c.bf16 %v3157_v41, %v1010_v35  ;;  %v1091_v49 = vpack.c.bf16 %v3157_v41, %v1088_v36  ;;  %v1325_v50 = vpack.c.bf16 %v3157_v41, %v1322_v37  ;;  %v1403_v51 = vpack.c.bf16 %v3157_v41, %v1400_v38 }
   0xe   :  { %860 = vst [vmem:[#allocation22 + $0x20] sm:$0xf] %v857_v42  ;;  %938 = vst [vmem:[#allocation22 + $0x24] sm:$0xf] %v935_v43  ;;  %v219_v52 = vunpack.c.l.bf16 %v218_v39  ;;  %v296_v53 = vunpack.c.h.bf16 %v218_v39  ;;  %v530_v54 = vunpack.c.l.bf16 %v2984_v40  ;;  %v608_v55 = vunpack.c.h.bf16 %v2984_v40 }
   0xf   :  { %1172 = vst [vmem:[#allocation22 + $0x30] sm:$0xf] %v1169_v44  ;;  %1250 = vst [vmem:[#allocation22 + $0x34] sm:$0xf] %v1247_v45  ;;  %v374_v57 = vunpack.c.l.bf16 %v2976_v46  ;;  %v452_v58 = vunpack.c.h.bf16 %v2976_v46  ;;  %v686_v59 = vunpack.c.l.bf16 %v2992_v47  ;;  %v764_v60 = vunpack.c.h.bf16 %v2992_v47 }
  0x10   :  { %1016 = vst [vmem:[#allocation22 + $0x28] sm:$0xf] %v1013_v48  ;;  %1094 = vst [vmem:[#allocation22 + $0x2c] sm:$0xf] %v1091_v49  ;;  %v223_v61 = vmax.f32 %v219_v52, %v3201_v1  ;;  %v300_v62 = vmax.f32 %v296_v53, %v3201_v1  ;;  %v534_v63 = vmax.f32 %v530_v54, %v3201_v1  ;;  %v829_v39 = vunpack.c.l.bf16 %v2999_v15 }
  0x11   :  { %1328 = vst [vmem:[#allocation22 + $0x38] sm:$0xf] %v1325_v50  ;;  %1406 = vst [vmem:[#allocation22 + $0x3c] sm:$0xf] %v1403_v51  ;;  %v612_v0 = vmax.f32 %v608_v55, %v3201_v1  ;;  %v378_v2 = vmax.f32 %v374_v57, %v3201_v1  ;;  %v456_v3 = vmax.f32 %v452_v58, %v3201_v1  ;;  %v907_v40 = vunpack.c.h.bf16 %v2999_v15 }
  0x12   :  { %v690_v4 = vmax.f32 %v686_v59, %v3201_v1  ;;  %v768_v5 = vmax.f32 %v764_v60, %v3201_v1  ;;  %v227_v6 = vmax.f32 %v223_v61, %v3201_v1  ;;  %v304_v7 = vmax.f32 %v300_v62, %v3201_v1 }
  0x13   :  { %v538_v8 = vmax.f32 %v534_v63, %v3201_v1  ;;  %v616_v9 = vmax.f32 %v612_v0, %v3201_v1  ;;  %v382_v11 = vmax.f32 %v378_v2, %v3201_v1  ;;  %v460_v12 = vmax.f32 %v456_v3, %v3201_v1  ;;  %v206_v0 = vld [vmem:[%s3555_s5] sm:$0xff]  }
  0x14   :  { %v694_v13 = vmax.f32 %v690_v4, %v3201_v1  ;;  %v772_v14 = vmax.f32 %v768_v5, %v3201_v1  ;;  %v231_v16 = vmax.f32 %v227_v6, %v3201_v1  ;;  %v308_v17 = vmax.f32 %v304_v7, %v3201_v1  ;;  %v2983_v6 = vld [vmem:[%s3555_s5 + $0x10] sm:$0xff]   ;;  %v2975_v7 = vld [vmem:[%s3555_s5 + $0x8] sm:$0xff]  }
  0x15   :  { %v542_v18 = vmax.f32 %v538_v8, %v3201_v1  ;;  %v620_v19 = vmax.f32 %v616_v9, %v3201_v1  ;;  %v386_v24 = vmax.f32 %v382_v11, %v3201_v1  ;;  %v464_v25 = vmax.f32 %v460_v12, %v3201_v1  ;;  %v2991_v8 = vld [vmem:[%s3555_s5 + $0x18] sm:$0xff]  }
  0x16   :  { %v3076_v23 = vld [vmem:[#allocation22 + $0x24] ss:$16 sps:$4 sm:$0xff]   ;;  %v698_v26 = vmax.f32 %v694_v13, %v3201_v1  ;;  %v776_v27 = vmax.f32 %v772_v14, %v3201_v1  ;;  %v233_v29 = vpack.c.bf16 %v3157_v41, %v231_v16  ;;  %v311_v30 = vpack.c.bf16 %v3157_v41, %v308_v17  ;;  %v3080_v33 = vld [vmem:[#allocation22 + $0x20] ss:$16 sps:$4 sm:$0xff]  }
  0x17   :  { %v545_v31 = vpack.c.bf16 %v3157_v41, %v542_v18  ;;  %v623_v32 = vpack.c.bf16 %v3157_v41, %v620_v19  ;;  %2430 = vmatprep.subr.bf16.mxu0 %v3076_v23  ;;  %v389_v35 = vpack.c.bf16 %v3157_v41, %v386_v24  ;;  %v467_v36 = vpack.c.bf16 %v3157_v41, %v464_v25 }
  0x18   :  { %v3078_v28 = vld [vmem:[#allocation22 + $0x2c] ss:$16 sps:$4 sm:$0xff]   ;;  %v3081_v34 = vld [vmem:[#allocation22 + $0x28] ss:$16 sps:$4 sm:$0xff]   ;;  %v701_v37 = vpack.c.bf16 %v3157_v41, %v698_v26  ;;  %v779_v38 = vpack.c.bf16 %v3157_v41, %v776_v27  ;;  %236 = vst [vmem:[#allocation22] sm:$0xf] %v233_v29  ;;  %v1141_v42 = vunpack.c.l.bf16 %v3015_v20  ;;  %v1219_v43 = vunpack.c.h.bf16 %v3015_v20  ;;  %2431 = vmatpush1.bf16.msra.mxu0 %v3080_v33 }
  0x19   :  { %2471 = vmatprep.subr.bf16.mxu1 %v3078_v28  ;;  %314 = vst [vmem:[#allocation22 + $0x4] sm:$0xf] %v311_v30  ;;  %548 = vst [vmem:[#allocation22 + $0x10] sm:$0xf] %v545_v31  ;;  %v985_v44 = vunpack.c.l.bf16 %v3007_v21  ;;  %v1063_v45 = vunpack.c.h.bf16 %v3007_v21  ;;  %v1297_v46 = vunpack.c.l.bf16 %v3023_v22  ;;  %v1375_v47 = vunpack.c.h.bf16 %v3023_v22  ;;  %v3356_v30 = vld [vmem:[%s3550_s0] sm:$0xf] }
  0x1a   :  { %626 = vst [vmem:[#allocation22 + $0x14] sm:$0xf] %v623_v32  ;;  %2472 = vmatpush1.bf16.msra.mxu1 %v3081_v34  ;;  %392 = vst [vmem:[#allocation22 + $0x8] sm:$0xf] %v389_v35  ;;  %v1569_v48 = vmax.f32 %v3201_v1, %v829_v39  ;;  %v1589_v49 = vmax.f32 %v3201_v1, %v907_v40  ;;  %v1649_v50 = vmax.f32 %v3201_v1, %v1141_v42  ;;  %v3361_v35 = vld [vmem:[%s3554_s4 + $0x20] sm:$0xff]  }
  0x1b   :  { %470 = vst [vmem:[#allocation22 + $0xc] sm:$0xf] %v467_v36  ;;  %704 = vst [vmem:[#allocation22 + $0x18] sm:$0xf] %v701_v37  ;;  %v1669_v51 = vmax.f32 %v3201_v1, %v1219_v43  ;;  %v1609_v52 = vmax.f32 %v3201_v1, %v985_v44  ;;  %v1629_v53 = vmax.f32 %v3201_v1, %v1063_v45  ;;  %v207_v26 = vunpack.c.l.bf16 %v206_v0 }
  0x1c   :  { %782 = vst [vmem:[#allocation22 + $0x1c] sm:$0xf] %v779_v38  ;;  %v1689_v54 = vmax.f32 %v3201_v1, %v1297_v46  ;;  %v1709_v55 = vmax.f32 %v3201_v1, %v1375_v47  ;;  %v1573_v56 = vmax.f32 %v1569_v48, %v3201_v1  ;;  %v1593_v57 = vmax.f32 %v1589_v49, %v3201_v1 }
  0x1d   :  { %v1653_v58 = vmax.f32 %v1649_v50, %v3201_v1  ;;  %v1673_v59 = vmax.f32 %v1669_v51, %v3201_v1  ;;  %v1613_v60 = vmax.f32 %v1609_v52, %v3201_v1  ;;  %v1633_v61 = vmax.f32 %v1629_v53, %v3201_v1 }
  0x1e   :  { %v1693_v62 = vmax.f32 %v1689_v54, %v3201_v1  ;;  %v1713_v63 = vmax.f32 %v1709_v55, %v3201_v1  ;;  %v1577_v2 = vmax.f32 %v1573_v56, %v3201_v1  ;;  %v1597_v3 = vmax.f32 %v1593_v57, %v3201_v1  ;;  %v3014_v57 = vld [vmem:[%s3554_s4 + $0x30] sm:$0xff]  }
  0x1f   :  { %v1657_v4 = vmax.f32 %v1653_v58, %v3201_v1  ;;  %v1677_v5 = vmax.f32 %v1673_v59, %v3201_v1  ;;  %v1617_v11 = vmax.f32 %v1613_v60, %v3201_v1  ;;  %v1637_v12 = vmax.f32 %v1633_v61, %v3201_v1  ;;  %v3006_v58 = vld [vmem:[%s3554_s4 + $0x28] sm:$0xff]   ;;  %v3022_v59 = vld [vmem:[%s3554_s4 + $0x38] sm:$0xff]  }
  0x20   :  { %v1697_v13 = vmax.f32 %v1693_v62, %v3201_v1  ;;  %v1717_v14 = vmax.f32 %v1713_v63, %v3201_v1  ;;  %v1580_v16 = vpack.c.bf16 %v3157_v41, %v1577_v2  ;;  %v1600_v17 = vpack.c.bf16 %v3157_v41, %v1597_v3  ;;  %v3086_v20 = vld [vmem:[#allocation22] ss:$16 sps:$4 sm:$0xff]  }
  0x21   :  { %v3082_v9 = vld [vmem:[#allocation22 + $0x4] ss:$16 sps:$4 sm:$0xff]   ;;  %v1660_v18 = vpack.c.bf16 %v3157_v41, %v1657_v4  ;;  %v1680_v19 = vpack.c.bf16 %v3157_v41, %v1677_v5  ;;  %v1620_v22 = vpack.c.bf16 %v3157_v41, %v1617_v11  ;;  %v1640_v23 = vpack.c.bf16 %v3157_v41, %v1637_v12 }
  0x22   :  { %2432 = vmatprep.subr.bf16.mxu0 %v3082_v9  ;;  %v3087_v21 = vld [vmem:[#allocation22 + $0x8] ss:$16 sps:$4 sm:$0xff]   ;;  %v1700_v24 = vpack.c.bf16 %v3157_v41, %v1697_v13  ;;  %v1720_v25 = vpack.c.bf16 %v3157_v41, %v1717_v14  ;;  %1583 = vst [vmem:[#allocation22 + $0x60] sm:$0xf] %v1580_v16  ;;  %1603 = vst [vmem:[#allocation22 + $0x64] sm:$0xf] %v1600_v17  ;;  %v283_v27 = vunpack.c.h.bf16 %v206_v0  ;;  %v517_v28 = vunpack.c.l.bf16 %v2983_v6 }
  0x23   :  { %v3084_v15 = vld [vmem:[#allocation22 + $0xc] ss:$16 sps:$4 sm:$0xff]   ;;  %1663 = vst [vmem:[#allocation22 + $0x70] sm:$0xf] %v1660_v18  ;;  %1683 = vst [vmem:[#allocation22 + $0x74] sm:$0xf] %v1680_v19  ;;  %v595_v29 = vunpack.c.h.bf16 %v2983_v6  ;;  %2433 = vmatpush1.bf16.msra.mxu0 %v3086_v20  ;;  %v361_v31 = vunpack.c.l.bf16 %v2975_v7  ;;  %v439_v32 = vunpack.c.h.bf16 %v2975_v7  ;;  %v673_v33 = vunpack.c.l.bf16 %v2991_v8 }
  0x24   :  { %2473 = vmatprep.subr.bf16.mxu1 %v3084_v15  ;;  %1623 = vst [vmem:[#allocation22 + $0x68] sm:$0xf] %v1620_v22  ;;  %1643 = vst [vmem:[#allocation22 + $0x6c] sm:$0xf] %v1640_v23  ;;  %v751_v34 = vunpack.c.h.bf16 %v2991_v8  ;;  %v1409_v36 = vmax.f32 %v3201_v1, %v207_v26  ;;  %v1429_v37 = vmax.f32 %v3201_v1, %v283_v27  ;;  %v813_v48 = vunpack.c.l.bf16 %v3361_v35 }
  0x25   :  { %2474 = vmatpush1.bf16.msra.mxu1 %v3087_v21  ;;  %1703 = vst [vmem:[#allocation22 + $0x78] sm:$0xf] %v1700_v24  ;;  %1723 = vst [vmem:[#allocation22 + $0x7c] sm:$0xf] %v1720_v25  ;;  %v1489_v38 = vmax.f32 %v3201_v1, %v517_v28  ;;  %v1509_v39 = vmax.f32 %v3201_v1, %v595_v29  ;;  %v1449_v40 = vmax.f32 %v3201_v1, %v361_v31 }
  0x26   :  { %v1469_v42 = vmax.f32 %v3201_v1, %v439_v32  ;;  %v1529_v43 = vmax.f32 %v3201_v1, %v673_v33  ;;  %v1549_v44 = vmax.f32 %v3201_v1, %v751_v34  ;;  %3037 = vmatmul.mubr.msk.bf16.vlgmr.msra.gmra.mxu0 %vm2414_vm0, %v3356_v30  ;;  %v1413_v45 = vmax.f32 %v1409_v36, %v3201_v1 }
  0x27   :  { %v1433_v46 = vmax.f32 %v1429_v37, %v3201_v1  ;;  %v1493_v47 = vmax.f32 %v1489_v38, %v3201_v1  ;;  %v1513_v49 = vmax.f32 %v1509_v39, %v3201_v1  ;;  %v1453_v50 = vmax.f32 %v1449_v40, %v3201_v1  ;;  %2589 = vmatprep.mubr.bf16.mxu0 %v3156_v10  ;;  %v2982_v40 = vld [vmem:[%s3554_s4 + $0x10] sm:$0xff]  }
  0x28   :  { %3038 = vmatmul.mubr.msk.bf16.vlgmr.msra.gmra.mxu1 %vm2414_vm0, %v3356_v30  ;;  %v1473_v51 = vmax.f32 %v1469_v42, %v3201_v1  ;;  %v1533_v52 = vmax.f32 %v1529_v43, %v3201_v1  ;;  %v1417_v53 = vmax.f32 %v1413_v45, %v3201_v1  ;;  %v1553_v56 = vmax.f32 %v1549_v44, %v3201_v1 }
  0x29   :  { %v1437_v54 = vmax.f32 %v1433_v46, %v3201_v1  ;;  %v1497_v55 = vmax.f32 %v1493_v47, %v3201_v1  ;;  %2630 = vmatprep.mubr.bf16.mxu1 %v3156_v10  ;;  %v1517_v61 = vmax.f32 %v1513_v49, %v3201_v1  ;;  %v1457_v62 = vmax.f32 %v1453_v50, %v3201_v1  ;;  %v2974_v46 = vld [vmem:[%s3554_s4 + $0x8] sm:$0xff]   ;;  %v2990_v47 = vld [vmem:[%s3554_s4 + $0x18] sm:$0xff]  }
  0x2a   :  { %v3088_v60 = vld [vmem:[#allocation22 + $0x60] ss:$16 sps:$4 sm:$0xff]   ;;  %v1477_v63 = vmax.f32 %v1473_v51, %v3201_v1  ;;  %v1537_v0 = vmax.f32 %v1533_v52, %v3201_v1  ;;  %v3090_v2 = vld [vmem:[#allocation22 + $0x64] ss:$16 sps:$4 sm:$0xff]   ;;  %v1420_v3 = vpack.c.bf16 %v3157_v41, %v1417_v53  ;;  %v1557_v6 = vmax.f32 %v1553_v56, %v3201_v1 }
  0x2b   :  { %v1440_v4 = vpack.c.bf16 %v3157_v41, %v1437_v54  ;;  %v1500_v5 = vpack.c.bf16 %v3157_v41, %v1497_v55  ;;  %v1520_v9 = vpack.c.bf16 %v3157_v41, %v1517_v61  ;;  %v1460_v11 = vpack.c.bf16 %v3157_v41, %v1457_v62  ;;  %2569 = vmatprep.subr.bf16.mxu0 %v3090_v2 }
  0x2c   :  { %v3091_v7 = vld [vmem:[#allocation22 + $0x68] ss:$16 sps:$4 sm:$0xff]   ;;  %v3093_v8 = vld [vmem:[#allocation22 + $0x6c] ss:$16 sps:$4 sm:$0xff]   ;;  %v1480_v12 = vpack.c.bf16 %v3157_v41, %v1477_v63  ;;  %v1540_v13 = vpack.c.bf16 %v3157_v41, %v1537_v0  ;;  %1423 = vst [vmem:[#allocation22 + $0x40] sm:$0xf] %v1420_v3  ;;  %v1560_v14 = vpack.c.bf16 %v3157_v41, %v1557_v6  ;;  %v891_v15 = vunpack.c.h.bf16 %v3361_v35  ;;  %2570 = vmatpush1.bf16.msra.mxu0 %v3088_v60 }
  0x2d   :  { %1443 = vst [vmem:[#allocation22 + $0x44] sm:$0xf] %v1440_v4  ;;  %1503 = vst [vmem:[#allocation22 + $0x50] sm:$0xf] %v1500_v5  ;;  %v1125_v16 = vunpack.c.l.bf16 %v3014_v57  ;;  %v1203_v17 = vunpack.c.h.bf16 %v3014_v57  ;;  %2610 = vmatprep.subr.bf16.mxu1 %v3093_v8  ;;  %v1890_v18 = vmax.f32 %v3201_v1, %v813_v48  ;;  %v969_v19 = vunpack.c.l.bf16 %v3006_v58  ;;  %v191_v35 = vld [vmem:[%s3554_s4] sm:$0xff]  }
  0x2e   :  { %1523 = vst [vmem:[#allocation22 + $0x54] sm:$0xf] %v1520_v9  ;;  %1463 = vst [vmem:[#allocation22 + $0x48] sm:$0xf] %v1460_v11  ;;  %v1047_v20 = vunpack.c.h.bf16 %v3006_v58  ;;  %v1281_v21 = vunpack.c.l.bf16 %v3022_v59  ;;  %2611 = vmatpush1.bf16.msra.mxu1 %v3091_v7  ;;  %v1910_v22 = vmax.f32 %v3201_v1, %v891_v15  ;;  %v1359_v25 = vunpack.c.h.bf16 %v3022_v59 }
  0x2f   :  { %1483 = vst [vmem:[#allocation22 + $0x4c] sm:$0xf] %v1480_v12  ;;  %1543 = vst [vmem:[#allocation22 + $0x58] sm:$0xf] %v1540_v13  ;;  %v1970_v23 = vmax.f32 %v3201_v1, %v1125_v16  ;;  %v1990_v24 = vmax.f32 %v3201_v1, %v1203_v17  ;;  %v1894_v26 = vmax.f32 %v1890_v18, %v3201_v1  ;;  %v192_v51 = vunpack.c.l.bf16 %v191_v35 }
  0x30   :  { %1563 = vst [vmem:[#allocation22 + $0x5c] sm:$0xf] %v1560_v14  ;;  %v1930_v27 = vmax.f32 %v3201_v1, %v969_v19  ;;  %v1950_v28 = vmax.f32 %v3201_v1, %v1047_v20  ;;  %v2010_v29 = vmax.f32 %v3201_v1, %v1281_v21  ;;  %v1914_v31 = vmax.f32 %v1910_v22, %v3201_v1  ;;  %v2997_v14 = vld [vmem:[%s3552_s2 + $0x20] sm:$0xff]   ;;  %v3013_v19 = vld [vmem:[%s3552_s2 + $0x30] sm:$0xff]  }
  0x31   :  { %v1974_v32 = vmax.f32 %v1970_v23, %v3201_v1  ;;  %v1994_v33 = vmax.f32 %v1990_v24, %v3201_v1  ;;  %v2030_v34 = vmax.f32 %v3201_v1, %v1359_v25  ;;  %v1897_v36 = vpack.c.bf16 %v3157_v41, %v1894_v26  ;;  %v3005_v24 = vld [vmem:[%s3552_s2 + $0x28] sm:$0xff]   ;;  %v3021_v25 = vld [vmem:[%s3552_s2 + $0x38] sm:$0xff]  }
  0x32   :  { %v1934_v37 = vmax.f32 %v1930_v27, %v3201_v1  ;;  %v1954_v38 = vmax.f32 %v1950_v28, %v3201_v1  ;;  %v2014_v39 = vmax.f32 %v2010_v29, %v3201_v1  ;;  %v1917_v42 = vpack.c.bf16 %v3157_v41, %v1914_v31 }
  0x33   :  { %v1977_v43 = vpack.c.bf16 %v3157_v41, %v1974_v32  ;;  %v1997_v44 = vpack.c.bf16 %v3157_v41, %v1994_v33  ;;  %v2034_v45 = vmax.f32 %v2030_v34, %v3201_v1  ;;  %1900 = vst [vmem:[#allocation22 + $0xa0] sm:$0xf] %v1897_v36  ;;  %v267_v55 = vunpack.c.h.bf16 %v191_v35 }
  0x34   :  { %v1937_v48 = vpack.c.bf16 %v3157_v41, %v1934_v37  ;;  %v1957_v49 = vpack.c.bf16 %v3157_v41, %v1954_v38  ;;  %v2017_v50 = vpack.c.bf16 %v3157_v41, %v2014_v39  ;;  %v3094_v52 = vld [vmem:[#allocation22 + $0x40] ss:$16 sps:$4 sm:$0xff]   ;;  %1920 = vst [vmem:[#allocation22 + $0xa4] sm:$0xf] %v1917_v42  ;;  %v501_v56 = vunpack.c.l.bf16 %v2982_v40 }
  0x35   :  { %v3096_v53 = vld [vmem:[#allocation22 + $0x44] ss:$16 sps:$4 sm:$0xff]   ;;  %1980 = vst [vmem:[#allocation22 + $0xb0] sm:$0xf] %v1977_v43  ;;  %2000 = vst [vmem:[#allocation22 + $0xb4] sm:$0xf] %v1997_v44  ;;  %v2037_v54 = vpack.c.bf16 %v3157_v41, %v2034_v45  ;;  %v579_v57 = vunpack.c.h.bf16 %v2982_v40  ;;  %v1730_v59 = vmax.f32 %v3201_v1, %v192_v51  ;;  %v345_v60 = vunpack.c.l.bf16 %v2974_v46 }
  0x36   :  { %v3097_v58 = vld [vmem:[#allocation22 + $0x48] ss:$16 sps:$4 sm:$0xff]   ;;  %1940 = vst [vmem:[#allocation22 + $0xa8] sm:$0xf] %v1937_v48  ;;  %1960 = vst [vmem:[#allocation22 + $0xac] sm:$0xf] %v1957_v49  ;;  %v423_v61 = vunpack.c.h.bf16 %v2974_v46  ;;  %v657_v62 = vunpack.c.l.bf16 %v2990_v47  ;;  %2571 = vmatprep.subr.bf16.mxu0 %v3096_v53  ;;  %v1750_v0 = vmax.f32 %v3201_v1, %v267_v55  ;;  %v1810_v2 = vmax.f32 %v3201_v1, %v501_v56 }
  0x37   :  { %2020 = vst [vmem:[#allocation22 + $0xb8] sm:$0xf] %v2017_v50  ;;  %v3099_v63 = vld [vmem:[#allocation22 + $0x4c] ss:$16 sps:$4 sm:$0xff]   ;;  %2040 = vst [vmem:[#allocation22 + $0xbc] sm:$0xf] %v2037_v54  ;;  %v1830_v3 = vmax.f32 %v3201_v1, %v579_v57  ;;  %v735_v4 = vunpack.c.h.bf16 %v2990_v47  ;;  %2572 = vmatpush1.bf16.msra.mxu0 %v3094_v52  ;;  %v1734_v5 = vmax.f32 %v1730_v59, %v3201_v1  ;;  %v797_v31 = vunpack.c.l.bf16 %v2997_v14 }
  0x38   :  { %v1770_v6 = vmax.f32 %v3201_v1, %v345_v60  ;;  %v1790_v7 = vmax.f32 %v3201_v1, %v423_v61  ;;  %v1850_v8 = vmax.f32 %v3201_v1, %v657_v62  ;;  %2612 = vmatprep.subr.bf16.mxu1 %v3099_v63  ;;  %v1754_v9 = vmax.f32 %v1750_v0, %v3201_v1  ;;  %v176_v37 = vld [vmem:[%s3552_s2] sm:$0xff]   ;;  %v2981_v53 = vld [vmem:[%s3552_s2 + $0x10] sm:$0xff]   ;;  %v2989_v63 = vld [vmem:[%s3552_s2 + $0x18] sm:$0xff]  }
  0x39   :  { %v1814_v11 = vmax.f32 %v1810_v2, %v3201_v1  ;;  %v1834_v12 = vmax.f32 %v1830_v3, %v3201_v1  ;;  %v1870_v13 = vmax.f32 %v3201_v1, %v735_v4  ;;  %2613 = vmatpush1.bf16.msra.mxu1 %v3097_v58  ;;  %v1737_v15 = vpack.c.bf16 %v3157_v41, %v1734_v5  ;;  %v2973_v58 = vld [vmem:[%s3552_s2 + $0x8] sm:$0xff]  }
  0x3a   :  { %v1774_v16 = vmax.f32 %v1770_v6, %v3201_v1  ;;  %v1794_v17 = vmax.f32 %v1790_v7, %v3201_v1  ;;  %v1854_v18 = vmax.f32 %v1850_v8, %v3201_v1  ;;  %3047 = vmatmul.mubr.msk.bf16.vlgmr.msra.gmra.mxu0 %vm2414_vm0, %v3356_v30  ;;  %v1757_v20 = vpack.c.bf16 %v3157_v41, %v1754_v9 }
  0x3b   :  { %v1817_v21 = vpack.c.bf16 %v3157_v41, %v1814_v11  ;;  %v1837_v22 = vpack.c.bf16 %v3157_v41, %v1834_v12  ;;  %v1874_v23 = vmax.f32 %v1870_v13, %v3201_v1  ;;  %1740 = vst [vmem:[#allocation22 + $0x80] sm:$0xf] %v1737_v15  ;;  %2728 = vmatprep.mubr.bf16.mxu0 %v3156_v10  ;;  %v875_v34 = vunpack.c.h.bf16 %v2997_v14 }
  0x3c   :  { %v3100_v26 = vld [vmem:[#allocation22 + $0xa0] ss:$16 sps:$4 sm:$0xff]   ;;  %v1777_v27 = vpack.c.bf16 %v3157_v41, %v1774_v16  ;;  %v1797_v28 = vpack.c.bf16 %v3157_v41, %v1794_v17  ;;  %v1857_v29 = vpack.c.bf16 %v3157_v41, %v1854_v18  ;;  %3048 = vmatmul.mubr.msk.bf16.vlgmr.msra.gmra.mxu1 %vm2414_vm0, %v3356_v30  ;;  %v3102_v32 = vld [vmem:[#allocation22 + $0xa4] ss:$16 sps:$4 sm:$0xff]   ;;  %1760 = vst [vmem:[#allocation22 + $0x84] sm:$0xf] %v1757_v20  ;;  %v1109_v35 = vunpack.c.l.bf16 %v3013_v19 }
  0x3d   :  { %1820 = vst [vmem:[#allocation22 + $0x90] sm:$0xf] %v1817_v21  ;;  %1840 = vst [vmem:[#allocation22 + $0x94] sm:$0xf] %v1837_v22  ;;  %v1877_v33 = vpack.c.bf16 %v3157_v41, %v1874_v23  ;;  %v1187_v36 = vunpack.c.h.bf16 %v3013_v19  ;;  %2769 = vmatprep.mubr.bf16.mxu1 %v3156_v10  ;;  %v2211_v40 = vmax.f32 %v3201_v1, %v797_v31  ;;  %v953_v42 = vunpack.c.l.bf16 %v3005_v24 }
  0x3e   :  { %v3103_v38 = vld [vmem:[#allocation22 + $0xa8] ss:$16 sps:$4 sm:$0xff]   ;;  %v3105_v39 = vld [vmem:[#allocation22 + $0xac] ss:$16 sps:$4 sm:$0xff]   ;;  %1780 = vst [vmem:[#allocation22 + $0x88] sm:$0xf] %v1777_v27  ;;  %v1031_v43 = vunpack.c.h.bf16 %v3005_v24  ;;  %v1265_v44 = vunpack.c.l.bf16 %v3021_v25  ;;  %2708 = vmatprep.subr.bf16.mxu0 %v3102_v32  ;;  %v2231_v45 = vmax.f32 %v3201_v1, %v875_v34  ;;  %v2291_v46 = vmax.f32 %v3201_v1, %v1109_v35 }
  0x3f   :  { %1800 = vst [vmem:[#allocation22 + $0x8c] sm:$0xf] %v1797_v28  ;;  %1860 = vst [vmem:[#allocation22 + $0x98] sm:$0xf] %v1857_v29  ;;  %v2311_v47 = vmax.f32 %v3201_v1, %v1187_v36  ;;  %v1343_v48 = vunpack.c.h.bf16 %v3021_v25  ;;  %2749 = vmatprep.subr.bf16.mxu1 %v3105_v39  ;;  %2709 = vmatpush1.bf16.msra.mxu0 %v3100_v26  ;;  %v2214_v49 = vpack.c.bf16 %v3157_v41, %v2211_v40 }
  0x40   :  { %1880 = vst [vmem:[#allocation22 + $0x9c] sm:$0xf] %v1877_v33  ;;  %v2251_v50 = vmax.f32 %v3201_v1, %v953_v42  ;;  %v2271_v51 = vmax.f32 %v3201_v1, %v1031_v43  ;;  %v177_v52 = vunpack.c.l.bf16 %v176_v37  ;;  %2750 = vmatpush1.bf16.msra.mxu1 %v3103_v38  ;;  %v2234_v54 = vpack.c.bf16 %v3157_v41, %v2231_v45 }
  0x41   :  { %v2294_v55 = vpack.c.bf16 %v3157_v41, %v2291_v46  ;;  %v2314_v56 = vpack.c.bf16 %v3157_v41, %v2311_v47  ;;  %v2331_v57 = vmax.f32 %v3201_v1, %v1265_v44  ;;  %2217 = vst [vmem:[#allocation22 + $0xe0] sm:$0xf] %v2214_v49  ;;  %v2351_v61 = vmax.f32 %v3201_v1, %v1343_v48 }
  0x42   :  { %v2254_v59 = vpack.c.bf16 %v3157_v41, %v2251_v50  ;;  %v2274_v60 = vpack.c.bf16 %v3157_v41, %v2271_v51  ;;  %v251_v62 = vunpack.c.h.bf16 %v176_v37  ;;  %2237 = vst [vmem:[#allocation22 + $0xe4] sm:$0xf] %v2234_v54  ;;  %v485_v2 = vunpack.c.l.bf16 %v2981_v53 }
  0x43   :  { %2297 = vst [vmem:[#allocation22 + $0xf0] sm:$0xf] %v2294_v55  ;;  %2317 = vst [vmem:[#allocation22 + $0xf4] sm:$0xf] %v2314_v56  ;;  %v2334_v0 = vpack.c.bf16 %v3157_v41, %v2331_v57  ;;  %v563_v3 = vunpack.c.h.bf16 %v2981_v53  ;;  %v2051_v4 = vmax.f32 %v3201_v1, %v177_v52  ;;  %v2354_v6 = vpack.c.bf16 %v3157_v41, %v2351_v61 }
  0x44   :  { %v3106_v5 = vld [vmem:[#allocation22 + $0x80] ss:$16 sps:$4 sm:$0xff]   ;;  %2257 = vst [vmem:[#allocation22 + $0xe8] sm:$0xf] %v2254_v59  ;;  %2277 = vst [vmem:[#allocation22 + $0xec] sm:$0xf] %v2274_v60  ;;  %v2071_v7 = vmax.f32 %v3201_v1, %v251_v62  ;;  %v329_v8 = vunpack.c.l.bf16 %v2973_v58  ;;  %v407_v9 = vunpack.c.h.bf16 %v2973_v58  ;;  %v2131_v13 = vmax.f32 %v3201_v1, %v485_v2 }
  0x45   :  { %v3108_v11 = vld [vmem:[#allocation22 + $0x84] ss:$16 sps:$4 sm:$0xff]   ;;  %2337 = vst [vmem:[#allocation22 + $0xf8] sm:$0xf] %v2334_v0  ;;  %v2054_v12 = vpack.c.bf16 %v3157_v41, %v2051_v4  ;;  %v2151_v14 = vmax.f32 %v3201_v1, %v563_v3  ;;  %v641_v15 = vunpack.c.l.bf16 %v2989_v63  ;;  %2357 = vst [vmem:[#allocation22 + $0xfc] sm:$0xf] %v2354_v6  ;;  %v719_v19 = vunpack.c.h.bf16 %v2989_v63 }
  0x46   :  { %v3109_v16 = vld [vmem:[#allocation22 + $0x88] ss:$16 sps:$4 sm:$0xff]   ;;  %v2074_v18 = vpack.c.bf16 %v3157_v41, %v2071_v7  ;;  %v2091_v20 = vmax.f32 %v3201_v1, %v329_v8  ;;  %v2111_v21 = vmax.f32 %v3201_v1, %v407_v9  ;;  %2710 = vmatprep.subr.bf16.mxu0 %v3108_v11  ;;  %v2134_v22 = vpack.c.bf16 %v3157_v41, %v2131_v13 }
  0x47   :  { %v3111_v17 = vld [vmem:[#allocation22 + $0x8c] ss:$16 sps:$4 sm:$0xff]   ;;  %2057 = vst [vmem:[#allocation22 + $0xc0] sm:$0xf] %v2054_v12  ;;  %v2154_v23 = vpack.c.bf16 %v3157_v41, %v2151_v14  ;;  %v2171_v24 = vmax.f32 %v3201_v1, %v641_v15  ;;  %2711 = vmatpush1.bf16.msra.mxu0 %v3106_v5  ;;  %v2191_v27 = vmax.f32 %v3201_v1, %v719_v19 }
  0x48   :  { %2751 = vmatprep.subr.bf16.mxu1 %v3111_v17  ;;  %2077 = vst [vmem:[#allocation22 + $0xc4] sm:$0xf] %v2074_v18  ;;  %v2094_v25 = vpack.c.bf16 %v3157_v41, %v2091_v20  ;;  %v2114_v26 = vpack.c.bf16 %v3157_v41, %v2111_v21  ;;  %2137 = vst [vmem:[#allocation22 + $0xd0] sm:$0xf] %v2134_v22 }
  0x49   :  { %2752 = vmatpush1.bf16.msra.mxu1 %v3109_v16  ;;  %2157 = vst [vmem:[#allocation22 + $0xd4] sm:$0xf] %v2154_v23  ;;  %v2174_v28 = vpack.c.bf16 %v3157_v41, %v2171_v24  ;;  %v2194_v31 = vpack.c.bf16 %v3157_v41, %v2191_v27 }
  0x4a   :  { %v3112_v29 = vld [vmem:[#allocation22 + $0xe0] ss:$16 sps:$4 sm:$0xff]   ;;  %2097 = vst [vmem:[#allocation22 + $0xc8] sm:$0xf] %v2094_v25  ;;  %2117 = vst [vmem:[#allocation22 + $0xcc] sm:$0xf] %v2114_v26  ;;  %3057 = vmatmul.mubr.msk.bf16.vlgmr.msra.gmra.mxu0 %vm2414_vm0, %v3356_v30 }
  0x4b   :  { %v3114_v32 = vld [vmem:[#allocation22 + $0xe4] ss:$16 sps:$4 sm:$0xff]   ;;  %2177 = vst [vmem:[#allocation22 + $0xd8] sm:$0xf] %v2174_v28  ;;  %2197 = vst [vmem:[#allocation22 + $0xdc] sm:$0xf] %v2194_v31  ;;  %2867 = vmatprep.mubr.bf16.mxu0 %v3156_v10 }
  0x4c   :  { %3058 = vmatmul.mubr.msk.bf16.vlgmr.msra.gmra.mxu1 %vm2414_vm0, %v3356_v30  ;;  %2847 = vmatprep.subr.bf16.mxu0 %v3114_v32  ;;  %v3115_v1 = vld [vmem:[#allocation22 + $0xe8] ss:$16 sps:$4 sm:$0xff]   ;;  %v3117_v33 = vld [vmem:[#allocation22 + $0xec] ss:$16 sps:$4 sm:$0xff]  }
  0x4d   :  { %2908 = vmatprep.mubr.bf16.mxu1 %v3156_v10  ;;  %2848 = vmatpush1.bf16.msra.mxu0 %v3112_v29 }
  0x4e   :  { %2888 = vmatprep.subr.bf16.mxu1 %v3117_v33 }
  0x4f   :  { %2889 = vmatpush1.bf16.msra.mxu1 %v3115_v1  ;;  %v3118_v41 = vld [vmem:[#allocation22 + $0xc0] ss:$16 sps:$4 sm:$0xff]  }
  0x50   :  { %v3120_v34 = vld [vmem:[#allocation22 + $0xc4] ss:$16 sps:$4 sm:$0xff]  }
  0x51   :  { %2849 = vmatprep.subr.bf16.mxu0 %v3120_v34 }
  0x52   :  { %v3121_v35 = vld [vmem:[#allocation22 + $0xc8] ss:$16 sps:$4 sm:$0xff]   ;;  %v3123_v36 = vld [vmem:[#allocation22 + $0xcc] ss:$16 sps:$4 sm:$0xff]   ;;  %2850 = vmatpush1.bf16.msra.mxu0 %v3118_v41 }
  0x53   :  { %2890 = vmatprep.subr.bf16.mxu1 %v3123_v36 }
  0x54   :  { %2891 = vmatpush1.bf16.msra.mxu1 %v3121_v35 }
  0x55   :  { %3067 = vmatmul.mubr.msk.bf16.vlgmr.msra.gmra.mxu0 %vm2414_vm0, %v3356_v30 }
  0x57   :  { %3068 = vmatmul.mubr.msk.bf16.vlgmr.msra.gmra.mxu1 %vm2414_vm0, %v3356_v30 }
  0x81   :  { %v2372_v53 = vpop.permute.xlu0 %2371 }
  0xe6   :  { %v2452_v37 = vpop.f32.mrf.mxu0 }
  0xe7   :  { %v2453_v54 = vadd.f32 %v2452_v37, %v2372_v53 }
  0xe8   :  { %v2493_v38 = vpop.f32.mrf.mxu1  ;;  %v2454_v10 = vpop.f32.mrf.mxu0 }
  0xe9   :  { %v2494_v55 = vadd.f32 %v2493_v38, %v2372_v53  ;;  %v2455_v56 = vadd.f32 %v2454_v10, %v2372_v53  ;;  %3124 = vtanh.f32 %v2453_v54 }
  0xea   :  { %v2495_v39 = vpop.f32.mrf.mxu1  ;;  %v2456_v40 = vpop.f32.mrf.mxu0 }
  0xeb   :  { %v2496_v58 = vadd.f32 %v2495_v39, %v2372_v53  ;;  %3126 = vtanh.f32 %v2494_v55 }
  0xec   :  { %v2497_v42 = vpop.f32.mrf.mxu1  ;;  %v2457_v43 = vpop.f32.mrf.mxu0  ;;  %3128 = vtanh.f32 %v2455_v56 }
  0xed   :  { %3130 = vtanh.f32 %v2496_v58 }
  0xee   :  { %v2498_v44 = vpop.f32.mrf.mxu1 }
  0xf6   :  { %v3125_v18 = vpop.eup %3124 }
  0xf8   :  { %v3127_v20 = vpop.eup %3126 }
  0xf9   :  { %v3129_v23 = vpop.eup %3128 }
  0xfa   :  { %v2591_v45 = vpop.f32.mrf.mxu0  ;;  %v3131_v25 = vpop.eup %3130 }
  0xfb   :  { %v2592_v60 = vadd.f32 %v2591_v45, %v2372_v53 }
  0xfc   :  { %v2632_v46 = vpop.f32.mrf.mxu1  ;;  %v2593_v47 = vpop.f32.mrf.mxu0 }
  0xfd   :  { %v2633_v62 = vadd.f32 %v2632_v46, %v2372_v53  ;;  %v2594_v0 = vadd.f32 %v2593_v47, %v2372_v53  ;;  %3132 = vtanh.f32 %v2592_v60 }
  0xfe   :  { %v2634_v48 = vpop.f32.mrf.mxu1  ;;  %v2595_v49 = vpop.f32.mrf.mxu0 }
  0xff   :  { %v2635_v5 = vadd.f32 %v2634_v48, %v2372_v53  ;;  %3134 = vtanh.f32 %v2633_v62 }
 0x100   :  { %v2636_v50 = vpop.f32.mrf.mxu1  ;;  %v2596_v51 = vpop.f32.mrf.mxu0  ;;  %3136 = vtanh.f32 %v2594_v0 }
 0x102   :  { %v2637_v52 = vpop.f32.mrf.mxu1 }
 0x10a   :  { %v2730_v30 = vpop.f32.mrf.mxu0  ;;  %v3133_v26 = vpop.eup %3132 }
 0x10b   :  { %v2731_v3 = vadd.f32 %v2730_v30, %v2372_v53  ;;  %v2643_v1 = vadd.f32 %v3133_v26, %v3125_v18 }
 0x10c   :  { %v2771_v57 = vpop.f32.mrf.mxu1  ;;  %v2732_v59 = vpop.f32.mrf.mxu0 }
 0x10d   :  { %v2733_v7 = vadd.f32 %v2732_v59, %v2372_v53  ;;  %v2772_v8 = vadd.f32 %v2771_v57, %v2372_v53  ;;  %3138 = vtanh.f32 %v2731_v3  ;;  %v3135_v28 = vpop.eup %3134 }
 0x10e   :  { %v2773_v61 = vpop.f32.mrf.mxu1  ;;  %v2734_v63 = vpop.f32.mrf.mxu0  ;;  %3140 = vtanh.f32 %v2635_v5  ;;  %v2645_v37 = vadd.f32 %v3135_v28, %v3127_v20 }
 0x10f   :  { %v2774_v9 = vadd.f32 %v2773_v61, %v2372_v53  ;;  %3142 = vtanh.f32 %v2733_v7  ;;  %v3137_v29 = vpop.eup %3136 }
 0x110   :  { %v2775_v2 = vpop.f32.mrf.mxu1  ;;  %v2735_v4 = vpop.f32.mrf.mxu0  ;;  %3144 = vtanh.f32 %v2772_v8  ;;  %v2644_v34 = vadd.f32 %v3137_v29, %v3129_v23 }
 0x112   :  { %v2776_v6 = vpop.f32.mrf.mxu1 }
 0x115   :  { %v2869_v11 = vpop.f32.mrf.mxu0 }
 0x116   :  { %v2870_v12 = vadd.f32 %v2869_v11, %v2372_v53 }
 0x117   :  { %v2871_v13 = vpop.f32.mrf.mxu0  ;;  %v2910_v14 = vpop.f32.mrf.mxu1 }
 0x118   :  { %3146 = vtanh.f32 %v2870_v12  ;;  %v2872_v15 = vadd.f32 %v2871_v13, %v2372_v53  ;;  %v2911_v16 = vadd.f32 %v2910_v14, %v2372_v53 }
 0x119   :  { %3148 = vtanh.f32 %v2774_v9  ;;  %v2873_v17 = vpop.f32.mrf.mxu0  ;;  %v2912_v19 = vpop.f32.mrf.mxu1 }
 0x11a   :  { %3150 = vtanh.f32 %v2872_v15  ;;  %v2913_v21 = vadd.f32 %v2912_v19, %v2372_v53  ;;  %v3139_v31 = vpop.eup %3138 }
 0x11b   :  { %3152 = vtanh.f32 %v2911_v16  ;;  %v2874_v22 = vpop.f32.mrf.mxu0  ;;  %v2914_v24 = vpop.f32.mrf.mxu1  ;;  %v2782_v35 = vadd.f32 %v3139_v31, %v2643_v1 }
 0x11c   :  { %3154 = vtanh.f32 %v2913_v21  ;;  %v3141_v32 = vpop.eup %3140 }
 0x11d   :  { %v2915_v27 = vpop.f32.mrf.mxu1  ;;  %v3143_v33 = vpop.eup %3142  ;;  %v2646_v42 = vadd.f32 %v3141_v32, %v3131_v25 }
 0x11e   :  { %v3145_v41 = vpop.eup %3144  ;;  %v2783_v10 = vadd.f32 %v3143_v33, %v2644_v34 }
 0x11f   :  { %v2784_v43 = vadd.f32 %v3145_v41, %v2645_v37 }
 0x125   :  { %v3147_v36 = vpop.eup %3146 }
 0x126   :  { %v3149_v38 = vpop.eup %3148  ;;  %v2921_v39 = vadd.f32 %v3147_v36, %v2782_v35 }
 0x127   :  { %v3151_v40 = vpop.eup %3150  ;;  %v2785_v46 = vadd.f32 %v3149_v38, %v2646_v42 }
 0x128   :  { %v3153_v44 = vpop.eup %3152  ;;  %v2922_v45 = vadd.f32 %v3151_v40, %v2783_v10  ;;  %v2925_v49 = vmul.f32 0.25, %v2921_v39 }
 0x129   :  { %v2923_v47 = vadd.f32 %v3153_v44, %v2784_v43  ;;  %v3155_v48 = vpop.eup %3154 }
 0x12a   :  { %v2926_v50 = vmul.f32 0.25, %v2922_v45  ;;  %v2924_v51 = vadd.f32 %v3155_v48, %v2785_v46 }
 0x12b   :  { %v2927_v53 = vmul.f32 0.25, %v2923_v47 }
 0x12c   :  { %v3071_v52 = vpack.c.bf16 %v2926_v50, %v2925_v49  ;;  %v2928_v54 = vmul.f32 0.25, %v2924_v51 }
 0x12e   :  { %2945 = vst [vmem:[%s3557_s7] sm:$0xff] %v3071_v52  ;;  %v3072_v55 = vpack.c.bf16 %v2928_v54, %v2927_v53 }
 0x130   :  { %2946 = vst [vmem:[%s3557_s7 + $0x8] sm:$0xff] %v3072_v55 }

// kernel: lenet5_forward.6
= control target key start
LH: loop header
LB: loop body
LE: loop exit
PB: predicated region body
PF: predicated region fallthrough
CT: control target
= control target key end

     0   :  { %s4160_s0 = inlined_call_operand.vmem [shape: bf16[16,160], index: 0, kind: input, shape index: {}]   ;;  %s4161_s1 = inlined_call_operand.vmem [shape: f32[16,1], index: 1, kind: input, shape index: {}]   ;;  %s4162_s2 = inlined_call_operand.vmem [shape: bf16[1,160,128], index: 2, kind: input, shape index: {}]   ;;  %s4163_s3 = inlined_call_operand.<no memory space> [shape: bf16[], index: 3, kind: input, shape index: {}]   ;;  %s4164_s4 = inlined_call_operand.vmem [shape: bf16[1,160,128], index: 4, kind: input, shape index: {}]   ;;  %s4165_s5 = inlined_call_operand.vmem [shape: bf16[1,160,128], index: 5, kind: input, shape index: {}]   ;;  %s4166_s6 = inlined_call_operand.vmem [shape: bf16[1,160,128], index: 6, kind: input, shape index: {}]   ;;  %s4167_s7 = inlined_call_operand.vmem [shape: bf16[16,128], index: 7, kind: output, shape index: {}]  }
   0x1   :  { %v12_v0 = vstv %s4163_s3 }
   0x2   :  { %v3698_v1 = vunpack.i.l.bf16 %v12_v0 }
   0x3   :  { %v3515_v2 = vld [vmem:[%s4166_s6 + $0x38] sm:$0xff]   ;;  %v3507_v4 = vld [vmem:[%s4166_s6 + $0x30] sm:$0xff]   ;;  %vm2999_vm0 = vcmask 261120   ;;  %v3653_v5 = vmov 0   ;;  %v3738_v35 = vld [vmem:[%s4160_s0 + $0x4] ss:$8 sps:$4 sm:$0xff]  }
   0x4   :  { %v3514_v3 = vld [vmem:[%s4165_s5 + $0x38] sm:$0xff]   ;;  %3003 = vmatprep.subr.bf16.mxu0 %v3653_v5  ;;  %3129 = vmatprep.subr.bf16.mxu1 %v3653_v5  ;;  %v1295_v6 = vunpack.c.l.bf16 %v3515_v2  ;;  %v1373_v7 = vunpack.c.h.bf16 %v3515_v2  ;;  %v3506_v10 = vld [vmem:[%s4165_s5 + $0x30] sm:$0xff]   ;;  %v1139_v11 = vunpack.c.l.bf16 %v3507_v4  ;;  %v1217_v12 = vunpack.c.h.bf16 %v3507_v4  ;;  %v3499_v40 = vld [vmem:[%s4166_s6 + $0x28] sm:$0xff]  }
   0x5   :  { %v1282_v8 = vunpack.c.l.bf16 %v3514_v3  ;;  %v1360_v9 = vunpack.c.h.bf16 %v3514_v3  ;;  %v1126_v13 = vunpack.c.l.bf16 %v3506_v10  ;;  %v1204_v14 = vunpack.c.h.bf16 %v3506_v10  ;;  %3593 = vset.pattern.permute.xlu0 %v3653_v5  ;;  %v3498_v41 = vld [vmem:[%s4165_s5 + $0x28] sm:$0xff]   ;;  %v3491_v47 = vld [vmem:[%s4166_s6 + $0x20] sm:$0xff]   ;;  %3548 = vmatprep.mubr.msk.bf16.mxu0 %vm2999_vm0, %v3738_v35 }
   0x6   :  { %v1299_v15 = vmax.f32 %v1295_v6, %v3698_v1  ;;  %v1377_v16 = vmax.f32 %v1373_v7, %v3698_v1  ;;  %v1143_v19 = vmax.f32 %v1139_v11, %v3698_v1  ;;  %v1221_v20 = vmax.f32 %v1217_v12, %v3698_v1  ;;  %v3490_v48 = vld [vmem:[%s4165_s5 + $0x20] sm:$0xff]   ;;  %3559 = vmatprep.mubr.msk.bf16.mxu1 %vm2999_vm0, %v3738_v35 }
   0x7   :  { %v1986_v17 = vmax.f32 %v3698_v1, %v1282_v8  ;;  %v2006_v18 = vmax.f32 %v3698_v1, %v1360_v9  ;;  %v1946_v21 = vmax.f32 %v3698_v1, %v1126_v13  ;;  %v1966_v22 = vmax.f32 %v3698_v1, %v1204_v14  ;;  %v2898_v7 = vld [vmem:[%s4161_s1] sm:$0xff] }
   0x8   :  { %v1303_v23 = vmax.f32 %v1299_v15, %v3698_v1  ;;  %v1381_v24 = vmax.f32 %v1377_v16, %v3698_v1  ;;  %v1147_v27 = vmax.f32 %v1143_v19, %v3698_v1  ;;  %v1225_v28 = vmax.f32 %v1221_v20, %v3698_v1  ;;  %2922 = vperm.xlu0 %3593, %v2898_v7   ;;  %v3483_v16 = vld [vmem:[%s4166_s6 + $0x18] sm:$0xff]  }
   0x9   :  { %v1990_v25 = vmax.f32 %v1986_v17, %v3698_v1  ;;  %v2010_v26 = vmax.f32 %v2006_v18, %v3698_v1  ;;  %v1950_v29 = vmax.f32 %v1946_v21, %v3698_v1  ;;  %v1970_v30 = vmax.f32 %v1966_v22, %v3698_v1  ;;  %v2899_v17 = vld [vmem:[%s4161_s1 + $0x8] sm:$0xff]  ;;  %v3482_v22 = vld [vmem:[%s4165_s5 + $0x18] sm:$0xff]  }
   0xa   :  { %v1307_v31 = vmax.f32 %v1303_v23, %v3698_v1  ;;  %v1385_v32 = vmax.f32 %v1381_v24, %v3698_v1  ;;  %v1151_v36 = vmax.f32 %v1147_v27, %v3698_v1  ;;  %v1229_v37 = vmax.f32 %v1225_v28, %v3698_v1  ;;  %v3475_v23 = vld [vmem:[%s4166_s6 + $0x10] sm:$0xff]  }
   0xb   :  { %v1994_v33 = vmax.f32 %v1990_v25, %v3698_v1  ;;  %v2014_v34 = vmax.f32 %v2010_v26, %v3698_v1  ;;  %v1954_v38 = vmax.f32 %v1950_v29, %v3698_v1  ;;  %v1974_v39 = vmax.f32 %v1970_v30, %v3698_v1  ;;  %v3474_v24 = vld [vmem:[%s4165_s5 + $0x10] sm:$0xff]  }
   0xc   :  { %v3654_v42 = vmov 0.0   ;;  %v983_v53 = vunpack.c.l.bf16 %v3499_v40  ;;  %v1061_v54 = vunpack.c.h.bf16 %v3499_v40  ;;  %v970_v55 = vunpack.c.l.bf16 %v3498_v41  ;;  %2927 = vperm.xlu0 %3593, %v2899_v17  }
   0xd   :  { %v1310_v43 = vpack.c.bf16 %v3654_v42, %v1307_v31  ;;  %v1388_v44 = vpack.c.bf16 %v3654_v42, %v1385_v32  ;;  %v1997_v45 = vpack.c.bf16 %v3654_v42, %v1994_v33  ;;  %v2017_v46 = vpack.c.bf16 %v3654_v42, %v2014_v34 }
   0xe   :  { %v1154_v49 = vpack.c.bf16 %v3654_v42, %v1151_v36  ;;  %v1232_v50 = vpack.c.bf16 %v3654_v42, %v1229_v37  ;;  %v1957_v51 = vpack.c.bf16 %v3654_v42, %v1954_v38  ;;  %v1977_v52 = vpack.c.bf16 %v3654_v42, %v1974_v39 }
   0xf   :  { %1313 = vst [vmem:[#allocation22 + $0x38] sm:$0xf] %v1310_v43  ;;  %1391 = vst [vmem:[#allocation22 + $0x3c] sm:$0xf] %v1388_v44  ;;  %v1048_v56 = vunpack.c.h.bf16 %v3498_v41  ;;  %v827_v57 = vunpack.c.l.bf16 %v3491_v47  ;;  %v905_v58 = vunpack.c.h.bf16 %v3491_v47  ;;  %v814_v59 = vunpack.c.l.bf16 %v3490_v48 }
  0x10   :  { %2000 = vst [vmem:[#allocation22 + $0x88] sm:$0xf] %v1997_v45  ;;  %2020 = vst [vmem:[#allocation22 + $0x8c] sm:$0xf] %v2017_v46  ;;  %v892_v60 = vunpack.c.h.bf16 %v3490_v48  ;;  %v987_v61 = vmax.f32 %v983_v53, %v3698_v1  ;;  %v1065_v62 = vmax.f32 %v1061_v54, %v3698_v1  ;;  %v1906_v63 = vmax.f32 %v3698_v1, %v970_v55 }
  0x11   :  { %1157 = vst [vmem:[#allocation22 + $0x30] sm:$0xf] %v1154_v49  ;;  %1235 = vst [vmem:[#allocation22 + $0x34] sm:$0xf] %v1232_v50  ;;  %v1926_v0 = vmax.f32 %v3698_v1, %v1048_v56  ;;  %v831_v2 = vmax.f32 %v827_v57, %v3698_v1  ;;  %v909_v3 = vmax.f32 %v905_v58, %v3698_v1  ;;  %v671_v43 = vunpack.c.l.bf16 %v3483_v16 }
  0x12   :  { %1960 = vst [vmem:[#allocation22 + $0x80] sm:$0xf] %v1957_v51  ;;  %1980 = vst [vmem:[#allocation22 + $0x84] sm:$0xf] %v1977_v52  ;;  %v1866_v4 = vmax.f32 %v3698_v1, %v814_v59  ;;  %v1886_v6 = vmax.f32 %v3698_v1, %v892_v60  ;;  %v991_v8 = vmax.f32 %v987_v61, %v3698_v1  ;;  %v749_v44 = vunpack.c.h.bf16 %v3483_v16  ;;  %v3823_v51 = vld [vmem:[%s4166_s6 + $0x8] sm:$0xff]  }
  0x13   :  { %v1069_v9 = vmax.f32 %v1065_v62, %v3698_v1  ;;  %v1910_v10 = vmax.f32 %v1906_v63, %v3698_v1  ;;  %v1930_v11 = vmax.f32 %v1926_v0, %v3698_v1  ;;  %v835_v12 = vmax.f32 %v831_v2, %v3698_v1 }
  0x14   :  { %v913_v13 = vmax.f32 %v909_v3, %v3698_v1  ;;  %v1870_v14 = vmax.f32 %v1866_v4, %v3698_v1  ;;  %v1890_v15 = vmax.f32 %v1886_v6, %v3698_v1  ;;  %v995_v18 = vmax.f32 %v991_v8, %v3698_v1 }
  0x15   :  { %v1073_v19 = vmax.f32 %v1069_v9, %v3698_v1  ;;  %v1914_v20 = vmax.f32 %v1910_v10, %v3698_v1  ;;  %v1934_v21 = vmax.f32 %v1930_v11, %v3698_v1  ;;  %v839_v26 = vmax.f32 %v835_v12, %v3698_v1  ;;  %v3466_v10 = vld [vmem:[%s4165_s5 + $0x8] sm:$0xff]   ;;  %v203_v11 = vld [vmem:[%s4166_s6] sm:$0xff]  }
  0x16   :  { %v3594_v25 = vld [vmem:[#allocation22 + $0x38] sm:$0xff]   ;;  %v917_v27 = vmax.f32 %v913_v13, %v3698_v1  ;;  %v1874_v28 = vmax.f32 %v1870_v14, %v3698_v1  ;;  %v1894_v29 = vmax.f32 %v1890_v15, %v3698_v1  ;;  %v998_v31 = vpack.c.bf16 %v3654_v42, %v995_v18  ;;  %v191_v12 = vld [vmem:[%s4165_s5] sm:$0xff]  }
  0x17   :  { %v3595_v30 = vld [vmem:[#allocation22 + $0x88] sm:$0xff]   ;;  %v1076_v32 = vpack.c.bf16 %v3654_v42, %v1073_v19  ;;  %v1917_v33 = vpack.c.bf16 %v3654_v42, %v1914_v20  ;;  %v1937_v34 = vpack.c.bf16 %v3654_v42, %v1934_v21  ;;  %3004 = vmatpush1.bf16.msra.mxu0 %v3594_v25  ;;  %v842_v37 = vpack.c.bf16 %v3654_v42, %v839_v26 }
  0x18   :  { %v3596_v36 = vld [vmem:[#allocation22 + $0x30] sm:$0xff]   ;;  %v920_v38 = vpack.c.bf16 %v3654_v42, %v917_v27  ;;  %v1877_v39 = vpack.c.bf16 %v3654_v42, %v1874_v28  ;;  %v1897_v40 = vpack.c.bf16 %v3654_v42, %v1894_v29  ;;  %3130 = vmatpush1.bf16.msra.mxu1 %v3595_v30  ;;  %3005 = vmatprep.subr.bf16.mxu0 %v3653_v5  ;;  %v658_v45 = vunpack.c.l.bf16 %v3482_v22 }
  0x19   :  { %v3597_v41 = vld [vmem:[#allocation22 + $0x80] sm:$0xff]   ;;  %1001 = vst [vmem:[#allocation22 + $0x28] sm:$0xf] %v998_v31  ;;  %1079 = vst [vmem:[#allocation22 + $0x2c] sm:$0xf] %v1076_v32  ;;  %v736_v46 = vunpack.c.h.bf16 %v3482_v22  ;;  %3131 = vmatprep.subr.bf16.mxu1 %v3653_v5  ;;  %v515_v47 = vunpack.c.l.bf16 %v3475_v23  ;;  %v593_v48 = vunpack.c.h.bf16 %v3475_v23  ;;  %v502_v49 = vunpack.c.l.bf16 %v3474_v24 }
  0x1a   :  { %1920 = vst [vmem:[#allocation22 + $0x78] sm:$0xf] %v1917_v33  ;;  %1940 = vst [vmem:[#allocation22 + $0x7c] sm:$0xf] %v1937_v34  ;;  %v580_v50 = vunpack.c.h.bf16 %v3474_v24  ;;  %v675_v52 = vmax.f32 %v671_v43, %v3698_v1  ;;  %v753_v53 = vmax.f32 %v749_v44, %v3698_v1  ;;  %v1826_v54 = vmax.f32 %v3698_v1, %v658_v45 }
  0x1b   :  { %845 = vst [vmem:[#allocation22 + $0x20] sm:$0xf] %v842_v37  ;;  %923 = vst [vmem:[#allocation22 + $0x24] sm:$0xf] %v920_v38  ;;  %v1846_v55 = vmax.f32 %v3698_v1, %v736_v46  ;;  %3006 = vmatpush1.bf16.msra.mxu0 %v3596_v36  ;;  %v519_v56 = vmax.f32 %v515_v47, %v3698_v1  ;;  %v597_v57 = vmax.f32 %v593_v48, %v3698_v1  ;;  %v3876_v38 = vld [vmem:[%s4166_s6 + $0x48] sm:$0xff]  }
  0x1c   :  { %1880 = vst [vmem:[#allocation22 + $0x70] sm:$0xf] %v1877_v39  ;;  %1900 = vst [vmem:[#allocation22 + $0x74] sm:$0xf] %v1897_v40  ;;  %v1786_v58 = vmax.f32 %v3698_v1, %v502_v49  ;;  %v1806_v59 = vmax.f32 %v3698_v1, %v580_v50  ;;  %3132 = vmatpush1.bf16.msra.mxu1 %v3597_v41  ;;  %3007 = vmatprep.subr.bf16.mxu0 %v3653_v5  ;;  %v359_v63 = vunpack.c.l.bf16 %v3823_v51 }
  0x1d   :  { %v679_v60 = vmax.f32 %v675_v52, %v3698_v1  ;;  %v757_v61 = vmax.f32 %v753_v53, %v3698_v1  ;;  %v1830_v62 = vmax.f32 %v1826_v54, %v3698_v1  ;;  %3133 = vmatprep.subr.bf16.mxu1 %v3653_v5  ;;  %v1850_v0 = vmax.f32 %v1846_v55, %v3698_v1 }
  0x1e   :  { %v523_v2 = vmax.f32 %v519_v56, %v3698_v1  ;;  %v601_v3 = vmax.f32 %v597_v57, %v3698_v1  ;;  %v1790_v4 = vmax.f32 %v1786_v58, %v3698_v1  ;;  %v1810_v9 = vmax.f32 %v1806_v59, %v3698_v1 }
  0x1f   :  { %v683_v6 = vmax.f32 %v679_v60, %v3698_v1  ;;  %v761_v7 = vmax.f32 %v757_v61, %v3698_v1  ;;  %v1834_v8 = vmax.f32 %v1830_v62, %v3698_v1  ;;  %v1854_v14 = vmax.f32 %v1850_v0, %v3698_v1  ;;  %v3530_v60 = vld [vmem:[%s4165_s5 + $0x48] sm:$0xff]   ;;  %v3523_v61 = vld [vmem:[%s4166_s6 + $0x40] sm:$0xff]  }
  0x20   :  { %v3598_v13 = vld [vmem:[#allocation22 + $0x28] sm:$0xff]   ;;  %v527_v15 = vmax.f32 %v523_v2, %v3698_v1  ;;  %v605_v16 = vmax.f32 %v601_v3, %v3698_v1  ;;  %v1794_v17 = vmax.f32 %v1790_v4, %v3698_v1  ;;  %v1814_v22 = vmax.f32 %v1810_v9, %v3698_v1  ;;  %v3522_v62 = vld [vmem:[%s4165_s5 + $0x40] sm:$0xff]  }
  0x21   :  { %v3599_v18 = vld [vmem:[#allocation22 + $0x78] sm:$0xff]   ;;  %v686_v19 = vpack.c.bf16 %v3654_v42, %v683_v6  ;;  %v764_v20 = vpack.c.bf16 %v3654_v42, %v761_v7  ;;  %v1837_v21 = vpack.c.bf16 %v3654_v42, %v1834_v8  ;;  %3008 = vmatpush1.bf16.msra.mxu0 %v3598_v13  ;;  %v1857_v24 = vpack.c.bf16 %v3654_v42, %v1854_v14 }
  0x22   :  { %v3600_v23 = vld [vmem:[#allocation22 + $0x20] sm:$0xff]   ;;  %v530_v25 = vpack.c.bf16 %v3654_v42, %v527_v15  ;;  %v608_v26 = vpack.c.bf16 %v3654_v42, %v605_v16  ;;  %v1797_v27 = vpack.c.bf16 %v3654_v42, %v1794_v17  ;;  %3134 = vmatpush1.bf16.msra.mxu1 %v3599_v18  ;;  %3009 = vmatprep.subr.bf16.mxu0 %v3653_v5  ;;  %v437_v31 = vunpack.c.h.bf16 %v3823_v51 }
  0x23   :  { %v3601_v28 = vld [vmem:[#allocation22 + $0x70] sm:$0xff]   ;;  %689 = vst [vmem:[#allocation22 + $0x18] sm:$0xf] %v686_v19  ;;  %767 = vst [vmem:[#allocation22 + $0x1c] sm:$0xf] %v764_v20  ;;  %v1817_v29 = vpack.c.bf16 %v3654_v42, %v1814_v22  ;;  %v363_v30 = vmax.f32 %v359_v63, %v3698_v1  ;;  %v346_v32 = vunpack.c.l.bf16 %v3466_v10  ;;  %3135 = vmatprep.subr.bf16.mxu1 %v3653_v5  ;;  %v424_v33 = vunpack.c.h.bf16 %v3466_v10 }
  0x24   :  { %1840 = vst [vmem:[#allocation22 + $0x68] sm:$0xf] %v1837_v21  ;;  %1860 = vst [vmem:[#allocation22 + $0x6c] sm:$0xf] %v1857_v24  ;;  %v204_v34 = vunpack.c.l.bf16 %v203_v11  ;;  %v281_v36 = vunpack.c.h.bf16 %v203_v11  ;;  %v192_v37 = vunpack.c.l.bf16 %v191_v12  ;;  %v441_v40 = vmax.f32 %v437_v31, %v3698_v1 }
  0x25   :  { %533 = vst [vmem:[#allocation22 + $0x10] sm:$0xf] %v530_v25  ;;  %611 = vst [vmem:[#allocation22 + $0x14] sm:$0xf] %v608_v26  ;;  %v367_v39 = vmax.f32 %v363_v30, %v3698_v1  ;;  %v1746_v41 = vmax.f32 %v3698_v1, %v346_v32  ;;  %v268_v43 = vunpack.c.h.bf16 %v191_v12  ;;  %3010 = vmatpush1.bf16.msra.mxu0 %v3600_v23  ;;  %v1607_v51 = vunpack.c.l.bf16 %v3876_v38  ;;  %v3513_v25 = vld [vmem:[%s4164_s4 + $0x38] sm:$0xff]  }
  0x26   :  { %1800 = vst [vmem:[#allocation22 + $0x60] sm:$0xf] %v1797_v27  ;;  %1820 = vst [vmem:[#allocation22 + $0x64] sm:$0xf] %v1817_v29  ;;  %v1766_v44 = vmax.f32 %v3698_v1, %v424_v33  ;;  %v208_v45 = vmax.f32 %v204_v34, %v3698_v1  ;;  %v285_v46 = vmax.f32 %v281_v36, %v3698_v1  ;;  %3136 = vmatpush1.bf16.msra.mxu1 %v3601_v28 }
  0x27   :  { %v1706_v47 = vmax.f32 %v3698_v1, %v192_v37  ;;  %3011 = vmatprep.subr.bf16.mxu0 %v3653_v5  ;;  %v371_v48 = vmax.f32 %v367_v39, %v3698_v1  ;;  %v445_v49 = vmax.f32 %v441_v40, %v3698_v1  ;;  %v1750_v50 = vmax.f32 %v1746_v41, %v3698_v1 }
  0x28   :  { %3137 = vmatprep.subr.bf16.mxu1 %v3653_v5  ;;  %v1770_v52 = vmax.f32 %v1766_v44, %v3698_v1  ;;  %v212_v53 = vmax.f32 %v208_v45, %v3698_v1  ;;  %v289_v54 = vmax.f32 %v285_v46, %v3698_v1  ;;  %v1726_v59 = vmax.f32 %v3698_v1, %v268_v43 }
  0x29   :  { %v1710_v55 = vmax.f32 %v1706_v47, %v3698_v1  ;;  %v374_v56 = vpack.c.bf16 %v3654_v42, %v371_v48  ;;  %v449_v57 = vmax.f32 %v445_v49, %v3698_v1  ;;  %v1754_v58 = vmax.f32 %v1750_v50, %v3698_v1  ;;  %v3512_v48 = vld [vmem:[%s4162_s2 + $0x38] sm:$0xff]   ;;  %v3505_v49 = vld [vmem:[%s4164_s4 + $0x30] sm:$0xff]  }
  0x2a   :  { %v3602_v63 = vld [vmem:[#allocation22 + $0x18] sm:$0xff]   ;;  %v1774_v0 = vmax.f32 %v1770_v52, %v3698_v1  ;;  %v216_v2 = vmax.f32 %v212_v53, %v3698_v1  ;;  %v293_v3 = vmax.f32 %v289_v54, %v3698_v1  ;;  %v1730_v9 = vmax.f32 %v1726_v59, %v3698_v1 }
  0x2b   :  { %v1714_v4 = vmax.f32 %v1710_v55, %v3698_v1  ;;  %v3603_v6 = vld [vmem:[#allocation22 + $0x68] sm:$0xff]   ;;  %377 = vst [vmem:[#allocation22 + $0x8] sm:$0xf] %v374_v56  ;;  %v452_v7 = vpack.c.bf16 %v3654_v42, %v449_v57  ;;  %v1757_v8 = vpack.c.bf16 %v3654_v42, %v1754_v58  ;;  %v1611_v10 = vmax.f32 %v1607_v51, %v3698_v1 }
  0x2c   :  { %3012 = vmatpush1.bf16.msra.mxu0 %v3602_v63  ;;  %v3604_v11 = vld [vmem:[#allocation22 + $0x10] sm:$0xff]   ;;  %v1777_v12 = vpack.c.bf16 %v3654_v42, %v1774_v0  ;;  %v218_v13 = vpack.c.bf16 %v3654_v42, %v216_v2  ;;  %v296_v14 = vpack.c.bf16 %v3654_v42, %v293_v3  ;;  %3138 = vmatpush1.bf16.msra.mxu1 %v3603_v6  ;;  %v1685_v19 = vunpack.c.h.bf16 %v3876_v38 }
  0x2d   :  { %v1717_v15 = vpack.c.bf16 %v3654_v42, %v1714_v4  ;;  %3013 = vmatprep.subr.bf16.mxu0 %v3653_v5  ;;  %v3605_v16 = vld [vmem:[#allocation22 + $0x60] sm:$0xff]   ;;  %455 = vst [vmem:[#allocation22 + $0xc] sm:$0xf] %v452_v7  ;;  %1760 = vst [vmem:[#allocation22 + $0x58] sm:$0xf] %v1757_v8  ;;  %v1734_v17 = vmax.f32 %v1730_v9, %v3698_v1  ;;  %v1615_v18 = vmax.f32 %v1611_v10, %v3698_v1  ;;  %v3504_v7 = vld [vmem:[%s4162_s2 + $0x30] sm:$0xff]  }
  0x2e   :  { %v1594_v20 = vunpack.c.l.bf16 %v3530_v60  ;;  %3139 = vmatprep.subr.bf16.mxu1 %v3653_v5  ;;  %1780 = vst [vmem:[#allocation22 + $0x5c] sm:$0xf] %v1777_v12  ;;  %221 = vst [vmem:[#allocation22] sm:$0xf] %v218_v13  ;;  %v1672_v21 = vunpack.c.h.bf16 %v3530_v60  ;;  %v1451_v22 = vunpack.c.l.bf16 %v3523_v61  ;;  %v1529_v23 = vunpack.c.h.bf16 %v3523_v61  ;;  %v3497_v13 = vld [vmem:[%s4164_s4 + $0x28] sm:$0xff]  }
  0x2f   :  { %299 = vst [vmem:[#allocation22 + $0x4] sm:$0xf] %v296_v14  ;;  %1720 = vst [vmem:[#allocation22 + $0x50] sm:$0xf] %v1717_v15  ;;  %v1438_v24 = vunpack.c.l.bf16 %v3522_v62  ;;  %v1737_v26 = vpack.c.bf16 %v3654_v42, %v1734_v17  ;;  %v1619_v27 = vmax.f32 %v1615_v18, %v3698_v1  ;;  %v1689_v28 = vmax.f32 %v1685_v19, %v3698_v1 }
  0x30   :  { %v2066_v29 = vmax.f32 %v3698_v1, %v1594_v20  ;;  %3014 = vmatpush1.bf16.msra.mxu0 %v3604_v11  ;;  %v2086_v30 = vmax.f32 %v3698_v1, %v1672_v21  ;;  %v1455_v31 = vmax.f32 %v1451_v22, %v3698_v1  ;;  %v1533_v32 = vmax.f32 %v1529_v23, %v3698_v1  ;;  %v3496_v22 = vld [vmem:[%s4162_s2 + $0x28] sm:$0xff]  }
  0x31   :  { %v1516_v33 = vunpack.c.h.bf16 %v3522_v62  ;;  %3140 = vmatpush1.bf16.msra.mxu1 %v3605_v16  ;;  %3015 = vmatprep.subr.bf16.mxu0 %v3653_v5  ;;  %1740 = vst [vmem:[#allocation22 + $0x54] sm:$0xf] %v1737_v26  ;;  %v1622_v34 = vpack.c.bf16 %v3654_v42, %v1619_v27  ;;  %v1693_v36 = vmax.f32 %v1689_v28, %v3698_v1  ;;  %v1266_v38 = vunpack.c.l.bf16 %v3513_v25 }
  0x32   :  { %v2070_v37 = vmax.f32 %v2066_v29, %v3698_v1  ;;  %3141 = vmatprep.subr.bf16.mxu1 %v3653_v5  ;;  %v2090_v39 = vmax.f32 %v2086_v30, %v3698_v1  ;;  %v1459_v40 = vmax.f32 %v1455_v31, %v3698_v1  ;;  %v1537_v41 = vmax.f32 %v1533_v32, %v3698_v1 }
  0x33   :  { %v2026_v43 = vmax.f32 %v3698_v1, %v1438_v24  ;;  %1625 = vst [vmem:[#allocation22 + $0x48] sm:$0xf] %v1622_v34  ;;  %v1697_v44 = vmax.f32 %v1693_v36, %v3698_v1  ;;  %v2046_v46 = vmax.f32 %v3698_v1, %v1516_v33  ;;  %v1344_v47 = vunpack.c.h.bf16 %v3513_v25  ;;  %v3489_v36 = vld [vmem:[%s4164_s4 + $0x20] sm:$0xff]  }
  0x34   :  { %v2074_v45 = vmax.f32 %v2070_v37, %v3698_v1  ;;  %v3606_v50 = vld [vmem:[#allocation22 + $0x8] sm:$0xff]   ;;  %v2094_v51 = vmax.f32 %v2090_v39, %v3698_v1  ;;  %v1463_v52 = vmax.f32 %v1459_v40, %v3698_v1  ;;  %v1541_v53 = vmax.f32 %v1537_v41, %v3698_v1  ;;  %v3488_v37 = vld [vmem:[%s4162_s2 + $0x20] sm:$0xff]  }
  0x35   :  { %v2030_v54 = vmax.f32 %v2026_v43, %v3698_v1  ;;  %v3607_v55 = vld [vmem:[#allocation22 + $0x58] sm:$0xff]   ;;  %v1700_v56 = vpack.c.bf16 %v3654_v42, %v1697_v44  ;;  %v2050_v58 = vmax.f32 %v2046_v46, %v3698_v1  ;;  %v2387_v59 = vmax.f32 %v3698_v1, %v1266_v38  ;;  %3016 = vmatpush1.bf16.msra.mxu0 %v3606_v50 }
  0x36   :  { %v2077_v57 = vpack.c.bf16 %v3654_v42, %v2074_v45  ;;  %v3608_v60 = vld [vmem:[#allocation22] sm:$0xff]   ;;  %v2097_v61 = vpack.c.bf16 %v3654_v42, %v2094_v51  ;;  %v1466_v62 = vpack.c.bf16 %v3654_v42, %v1463_v52  ;;  %v1544_v63 = vpack.c.bf16 %v3654_v42, %v1541_v53  ;;  %3142 = vmatpush1.bf16.msra.mxu1 %v3607_v55 }
  0x37   :  { %v2034_v0 = vmax.f32 %v2030_v54, %v3698_v1  ;;  %3017 = vmatprep.subr.bf16.mxu0 %v3653_v5  ;;  %1703 = vst [vmem:[#allocation22 + $0x4c] sm:$0xf] %v1700_v56  ;;  %v2054_v2 = vmax.f32 %v2050_v58, %v3698_v1  ;;  %v2391_v3 = vmax.f32 %v2387_v59, %v3698_v1  ;;  %v1250_v6 = vunpack.c.l.bf16 %v3512_v48  ;;  %v3481_v54 = vld [vmem:[%s4164_s4 + $0x18] sm:$0xff]  }
  0x38   :  { %2080 = vst [vmem:[#allocation22 + $0x98] sm:$0xf] %v2077_v57  ;;  %v2407_v4 = vmax.f32 %v3698_v1, %v1344_v47  ;;  %3143 = vmatprep.subr.bf16.mxu1 %v3653_v5  ;;  %v3609_v8 = vld [vmem:[#allocation22 + $0x50] sm:$0xff]   ;;  %2100 = vst [vmem:[#allocation22 + $0x9c] sm:$0xf] %v2097_v61  ;;  %v1328_v10 = vunpack.c.h.bf16 %v3512_v48  ;;  %v1110_v11 = vunpack.c.l.bf16 %v3505_v49  ;;  %v1188_v12 = vunpack.c.h.bf16 %v3505_v49  ;;  %v3480_v59 = vld [vmem:[%s4162_s2 + $0x18] sm:$0xff]  }
  0x39   :  { %1469 = vst [vmem:[#allocation22 + $0x40] sm:$0xf] %v1466_v62  ;;  %1547 = vst [vmem:[#allocation22 + $0x44] sm:$0xf] %v1544_v63  ;;  %v2037_v9 = vpack.c.bf16 %v3654_v42, %v2034_v0  ;;  %v2057_v14 = vpack.c.bf16 %v3654_v42, %v2054_v2  ;;  %v2394_v15 = vpack.c.bf16 %v3654_v42, %v2391_v3  ;;  %3018 = vmatpush1.bf16.msra.mxu0 %v3608_v60  ;;  %v4029_v2 = vld [vmem:[%s4160_s0] ss:$8 sps:$4 sm:$0xff]  }
  0x3a   :  { %v2411_v16 = vmax.f32 %v2407_v4, %v3698_v1  ;;  %v2788_v17 = vmax.f32 %v3698_v1, %v1250_v6  ;;  %v2808_v18 = vmax.f32 %v3698_v1, %v1328_v10  ;;  %v2347_v19 = vmax.f32 %v3698_v1, %v1110_v11  ;;  %3144 = vmatpush1.bf16.msra.mxu1 %v3609_v8  ;;  %v3473_v8 = vld [vmem:[%s4164_s4 + $0x10] sm:$0xff]  }
  0x3b   :  { %2040 = vst [vmem:[#allocation22 + $0x90] sm:$0xf] %v2037_v9  ;;  %v2367_v20 = vmax.f32 %v3698_v1, %v1188_v12  ;;  %v1094_v21 = vunpack.c.l.bf16 %v3504_v7  ;;  %3031 = vmatprep.subr.bf16.mxu0 %v3653_v5  ;;  %2060 = vst [vmem:[#allocation22 + $0x94] sm:$0xf] %v2057_v14  ;;  %v1172_v25 = vunpack.c.h.bf16 %v3504_v7  ;;  %v954_v26 = vunpack.c.l.bf16 %v3497_v13  ;;  %3157 = vmatprep.subr.bf16.mxu1 %v3653_v5 }
  0x3c   :  { %2397 = vst [vmem:[#allocation22 + $0xd8] sm:$0xf] %v2394_v15  ;;  %v2414_v23 = vpack.c.bf16 %v3654_v42, %v2411_v16  ;;  %v2791_v24 = vpack.c.bf16 %v3654_v42, %v2788_v17  ;;  %v2811_v27 = vpack.c.bf16 %v3654_v42, %v2808_v18  ;;  %v2351_v28 = vmax.f32 %v2347_v19, %v3698_v1  ;;  %v3472_v19 = vld [vmem:[%s4162_s2 + $0x10] sm:$0xff]  }
  0x3d   :  { %v2371_v29 = vmax.f32 %v2367_v20, %v3698_v1  ;;  %v2748_v30 = vmax.f32 %v3698_v1, %v1094_v21  ;;  %v2768_v31 = vmax.f32 %v3698_v1, %v1172_v25  ;;  %v1032_v32 = vunpack.c.h.bf16 %v3497_v13 }
  0x3e   :  { %2417 = vst [vmem:[#allocation22 + $0xdc] sm:$0xf] %v2414_v23  ;;  %2794 = vst [vmem:[#allocation22 + $0x128] sm:$0xf] %v2791_v24  ;;  %v2307_v33 = vmax.f32 %v3698_v1, %v954_v26  ;;  %v938_v34 = vunpack.c.l.bf16 %v3496_v22  ;;  %v3610_v38 = vld [vmem:[#allocation22 + $0x48] sm:$0xff]   ;;  %v2354_v39 = vpack.c.bf16 %v3654_v42, %v2351_v28  ;;  %v1016_v43 = vunpack.c.h.bf16 %v3496_v22 }
  0x3f   :  { %2814 = vst [vmem:[#allocation22 + $0x12c] sm:$0xf] %v2811_v27  ;;  %v2374_v40 = vpack.c.bf16 %v3654_v42, %v2371_v29  ;;  %v2751_v41 = vpack.c.bf16 %v3654_v42, %v2748_v30  ;;  %v3611_v44 = vld [vmem:[#allocation22 + $0x98] sm:$0xff]   ;;  %v2771_v45 = vpack.c.bf16 %v3654_v42, %v2768_v31  ;;  %v2327_v47 = vmax.f32 %v3698_v1, %v1032_v32  ;;  %v3465_v24 = vld [vmem:[%s4164_s4 + $0x8] sm:$0xff]  }
  0x40   :  { %v2311_v46 = vmax.f32 %v2307_v33, %v3698_v1  ;;  %v2708_v48 = vmax.f32 %v3698_v1, %v938_v34  ;;  %3032 = vmatpush2.bf16.msra.mxu0 %v3610_v38  ;;  %v3612_v49 = vld [vmem:[#allocation22 + $0x40] sm:$0xff]   ;;  %2357 = vst [vmem:[#allocation22 + $0xd0] sm:$0xf] %v2354_v39  ;;  %v2728_v50 = vmax.f32 %v3698_v1, %v1016_v43  ;;  %v798_v51 = vunpack.c.l.bf16 %v3489_v36  ;;  %v3464_v29 = vld [vmem:[%s4162_s2 + $0x8] sm:$0xff]  }
  0x41   :  { %2377 = vst [vmem:[#allocation22 + $0xd4] sm:$0xf] %v2374_v40  ;;  %2754 = vst [vmem:[#allocation22 + $0x120] sm:$0xf] %v2751_v41  ;;  %v876_v52 = vunpack.c.h.bf16 %v3489_v36  ;;  %v782_v53 = vunpack.c.l.bf16 %v3488_v37  ;;  %3158 = vmatpush2.bf16.msra.mxu1 %v3611_v44  ;;  %3033 = vmatprep.subr.bf16.mxu0 %v3653_v5  ;;  %v2331_v56 = vmax.f32 %v2327_v47, %v3698_v1  ;;  %v860_v58 = vunpack.c.h.bf16 %v3488_v37 }
  0x42   :  { %2774 = vst [vmem:[#allocation22 + $0x124] sm:$0xf] %v2771_v45  ;;  %v2314_v55 = vpack.c.bf16 %v3654_v42, %v2311_v46  ;;  %v2711_v57 = vpack.c.bf16 %v3654_v42, %v2708_v48  ;;  %3159 = vmatprep.subr.bf16.mxu1 %v3653_v5  ;;  %v3613_v60 = vld [vmem:[#allocation22 + $0x90] sm:$0xff]   ;;  %v2731_v61 = vpack.c.bf16 %v3654_v42, %v2728_v50  ;;  %v642_v6 = vunpack.c.l.bf16 %v3481_v54  ;;  %v176_v46 = vld [vmem:[%s4164_s4] sm:$0xff]  }
  0x43   :  { %v2267_v62 = vmax.f32 %v3698_v1, %v798_v51  ;;  %v2287_v63 = vmax.f32 %v3698_v1, %v876_v52  ;;  %v2668_v0 = vmax.f32 %v3698_v1, %v782_v53  ;;  %v2334_v3 = vpack.c.bf16 %v3654_v42, %v2331_v56  ;;  %v161_v51 = vld [vmem:[%s4162_s2] sm:$0xff]  }
  0x44   :  { %2317 = vst [vmem:[#allocation22 + $0xc8] sm:$0xf] %v2314_v55  ;;  %2714 = vst [vmem:[#allocation22 + $0x118] sm:$0xf] %v2711_v57  ;;  %v2688_v4 = vmax.f32 %v3698_v1, %v860_v58  ;;  %v720_v7 = vunpack.c.h.bf16 %v3481_v54  ;;  %3034 = vmatpush2.bf16.msra.mxu0 %v3612_v49  ;;  %v626_v13 = vunpack.c.l.bf16 %v3480_v59  ;;  %v2227_v16 = vmax.f32 %v3698_v1, %v642_v6 }
  0x45   :  { %v3617_v9 = vld [vmem:[#allocation22 + $0xd8] sm:$0xff]   ;;  %2734 = vst [vmem:[#allocation22 + $0x11c] sm:$0xf] %v2731_v61  ;;  %v2271_v10 = vmax.f32 %v2267_v62, %v3698_v1  ;;  %v2291_v11 = vmax.f32 %v2287_v63, %v3698_v1  ;;  %v2671_v12 = vpack.c.bf16 %v3654_v42, %v2668_v0  ;;  %3160 = vmatpush2.bf16.msra.mxu1 %v3613_v60  ;;  %2337 = vst [vmem:[#allocation22 + $0xcc] sm:$0xf] %v2334_v3  ;;  %v3529_v3 = vld [vmem:[%s4164_s4 + $0x48] sm:$0xff]  }
  0x46   :  { %3255 = vmatprep.subr.bf16.mxu0 %v3653_v5  ;;  %v3618_v14 = vld [vmem:[#allocation22 + $0x128] sm:$0xff]   ;;  %v2691_v15 = vpack.c.bf16 %v3654_v42, %v2688_v4  ;;  %v2247_v17 = vmax.f32 %v3698_v1, %v720_v7  ;;  %v704_v18 = vunpack.c.h.bf16 %v3480_v59  ;;  %3381 = vmatprep.subr.bf16.mxu1 %v3653_v5  ;;  %v2628_v22 = vmax.f32 %v3698_v1, %v626_v13 }
  0x47   :  { %v2274_v20 = vpack.c.bf16 %v3654_v42, %v2271_v10  ;;  %v2294_v21 = vpack.c.bf16 %v3654_v42, %v2291_v11  ;;  %2674 = vst [vmem:[#allocation22 + $0x110] sm:$0xf] %v2671_v12  ;;  %v486_v23 = vunpack.c.l.bf16 %v3473_v8  ;;  %3036 = vmatmul.mubr.bf16.vlgmr.msra.gmra.mxu0 %v4029_v2  ;;  %v2231_v25 = vmax.f32 %v2227_v16, %v3698_v1 }
  0x48   :  { %2694 = vst [vmem:[#allocation22 + $0x114] sm:$0xf] %v2691_v15  ;;  %v2251_v26 = vmax.f32 %v2247_v17, %v3698_v1  ;;  %v2648_v27 = vmax.f32 %v3698_v1, %v704_v18  ;;  %v564_v28 = vunpack.c.h.bf16 %v3473_v8  ;;  %3162 = vmatmul.mubr.bf16.vlgmr.msra.gmra.mxu1 %v4029_v2  ;;  %3256 = vmatpush1.bf16.msra.mxu0 %v3617_v9  ;;  %v3619_v30 = vld [vmem:[#allocation22 + $0xd0] sm:$0xff]   ;;  %v470_v33 = vunpack.c.l.bf16 %v3472_v19  ;;  %v3528_v9 = vld [vmem:[%s4162_s2 + $0x48] sm:$0xff]  }
  0x49   :  { %2277 = vst [vmem:[#allocation22 + $0xc0] sm:$0xf] %v2274_v20  ;;  %2297 = vst [vmem:[#allocation22 + $0xc4] sm:$0xf] %v2294_v21  ;;  %v2631_v31 = vpack.c.bf16 %v3654_v42, %v2628_v22  ;;  %v2187_v32 = vmax.f32 %v3698_v1, %v486_v23  ;;  %v548_v34 = vunpack.c.h.bf16 %v3472_v19  ;;  %3382 = vmatpush1.bf16.msra.mxu1 %v3618_v14  ;;  %3257 = vmatprep.subr.bf16.mxu0 %v3653_v5  ;;  %v3620_v36 = vld [vmem:[#allocation22 + $0x120] sm:$0xff]  }
  0x4a   :  { %v2234_v37 = vpack.c.bf16 %v3654_v42, %v2231_v25  ;;  %v2254_v38 = vpack.c.bf16 %v3654_v42, %v2251_v26  ;;  %v2651_v39 = vpack.c.bf16 %v3654_v42, %v2648_v27  ;;  %v330_v40 = vunpack.c.l.bf16 %v3465_v24  ;;  %3383 = vmatprep.subr.bf16.mxu1 %v3653_v5  ;;  %3570 = vmatprep.mubr.msk.bf16.mxu0 %vm2999_vm0, %v3738_v35  ;;  %v3521_v20 = vld [vmem:[%s4164_s4 + $0x40] sm:$0xff]  }
  0x4b   :  { %2634 = vst [vmem:[#allocation22 + $0x108] sm:$0xf] %v2631_v31  ;;  %v2191_v41 = vmax.f32 %v2187_v32, %v3698_v1  ;;  %v2207_v43 = vmax.f32 %v3698_v1, %v564_v28  ;;  %v2588_v44 = vmax.f32 %v3698_v1, %v470_v33  ;;  %v2608_v45 = vmax.f32 %v3698_v1, %v548_v34 }
  0x4c   :  { %2237 = vst [vmem:[#allocation22 + $0xb8] sm:$0xf] %v2234_v37  ;;  %2257 = vst [vmem:[#allocation22 + $0xbc] sm:$0xf] %v2254_v38  ;;  %v408_v47 = vunpack.c.h.bf16 %v3465_v24  ;;  %v2147_v48 = vmax.f32 %v3698_v1, %v330_v40  ;;  %v314_v49 = vunpack.c.l.bf16 %v3464_v29  ;;  %v392_v50 = vunpack.c.h.bf16 %v3464_v29  ;;  %3581 = vmatprep.mubr.msk.bf16.mxu1 %vm2999_vm0, %v3738_v35  ;;  %3258 = vmatpush1.bf16.msra.mxu0 %v3619_v30  ;;  %v3621_v52 = vld [vmem:[#allocation22 + $0xc8] sm:$0xff]   ;;  %v3622_v57 = vld [vmem:[#allocation22 + $0x118] sm:$0xff]  }
  0x4d   :  { %2654 = vst [vmem:[#allocation22 + $0x10c] sm:$0xf] %v2651_v39  ;;  %v2194_v53 = vpack.c.bf16 %v3654_v42, %v2191_v41  ;;  %v2211_v54 = vmax.f32 %v2207_v43, %v3698_v1  ;;  %v2591_v55 = vpack.c.bf16 %v3654_v42, %v2588_v44  ;;  %v2611_v56 = vpack.c.bf16 %v3654_v42, %v2608_v45  ;;  %v3520_v29 = vld [vmem:[%s4162_s2 + $0x40] sm:$0xff]  }
  0x4e   :  { %3384 = vmatpush1.bf16.msra.mxu1 %v3620_v36  ;;  %3259 = vmatprep.subr.bf16.mxu0 %v3653_v5  ;;  %v2151_v58 = vmax.f32 %v2147_v48, %v3698_v1  ;;  %v2167_v59 = vmax.f32 %v3698_v1, %v408_v47  ;;  %v2548_v35 = vmax.f32 %v3698_v1, %v314_v49  ;;  %v177_v60 = vunpack.c.l.bf16 %v176_v46 }
  0x4f   :  { %3385 = vmatprep.subr.bf16.mxu1 %v3653_v5  ;;  %2197 = vst [vmem:[#allocation22 + $0xb0] sm:$0xf] %v2194_v53  ;;  %v2214_v61 = vpack.c.bf16 %v3654_v42, %v2211_v54  ;;  %2594 = vst [vmem:[#allocation22 + $0x100] sm:$0xf] %v2591_v55  ;;  %v2568_v62 = vmax.f32 %v3698_v1, %v392_v50  ;;  %v252_v63 = vunpack.c.h.bf16 %v176_v46  ;;  %v162_v0 = vunpack.c.l.bf16 %v161_v51  ;;  %v3624_v15 = vld [vmem:[#allocation22 + $0x110] sm:$0xff]  }
  0x50   :  { %2614 = vst [vmem:[#allocation22 + $0x104] sm:$0xf] %v2611_v56  ;;  %v2154_v4 = vpack.c.bf16 %v3654_v42, %v2151_v58  ;;  %v2171_v6 = vmax.f32 %v2167_v59, %v3698_v1  ;;  %v2551_v7 = vpack.c.bf16 %v3654_v42, %v2548_v35  ;;  %v2107_v8 = vmax.f32 %v3698_v1, %v177_v60  ;;  %v3623_v10 = vld [vmem:[#allocation22 + $0xc0] sm:$0xff]  }
  0x51   :  { %3260 = vmatpush1.bf16.msra.mxu0 %v3621_v52  ;;  %2217 = vst [vmem:[#allocation22 + $0xb4] sm:$0xf] %v2214_v61  ;;  %v2571_v11 = vpack.c.bf16 %v3654_v42, %v2568_v62  ;;  %v2127_v12 = vmax.f32 %v3698_v1, %v252_v63  ;;  %v236_v13 = vunpack.c.h.bf16 %v161_v51  ;;  %v2508_v14 = vmax.f32 %v3698_v1, %v162_v0 }
  0x52   :  { %3386 = vmatpush1.bf16.msra.mxu1 %v3622_v57  ;;  %3261 = vmatprep.subr.bf16.mxu0 %v3653_v5  ;;  %2157 = vst [vmem:[#allocation22 + $0xa8] sm:$0xf] %v2154_v4  ;;  %v2174_v16 = vpack.c.bf16 %v3654_v42, %v2171_v6  ;;  %2554 = vst [vmem:[#allocation22 + $0xf8] sm:$0xf] %v2551_v7  ;;  %v2111_v17 = vmax.f32 %v2107_v8, %v3698_v1  ;;  %v1578_v18 = vunpack.c.l.bf16 %v3529_v3 }
  0x53   :  { %v1656_v19 = vunpack.c.h.bf16 %v3529_v3  ;;  %3387 = vmatprep.subr.bf16.mxu1 %v3653_v5  ;;  %2574 = vst [vmem:[#allocation22 + $0xfc] sm:$0xf] %v2571_v11  ;;  %v2131_v21 = vmax.f32 %v2127_v12, %v3698_v1  ;;  %v2511_v22 = vpack.c.bf16 %v3654_v42, %v2508_v14  ;;  %v2528_v23 = vmax.f32 %v3698_v1, %v236_v13  ;;  %v3625_v30 = vld [vmem:[#allocation22 + $0xb8] sm:$0xff]  }
  0x54   :  { %v1562_v24 = vunpack.c.l.bf16 %v3528_v9  ;;  %2177 = vst [vmem:[#allocation22 + $0xac] sm:$0xf] %v2174_v16  ;;  %v2114_v25 = vpack.c.bf16 %v3654_v42, %v2111_v17  ;;  %v2467_v26 = vmax.f32 %v3698_v1, %v1578_v18  ;;  %v1640_v28 = vunpack.c.h.bf16 %v3528_v9  ;;  %v3626_v31 = vld [vmem:[#allocation22 + $0x108] sm:$0xff]  }
  0x55   :  { %v2487_v27 = vmax.f32 %v3698_v1, %v1656_v19  ;;  %3262 = vmatpush1.bf16.msra.mxu0 %v3623_v10  ;;  %v2134_v32 = vpack.c.bf16 %v3654_v42, %v2131_v21  ;;  %2514 = vst [vmem:[#allocation22 + $0xf0] sm:$0xf] %v2511_v22  ;;  %v2531_v33 = vpack.c.bf16 %v3654_v42, %v2528_v23  ;;  %v1422_v36 = vunpack.c.l.bf16 %v3521_v20 }
  0x56   :  { %v2868_v34 = vmax.f32 %v3698_v1, %v1562_v24  ;;  %3388 = vmatpush1.bf16.msra.mxu1 %v3624_v15  ;;  %3263 = vmatprep.subr.bf16.mxu0 %v3653_v5  ;;  %2117 = vst [vmem:[#allocation22 + $0xa0] sm:$0xf] %v2114_v25  ;;  %v2471_v37 = vmax.f32 %v2467_v26, %v3698_v1  ;;  %v1500_v40 = vunpack.c.h.bf16 %v3521_v20  ;;  %v1406_v44 = vunpack.c.l.bf16 %v3520_v29 }
  0x57   :  { %v2491_v38 = vmax.f32 %v2487_v27, %v3698_v1  ;;  %v2888_v39 = vmax.f32 %v3698_v1, %v1640_v28  ;;  %3389 = vmatprep.subr.bf16.mxu1 %v3653_v5  ;;  %2137 = vst [vmem:[#allocation22 + $0xa4] sm:$0xf] %v2134_v32  ;;  %2534 = vst [vmem:[#allocation22 + $0xf4] sm:$0xf] %v2531_v33  ;;  %v2427_v43 = vmax.f32 %v3698_v1, %v1422_v36  ;;  %v3628_v54 = vld [vmem:[#allocation22 + $0x100] sm:$0xff]  }
  0x58   :  { %v2871_v41 = vpack.c.bf16 %v3654_v42, %v2868_v34  ;;  %v1484_v45 = vunpack.c.h.bf16 %v3520_v29  ;;  %v2474_v46 = vpack.c.bf16 %v3654_v42, %v2471_v37  ;;  %v2447_v49 = vmax.f32 %v3698_v1, %v1500_v40  ;;  %v3627_v50 = vld [vmem:[#allocation22 + $0xb0] sm:$0xff]  }
  0x59   :  { %v2494_v47 = vpack.c.bf16 %v3654_v42, %v2491_v38  ;;  %v2891_v48 = vpack.c.bf16 %v3654_v42, %v2888_v39  ;;  %3264 = vmatpush1.bf16.msra.mxu0 %v3625_v30  ;;  %v2431_v51 = vmax.f32 %v2427_v43, %v3698_v1  ;;  %v2828_v52 = vmax.f32 %v3698_v1, %v1406_v44 }
  0x5a   :  { %2874 = vst [vmem:[#allocation22 + $0x138] sm:$0xf] %v2871_v41  ;;  %v2848_v53 = vmax.f32 %v3698_v1, %v1484_v45  ;;  %3390 = vmatpush1.bf16.msra.mxu1 %v3626_v31  ;;  %3265 = vmatprep.subr.bf16.mxu0 %v3653_v5  ;;  %2477 = vst [vmem:[#allocation22 + $0xe8] sm:$0xf] %v2474_v46  ;;  %v2451_v55 = vmax.f32 %v2447_v49, %v3698_v1  ;;  %v3630_v60 = vld [vmem:[#allocation22 + $0xf8] sm:$0xff]  }
  0x5b   :  { %2497 = vst [vmem:[#allocation22 + $0xec] sm:$0xf] %v2494_v47  ;;  %2894 = vst [vmem:[#allocation22 + $0x13c] sm:$0xf] %v2891_v48  ;;  %3391 = vmatprep.subr.bf16.mxu1 %v3653_v5  ;;  %v2434_v56 = vpack.c.bf16 %v3654_v42, %v2431_v51  ;;  %v2831_v57 = vpack.c.bf16 %v3654_v42, %v2828_v52  ;;  %v3629_v35 = vld [vmem:[#allocation22 + $0xa8] sm:$0xff]  }
  0x5c   :  { %v2851_v58 = vpack.c.bf16 %v3654_v42, %v2848_v53  ;;  %v2454_v59 = vpack.c.bf16 %v3654_v42, %v2451_v55 }
  0x5d   :  { %3266 = vmatpush1.bf16.msra.mxu0 %v3627_v50  ;;  %2437 = vst [vmem:[#allocation22 + $0xe0] sm:$0xf] %v2434_v56  ;;  %2834 = vst [vmem:[#allocation22 + $0x130] sm:$0xf] %v2831_v57 }
  0x5e   :  { %2854 = vst [vmem:[#allocation22 + $0x134] sm:$0xf] %v2851_v58  ;;  %3392 = vmatpush1.bf16.msra.mxu1 %v3628_v54  ;;  %3267 = vmatprep.subr.bf16.mxu0 %v3653_v5  ;;  %2457 = vst [vmem:[#allocation22 + $0xe4] sm:$0xf] %v2454_v59  ;;  %v3631_v1 = vld [vmem:[#allocation22 + $0xa0] sm:$0xff]   ;;  %v3632_v61 = vld [vmem:[#allocation22 + $0xf0] sm:$0xff]  }
  0x5f   :  { %3393 = vmatprep.subr.bf16.mxu1 %v3653_v5 }
  0x61   :  { %3268 = vmatpush1.bf16.msra.mxu0 %v3629_v35 }
  0x62   :  { %3394 = vmatpush1.bf16.msra.mxu1 %v3630_v60  ;;  %3269 = vmatprep.subr.bf16.mxu0 %v3653_v5  ;;  %v3633_v42 = vld [vmem:[#allocation22 + $0xe8] sm:$0xff]   ;;  %v3634_v62 = vld [vmem:[#allocation22 + $0x138] sm:$0xff]  }
  0x63   :  { %3395 = vmatprep.subr.bf16.mxu1 %v3653_v5 }
  0x65   :  { %3270 = vmatpush1.bf16.msra.mxu0 %v3631_v1  ;;  %v3635_v63 = vld [vmem:[#allocation22 + $0xe0] sm:$0xff]   ;;  %v3636_v0 = vld [vmem:[#allocation22 + $0x130] sm:$0xff]  }
  0x66   :  { %3396 = vmatpush1.bf16.msra.mxu1 %v3632_v61  ;;  %3283 = vmatprep.subr.bf16.mxu0 %v3653_v5 }
  0x67   :  { %3409 = vmatprep.subr.bf16.mxu1 %v3653_v5 }
  0x69   :  { %3284 = vmatpush2.bf16.msra.mxu0 %v3633_v42 }
  0x6a   :  { %3410 = vmatpush2.bf16.msra.mxu1 %v3634_v62  ;;  %3285 = vmatprep.subr.bf16.mxu0 %v3653_v5 }
  0x6b   :  { %3411 = vmatprep.subr.bf16.mxu1 %v3653_v5 }
  0x6d   :  { %3286 = vmatpush2.bf16.msra.mxu0 %v3635_v63 }
  0x6e   :  { %3412 = vmatpush2.bf16.msra.mxu1 %v3636_v0 }
  0x70   :  { %3288 = vmatmul.mubr.bf16.vlgmr.msra.gmra.mxu0 %v4029_v2 }
  0x71   :  { %3414 = vmatmul.mubr.bf16.vlgmr.msra.gmra.mxu1 %v4029_v2 }
  0x83   :  { %v2923_v12 = vpop.permute.xlu0 %2922 }
  0x87   :  { %v2928_v14 = vpop.permute.xlu0 %2927 }
 0x107   :  { %v3037_v3 = vpop.f32.mrf.mxu0 }
 0x108   :  { %v3163_v4 = vpop.f32.mrf.mxu1  ;;  %v3038_v13 = vadd.f32 %v3037_v3, %v2923_v12 }
 0x109   :  { %v3039_v6 = vpop.f32.mrf.mxu0  ;;  %v3164_v15 = vadd.f32 %v3163_v4, %v2923_v12 }
 0x10a   :  { %v3165_v7 = vpop.f32.mrf.mxu1  ;;  %3637 = vtanh.f32 %v3038_v13 }
 0x10b   :  { %v3040_v8 = vpop.f32.mrf.mxu0  ;;  %3639 = vtanh.f32 %v3164_v15 }
 0x10c   :  { %v3166_v9 = vpop.f32.mrf.mxu1  ;;  %v3041_v16 = vadd.f32 %v3040_v8, %v2928_v14 }
 0x10d   :  { %v3042_v10 = vpop.f32.mrf.mxu0  ;;  %v3167_v5 = vadd.f32 %v3166_v9, %v2928_v14 }
 0x10e   :  { %v3168_v11 = vpop.f32.mrf.mxu1  ;;  %3641 = vtanh.f32 %v3041_v16 }
 0x10f   :  { %3643 = vtanh.f32 %v3167_v5 }
 0x117   :  { %v3638_v28 = vpop.eup %3637 }
 0x118   :  { %v3640_v29 = vpop.eup %3639 }
 0x119   :  { %v3172_v32 = vadd.f32 %v3640_v29, %v3638_v28 }
 0x11b   :  { %v3642_v30 = vpop.eup %3641 }
 0x11c   :  { %v3644_v31 = vpop.eup %3643 }
 0x11d   :  { %v3173_v37 = vadd.f32 %v3644_v31, %v3642_v30 }
 0x130   :  { %v3289_v17 = vpop.f32.mrf.mxu0 }
 0x131   :  { %v3290_v18 = vadd.f32 %v3289_v17, %v2923_v12  ;;  %v3415_v2 = vpop.f32.mrf.mxu1 }
 0x132   :  { %v3416_v19 = vadd.f32 %v3415_v2, %v2923_v12  ;;  %v3291_v20 = vpop.f32.mrf.mxu0 }
 0x133   :  { %3645 = vtanh.f32 %v3290_v18  ;;  %v3417_v21 = vpop.f32.mrf.mxu1 }
 0x134   :  { %v3292_v22 = vpop.f32.mrf.mxu0  ;;  %3647 = vtanh.f32 %v3416_v19 }
 0x135   :  { %v3293_v23 = vadd.f32 %v3292_v22, %v2928_v14  ;;  %v3418_v24 = vpop.f32.mrf.mxu1 }
 0x136   :  { %v3419_v25 = vadd.f32 %v3418_v24, %v2928_v14  ;;  %v3294_v26 = vpop.f32.mrf.mxu0 }
 0x137   :  { %3649 = vtanh.f32 %v3293_v23  ;;  %v3420_v27 = vpop.f32.mrf.mxu1 }
 0x138   :  { %3651 = vtanh.f32 %v3419_v25 }
 0x140   :  { %v3646_v33 = vpop.eup %3645 }
 0x141   :  { %v3298_v34 = vadd.f32 %v3646_v33, %v3172_v32  ;;  %v3648_v36 = vpop.eup %3647 }
 0x143   :  { %v3424_v39 = vadd.f32 %v3648_v36, %v3298_v34 }
 0x144   :  { %v3650_v38 = vpop.eup %3649 }
 0x145   :  { %v3299_v40 = vadd.f32 %v3650_v38, %v3173_v37  ;;  %v3652_v41 = vpop.eup %3651  ;;  %v3426_v44 = vmul.f32 0.25, %v3424_v39 }
 0x147   :  { %v3425_v43 = vadd.f32 %v3652_v41, %v3299_v40 }
 0x149   :  { %v3427_v45 = vmul.f32 0.25, %v3425_v43 }
 0x14b   :  { %v3589_v46 = vpack.c.bf16 %v3427_v45, %v3426_v44 }
 0x14d   :  { %3590 = vst [vmem:[%s4167_s7] sm:$0xff] %v3589_v46  }

// kernel: lenet5_forward.5
= control target key start
LH: loop header
LB: loop body
LE: loop exit
PB: predicated region body
PF: predicated region fallthrough
CT: control target
= control target key end

     0   :  { %v1815_v1 = vmov 0   ;;  %vm1327_vm0 = vcmask 15360   ;;  %s2396_s0 = inlined_call_operand.vmem [shape: bf16[512,2], index: 0, kind: input, shape index: {}]   ;;  %s2397_s1 = inlined_call_operand.vmem [shape: bf16[128,512], index: 1, kind: input, shape index: {}]   ;;  %s2398_s2 = inlined_call_operand.vmem [shape: f32[128,1], index: 2, kind: input, shape index: {}]   ;;  %s2399_s4 = inlined_call_operand.vmem [shape: f32[128,1], index: 4, kind: input, shape index: {}]   ;;  %s2400_s6 = inlined_call_operand.vmem [shape: f32[128,1], index: 6, kind: input, shape index: {}]   ;;  %s2401_s3 = inlined_call_operand.vmem [shape: bf16[128,128], index: 3, kind: input, shape index: {}]   ;;  %s2402_s5 = inlined_call_operand.vmem [shape: bf16[128,128], index: 5, kind: input, shape index: {}]   ;;  %s2403_s7 = inlined_call_operand.vmem [shape: f32[128,2], index: 7, kind: output, shape index: {}]  }
   0x1   :  { %v1655_v0 = vld [vmem:[%s2396_s0 + $0x78] sm:$0xff]   ;;  %1653 = vset.pattern.permute.xlu0 %v1815_v1  ;;  %1654 = vset.pattern.permute.xlu1 %v1815_v1  ;;  %v1659_v5 = vld [vmem:[%s2396_s0 + $0x70] sm:$0xff]   ;;  %v1663_v9 = vld [vmem:[%s2396_s0 + $0x68] sm:$0xff]  }
   0x2   :  { %v1656_v2 = vld [vmem:[%s2396_s0 + $0xf8] sm:$0xff]   ;;  %1428 = vmatprep.subr.bf16.mxu0 %v1655_v0  ;;  %v1660_v6 = vld [vmem:[%s2396_s0 + $0xf0] sm:$0xff]   ;;  %v1664_v10 = vld [vmem:[%s2396_s0 + $0xe8] sm:$0xff]  }
   0x3   :  { %v1657_v3 = vld [vmem:[%s2396_s0 + $0x38] sm:$0xff]   ;;  %1492 = vmatprep.subr.bf16.mxu1 %v1656_v2  ;;  %v1661_v7 = vld [vmem:[%s2396_s0 + $0x30] sm:$0xff]   ;;  %v1665_v11 = vld [vmem:[%s2396_s0 + $0x28] sm:$0xff]  }
   0x4   :  { %v1658_v4 = vld [vmem:[%s2396_s0 + $0xb8] sm:$0xff]   ;;  %1429 = vmatpush3.bf16.msra.mxu0 %v1657_v3  ;;  %v1662_v8 = vld [vmem:[%s2396_s0 + $0xb0] sm:$0xff]   ;;  %v1666_v12 = vld [vmem:[%s2396_s0 + $0xa8] sm:$0xff]  }
   0x5   :  { %1493 = vmatpush3.bf16.msra.mxu1 %v1658_v4  ;;  %1430 = vmatprep.subr.bf16.mxu0 %v1659_v5  ;;  %v1667_v13 = vld [vmem:[%s2396_s0 + $0x60] sm:$0xff]   ;;  %v1671_v17 = vld [vmem:[%s2396_s0 + $0x58] sm:$0xff]   ;;  %v1675_v21 = vld [vmem:[%s2396_s0 + $0x50] sm:$0xff]  }
   0x6   :  { %1494 = vmatprep.subr.bf16.mxu1 %v1660_v6  ;;  %v1668_v14 = vld [vmem:[%s2396_s0 + $0xe0] sm:$0xff]   ;;  %v1672_v18 = vld [vmem:[%s2396_s0 + $0xd8] sm:$0xff]   ;;  %v1676_v22 = vld [vmem:[%s2396_s0 + $0xd0] sm:$0xff]  }
   0x7   :  { %v1669_v15 = vld [vmem:[%s2396_s0 + $0x20] sm:$0xff]   ;;  %v1673_v19 = vld [vmem:[%s2396_s0 + $0x18] sm:$0xff]   ;;  %v1677_v23 = vld [vmem:[%s2396_s0 + $0x10] sm:$0xff]  }
   0x8   :  { %1431 = vmatpush3.bf16.msra.mxu0 %v1661_v7  ;;  %v1670_v16 = vld [vmem:[%s2396_s0 + $0xa0] sm:$0xff]   ;;  %v1674_v20 = vld [vmem:[%s2396_s0 + $0x98] sm:$0xff]   ;;  %v1678_v24 = vld [vmem:[%s2396_s0 + $0x90] sm:$0xff]  }
   0x9   :  { %1495 = vmatpush3.bf16.msra.mxu1 %v1662_v8  ;;  %1432 = vmatprep.subr.bf16.mxu0 %v1663_v9  ;;  %v1679_v25 = vld [vmem:[%s2396_s0 + $0x48] sm:$0xff]   ;;  %v1683_v29 = vld [vmem:[%s2396_s0 + $0x40] sm:$0xff]   ;;  %v137_v43 = vld [vmem:[%s2398_s2 + $0x70] sm:$0xff] }
   0xa   :  { %1496 = vmatprep.subr.bf16.mxu1 %v1664_v10  ;;  %v1680_v26 = vld [vmem:[%s2396_s0 + $0xc8] sm:$0xff]   ;;  %v1684_v30 = vld [vmem:[%s2396_s0 + $0xc0] sm:$0xff]   ;;  %211 = vperm.xlu0 %1653, %v137_v43   ;;  %v138_v45 = vld [vmem:[%s2398_s2 + $0x78] sm:$0xff] }
   0xb   :  { %v1681_v27 = vld [vmem:[%s2396_s0 + $0x8] sm:$0xff]   ;;  %v1685_v31 = vld [vmem:[%s2396_s0] sm:$0xff]   ;;  %v133_v51 = vld [vmem:[%s2398_s2 + $0x50] sm:$0xff] }
   0xc   :  { %1433 = vmatpush3.bf16.msra.mxu0 %v1665_v11  ;;  %v1682_v28 = vld [vmem:[%s2396_s0 + $0x88] sm:$0xff]   ;;  %v1686_v32 = vld [vmem:[%s2396_s0 + $0x80] sm:$0xff]   ;;  %v134_v52 = vld [vmem:[%s2398_s2 + $0x58] sm:$0xff] }
   0xd   :  { %1497 = vmatpush3.bf16.msra.mxu1 %v1666_v12  ;;  %1434 = vmatprep.subr.bf16.mxu0 %v1667_v13  ;;  %v1687_v33 = vld [vmem:[%s2397_s1] ss:$16 sps:$4 sm:$0xff]   ;;  %v1689_v34 = vld [vmem:[%s2397_s1 + $0x4] ss:$16 sps:$4 sm:$0xff]   ;;  %v1690_v35 = vld [vmem:[%s2397_s1 + $0x8] ss:$16 sps:$4 sm:$0xff]  }
   0xe   :  { %1498 = vmatprep.subr.bf16.mxu1 %v1668_v14  ;;  %v1692_v36 = vld [vmem:[%s2397_s1 + $0xc] ss:$16 sps:$4 sm:$0xff]   ;;  %603 = vmatprep.mubr.bf16.mxu0 %v1689_v34  ;;  %v1693_v37 = vld [vmem:[%s2397_s1 + $0x24] ss:$16 sps:$4 sm:$0xff]   ;;  %v1697_v39 = vld [vmem:[%s2397_s1 + $0x20] ss:$16 sps:$4 sm:$0xff]  }
   0xf   :  { %700 = vmatprep.mubr.bf16.mxu1 %v1692_v36  ;;  %v1695_v38 = vld [vmem:[%s2397_s1 + $0x2c] ss:$16 sps:$4 sm:$0xff]   ;;  %v1698_v40 = vld [vmem:[%s2397_s1 + $0x28] ss:$16 sps:$4 sm:$0xff]   ;;  %v1699_v41 = vld [vmem:[%s2397_s1 + $0x44] ss:$16 sps:$4 sm:$0xff]   ;;  %216 = vperm.xlu0 %1653, %v138_v45  }
  0x10   :  { %1435 = vmatpush3.bf16.msra.mxu0 %v1669_v15  ;;  %v1701_v42 = vld [vmem:[%s2397_s1 + $0x4c] ss:$16 sps:$4 sm:$0xff]   ;;  %v1703_v44 = vld [vmem:[%s2397_s1 + $0x40] ss:$16 sps:$4 sm:$0xff]   ;;  %v1704_v47 = vld [vmem:[%s2397_s1 + $0x48] ss:$16 sps:$4 sm:$0xff]  }
  0x11   :  { %1499 = vmatpush3.bf16.msra.mxu1 %v1670_v16  ;;  %1436 = vmatprep.subr.bf16.mxu0 %v1671_v17  ;;  %v135_v46 = vld [vmem:[%s2398_s2 + $0x60] sm:$0xff]  ;;  %v1707_v49 = vld [vmem:[%s2397_s1 + $0x6c] ss:$16 sps:$4 sm:$0xff]   ;;  %v1710_v55 = vld [vmem:[%s2397_s1 + $0x68] ss:$16 sps:$4 sm:$0xff]  }
  0x12   :  { %1500 = vmatprep.subr.bf16.mxu1 %v1672_v18  ;;  %v1705_v48 = vld [vmem:[%s2397_s1 + $0x64] ss:$16 sps:$4 sm:$0xff]   ;;  %201 = vperm.xlu1 %1654, %v135_v46   ;;  %v136_v50 = vld [vmem:[%s2398_s2 + $0x68] sm:$0xff]  ;;  %v1709_v53 = vld [vmem:[%s2397_s1 + $0x60] ss:$16 sps:$4 sm:$0xff]  }
  0x13   :  { %191 = vperm.xlu0 %1653, %v133_v51   ;;  %v131_v54 = vld [vmem:[%s2398_s2 + $0x40] sm:$0xff]  ;;  %v1713_v57 = vld [vmem:[%s2397_s1 + $0x8c] ss:$16 sps:$4 sm:$0xff]   ;;  %v129_v59 = vld [vmem:[%s2398_s2 + $0x30] sm:$0xff] }
  0x14   :  { %1437 = vmatpush3.bf16.msra.mxu0 %v1673_v19  ;;  %v1711_v56 = vld [vmem:[%s2397_s1 + $0x84] ss:$16 sps:$4 sm:$0xff]   ;;  %v132_v58 = vld [vmem:[%s2398_s2 + $0x48] sm:$0xff]  ;;  %v130_v60 = vld [vmem:[%s2398_s2 + $0x38] sm:$0xff] }
  0x15   :  { %1501 = vmatpush3.bf16.msra.mxu1 %v1674_v20  ;;  %1438 = vmatprep.subr.bf16.mxu0 %v1675_v21  ;;  %v1715_v61 = vld [vmem:[%s2397_s1 + $0x80] ss:$16 sps:$4 sm:$0xff]   ;;  %v1716_v63 = vld [vmem:[%s2397_s1 + $0x88] ss:$16 sps:$4 sm:$0xff]   ;;  %v1717_v0 = vld [vmem:[%s2397_s1 + $0xa4] ss:$16 sps:$4 sm:$0xff]  }
  0x16   :  { %1502 = vmatprep.subr.bf16.mxu1 %v1676_v22  ;;  %206 = vperm.xlu1 %1654, %v136_v50   ;;  %v127_v62 = vld [vmem:[%s2398_s2 + $0x20] sm:$0xff]  ;;  %v1719_v1 = vld [vmem:[%s2397_s1 + $0xac] ss:$16 sps:$4 sm:$0xff]   ;;  %v125_v3 = vld [vmem:[%s2398_s2 + $0x10] sm:$0xff] }
  0x17   :  { %181 = vperm.xlu0 %1653, %v131_v54   ;;  %v128_v2 = vld [vmem:[%s2398_s2 + $0x28] sm:$0xff]  ;;  %v126_v4 = vld [vmem:[%s2398_s2 + $0x18] sm:$0xff]  ;;  %v1721_v5 = vld [vmem:[%s2397_s1 + $0xa0] ss:$16 sps:$4 sm:$0xff]  }
  0x18   :  { %1439 = vmatpush3.bf16.msra.mxu0 %v1677_v23  ;;  %v123_v6 = vld [vmem:[%s2398_s2] sm:$0xff]  ;;  %v1722_v7 = vld [vmem:[%s2397_s1 + $0xa8] ss:$16 sps:$4 sm:$0xff]   ;;  %v1725_v9 = vld [vmem:[%s2397_s1 + $0xcc] ss:$16 sps:$4 sm:$0xff]  }
  0x19   :  { %1503 = vmatpush3.bf16.msra.mxu1 %v1678_v24  ;;  %1440 = vmatprep.subr.bf16.mxu0 %v1679_v25  ;;  %v1723_v8 = vld [vmem:[%s2397_s1 + $0xc4] ss:$16 sps:$4 sm:$0xff]   ;;  %v124_v10 = vld [vmem:[%s2398_s2 + $0x8] sm:$0xff]  ;;  %v820_v12 = vld [vmem:[%s2399_s4 + $0x78] sm:$0xff] }
  0x1a   :  { %1504 = vmatprep.subr.bf16.mxu1 %v1680_v26  ;;  %196 = vperm.xlu1 %1654, %v134_v52   ;;  %v819_v11 = vld [vmem:[%s2399_s4 + $0x70] sm:$0xff]  ;;  %v817_v14 = vld [vmem:[%s2399_s4 + $0x60] sm:$0xff]  ;;  %v1728_v15 = vld [vmem:[%s2397_s1 + $0xc8] ss:$16 sps:$4 sm:$0xff]  }
  0x1b   :  { %171 = vperm.xlu0 %1653, %v129_v59   ;;  %v1727_v13 = vld [vmem:[%s2397_s1 + $0xc0] ss:$16 sps:$4 sm:$0xff]   ;;  %v1729_v16 = vld [vmem:[%s2397_s1 + $0xe4] ss:$16 sps:$4 sm:$0xff]   ;;  %v1731_v17 = vld [vmem:[%s2397_s1 + $0xec] ss:$16 sps:$4 sm:$0xff]  }
  0x1c   :  { %1441 = vmatpush3.bf16.msra.mxu0 %v1681_v27  ;;  %v818_v18 = vld [vmem:[%s2399_s4 + $0x68] sm:$0xff]  ;;  %v815_v19 = vld [vmem:[%s2399_s4 + $0x50] sm:$0xff]  ;;  %v816_v20 = vld [vmem:[%s2399_s4 + $0x58] sm:$0xff] }
  0x1d   :  { %1505 = vmatpush3.bf16.msra.mxu1 %v1682_v28  ;;  %1442 = vmatprep.subr.bf16.mxu0 %v1683_v29  ;;  %v1733_v21 = vld [vmem:[%s2397_s1 + $0xe0] ss:$16 sps:$4 sm:$0xff]   ;;  %v1734_v23 = vld [vmem:[%s2397_s1 + $0xe8] ss:$16 sps:$4 sm:$0xff]  }
  0x1e   :  { %1506 = vmatprep.subr.bf16.mxu1 %v1684_v30  ;;  %186 = vperm.xlu1 %1654, %v132_v58   ;;  %v813_v22 = vld [vmem:[%s2399_s4 + $0x40] sm:$0xff]  ;;  %v814_v24 = vld [vmem:[%s2399_s4 + $0x48] sm:$0xff]  ;;  %v811_v25 = vld [vmem:[%s2399_s4 + $0x30] sm:$0xff] }
  0x1f   :  { %161 = vperm.xlu0 %1653, %v127_v62   ;;  %v812_v26 = vld [vmem:[%s2399_s4 + $0x38] sm:$0xff]  ;;  %v809_v27 = vld [vmem:[%s2399_s4 + $0x20] sm:$0xff]  ;;  %v810_v28 = vld [vmem:[%s2399_s4 + $0x28] sm:$0xff] }
  0x20   :  { %1443 = vmatpush3.bf16.msra.mxu0 %v1685_v31  ;;  %v807_v29 = vld [vmem:[%s2399_s4 + $0x10] sm:$0xff]  ;;  %v808_v30 = vld [vmem:[%s2399_s4 + $0x18] sm:$0xff]  ;;  %v805_v31 = vld [vmem:[%s2399_s4] sm:$0xff] }
  0x21   :  { %1507 = vmatpush3.bf16.msra.mxu1 %v1686_v32  ;;  %v806_v32 = vld [vmem:[%s2399_s4 + $0x8] sm:$0xff]  ;;  %v1089_v36 = vld [vmem:[%s2400_s6 + $0x18] sm:$0xff]  ;;  %v1096_v43 = vld [vmem:[%s2400_s6 + $0x50] sm:$0xff] }
  0x22   :  { %176 = vperm.xlu1 %1654, %v130_v60   ;;  %v1087_v34 = vld [vmem:[%s2400_s6 + $0x8] sm:$0xff]  ;;  %v1098_v45 = vld [vmem:[%s2400_s6 + $0x60] sm:$0xff] }
  0x23   :  { %604 = vmatmul.mubr.bf16.vlgmr.msra.gmra.mxu0 %v1687_v33  ;;  %151 = vperm.xlu0 %1653, %v125_v3   ;;  %v1086_v33 = vld [vmem:[%s2400_s6] sm:$0xff]  ;;  %v1099_v46 = vld [vmem:[%s2400_s6 + $0x68] sm:$0xff] }
  0x24   :  { %701 = vmatmul.mubr.bf16.vlgmr.msra.gmra.mxu1 %v1690_v35  ;;  %611 = vmatprep.mubr.bf16.mxu0 %v1693_v37  ;;  %v1088_v35 = vld [vmem:[%s2400_s6 + $0x10] sm:$0xff]  ;;  %v1090_v37 = vld [vmem:[%s2400_s6 + $0x20] sm:$0xff] }
  0x25   :  { %708 = vmatprep.mubr.bf16.mxu1 %v1695_v38  ;;  %v1091_v38 = vld [vmem:[%s2400_s6 + $0x28] sm:$0xff]  ;;  %v1735_v58 = vld [vmem:[%s2401_s3] sm:$0xff]  }
  0x26   :  { %166 = vperm.xlu1 %1654, %v128_v2  }
  0x27   :  { %141 = vperm.xlu0 %1653, %v123_v6  }
  0x2a   :  { %156 = vperm.xlu1 %1654, %v126_v4  }
  0x2b   :  { %612 = vmatmul.mubr.bf16.gmra.mxu0 %v1697_v39  ;;  %893 = vperm.xlu0 %1653, %v819_v11   ;;  %v1092_v39 = vld [vmem:[%s2400_s6 + $0x30] sm:$0xff] }
  0x2c   :  { %709 = vmatmul.mubr.bf16.gmra.mxu1 %v1698_v40  ;;  %619 = vmatprep.mubr.bf16.mxu0 %v1699_v41  ;;  %v1093_v40 = vld [vmem:[%s2400_s6 + $0x38] sm:$0xff]  ;;  %v1094_v41 = vld [vmem:[%s2400_s6 + $0x40] sm:$0xff] }
  0x2d   :  { %716 = vmatprep.mubr.bf16.mxu1 %v1701_v42  ;;  %v1095_v42 = vld [vmem:[%s2400_s6 + $0x48] sm:$0xff] }
  0x2e   :  { %146 = vperm.xlu1 %1654, %v124_v10  }
  0x2f   :  { %883 = vperm.xlu0 %1653, %v817_v14  }
  0x32   :  { %898 = vperm.xlu1 %1654, %v820_v12  }
  0x33   :  { %620 = vmatmul.mubr.bf16.gmra.mxu0 %v1703_v44  ;;  %873 = vperm.xlu0 %1653, %v815_v19   ;;  %v1097_v44 = vld [vmem:[%s2400_s6 + $0x58] sm:$0xff] }
  0x34   :  { %717 = vmatmul.mubr.bf16.gmra.mxu1 %v1704_v47  ;;  %627 = vmatprep.mubr.bf16.mxu0 %v1705_v48  ;;  %v1100_v47 = vld [vmem:[%s2400_s6 + $0x70] sm:$0xff]  ;;  %v1101_v48 = vld [vmem:[%s2400_s6 + $0x78] sm:$0xff] }
  0x35   :  { %724 = vmatprep.mubr.bf16.mxu1 %v1707_v49 }
  0x36   :  { %888 = vperm.xlu1 %1654, %v818_v18  }
  0x37   :  { %863 = vperm.xlu0 %1653, %v813_v22  }
  0x3a   :  { %878 = vperm.xlu1 %1654, %v816_v20  }
  0x3b   :  { %628 = vmatmul.mubr.bf16.gmra.mxu0 %v1709_v53  ;;  %853 = vperm.xlu0 %1653, %v811_v25  }
  0x3c   :  { %725 = vmatmul.mubr.bf16.gmra.mxu1 %v1710_v55  ;;  %635 = vmatprep.mubr.bf16.mxu0 %v1711_v56 }
  0x3d   :  { %732 = vmatprep.mubr.bf16.mxu1 %v1713_v57 }
  0x3e   :  { %868 = vperm.xlu1 %1654, %v814_v24  }
  0x3f   :  { %843 = vperm.xlu0 %1653, %v809_v27  }
  0x42   :  { %858 = vperm.xlu1 %1654, %v812_v26  }
  0x43   :  { %636 = vmatmul.mubr.bf16.gmra.mxu0 %v1715_v61  ;;  %833 = vperm.xlu0 %1653, %v807_v29  }
  0x44   :  { %733 = vmatmul.mubr.bf16.gmra.mxu1 %v1716_v63  ;;  %643 = vmatprep.mubr.bf16.mxu0 %v1717_v0 }
  0x45   :  { %740 = vmatprep.mubr.bf16.mxu1 %v1719_v1 }
  0x46   :  { %848 = vperm.xlu1 %1654, %v810_v28  }
  0x47   :  { %823 = vperm.xlu0 %1653, %v805_v31  }
  0x4a   :  { %838 = vperm.xlu1 %1654, %v808_v30  }
  0x4b   :  { %644 = vmatmul.mubr.bf16.gmra.mxu0 %v1721_v5  ;;  %1104 = vperm.xlu0 %1653, %v1086_v33  }
  0x4c   :  { %741 = vmatmul.mubr.bf16.gmra.mxu1 %v1722_v7  ;;  %651 = vmatprep.mubr.bf16.mxu0 %v1723_v8 }
  0x4d   :  { %748 = vmatprep.mubr.bf16.mxu1 %v1725_v9 }
  0x4e   :  { %828 = vperm.xlu1 %1654, %v806_v32  }
  0x4f   :  { %1114 = vperm.xlu0 %1653, %v1088_v35  }
  0x52   :  { %1109 = vperm.xlu1 %1654, %v1087_v34  }
  0x53   :  { %652 = vmatmul.mubr.bf16.gmra.mxu0 %v1727_v13  ;;  %1124 = vperm.xlu0 %1653, %v1090_v37  }
  0x54   :  { %749 = vmatmul.mubr.bf16.gmra.mxu1 %v1728_v15  ;;  %659 = vmatprep.mubr.bf16.mxu0 %v1729_v16 }
  0x55   :  { %756 = vmatprep.mubr.bf16.mxu1 %v1731_v17 }
  0x56   :  { %1119 = vperm.xlu1 %1654, %v1089_v36  }
  0x57   :  { %1134 = vperm.xlu0 %1653, %v1092_v39  }
  0x5a   :  { %1129 = vperm.xlu1 %1654, %v1091_v38  }
  0x5b   :  { %660 = vmatmul.mubr.bf16.gmra.mxu0 %v1733_v21  ;;  %1144 = vperm.xlu0 %1653, %v1094_v41  }
  0x5c   :  { %757 = vmatmul.mubr.bf16.gmra.mxu1 %v1734_v23  ;;  %1604 = vmatprep.mubr.bf16.mxu0 %v1735_v58 }
  0x5e   :  { %1139 = vperm.xlu1 %1654, %v1093_v40  }
  0x5f   :  { %1154 = vperm.xlu0 %1653, %v1096_v43  }
  0x62   :  { %1149 = vperm.xlu1 %1654, %v1095_v42  }
  0x63   :  { %1164 = vperm.xlu0 %1653, %v1098_v45  }
  0x66   :  { %1159 = vperm.xlu1 %1654, %v1097_v44  }
  0x67   :  { %1174 = vperm.xlu0 %1653, %v1100_v47  }
  0x6a   :  { %1169 = vperm.xlu1 %1654, %v1099_v46  }
  0x6e   :  { %1179 = vperm.xlu1 %1654, %v1101_v48  }
  0x85   :  { %v2192_v49 = vpop.permute.xlu0 %211 }
  0x8a   :  { %v2196_v51 = vpop.permute.xlu0 %216 }
  0x8d   :  { %v2194_v50 = vpop.permute.xlu1 %201 }
  0x8e   :  { %v2200_v53 = vpop.permute.xlu0 %191 }
  0x91   :  { %v2198_v52 = vpop.permute.xlu1 %206 }
  0x92   :  { %v2204_v55 = vpop.permute.xlu0 %181 }
  0x95   :  { %v2202_v54 = vpop.permute.xlu1 %196 }
  0x96   :  { %v2208_v57 = vpop.permute.xlu0 %171 }
  0x99   :  { %v2206_v56 = vpop.permute.xlu1 %186 }
  0x9a   :  { %v162_v60 = vpop.permute.xlu0 %161 }
  0x9d   :  { %v2213_v59 = vpop.permute.xlu1 %176 }
  0x9e   :  { %v152_v62 = vpop.permute.xlu0 %151 }
  0xa1   :  { %v2215_v61 = vpop.permute.xlu1 %166 }
  0xa2   :  { %v142_v5 = vpop.permute.xlu0 %141 }
  0xa5   :  { %v157_v1 = vpop.permute.xlu1 %156 }
  0xa9   :  { %v147_v14 = vpop.permute.xlu1 %146 }
  0xe3   :  { %v1444_v63 = vpop.f32.mrf.mxu0 }
  0xe4   :  { %v1508_v0 = vpop.f32.mrf.mxu1 }
  0xe5   :  { %v1445_v2 = vpop.f32.mrf.mxu0 }
  0xe6   :  { %v1446_v3 = vadd.f32 %v1445_v2, %v1444_v63  ;;  %v1509_v4 = vpop.f32.mrf.mxu1 }
  0xe7   :  { %v1510_v6 = vadd.f32 %v1509_v4, %v1508_v0  ;;  %v1447_v7 = vpop.f32.mrf.mxu0 }
  0xe8   :  { %v606_v8 = vadd.f32 %v1446_v3, %v142_v5  ;;  %v1511_v9 = vpop.f32.mrf.mxu1 }
  0xe9   :  { %v1448_v10 = vpop.f32.mrf.mxu0 }
  0xea   :  { %v703_v11 = vadd.f32 %v1510_v6, %v606_v8  ;;  %v1449_v12 = vadd.f32 %v1448_v10, %v1447_v7  ;;  %v1512_v13 = vpop.f32.mrf.mxu1 }
  0xeb   :  { %v1513_v15 = vadd.f32 %v1512_v13, %v1511_v9  ;;  %v1450_v16 = vpop.f32.mrf.mxu0 }
  0xec   :  { %v609_v17 = vadd.f32 %v1449_v12, %v147_v14  ;;  %v1514_v18 = vpop.f32.mrf.mxu1  ;;  %1751 = vtanh.f32 %v703_v11 }
  0xed   :  { %v1451_v19 = vpop.f32.mrf.mxu0 }
  0xee   :  { %v706_v20 = vadd.f32 %v1513_v15, %v609_v17  ;;  %v1452_v21 = vadd.f32 %v1451_v19, %v1450_v16  ;;  %v1515_v22 = vpop.f32.mrf.mxu1 }
  0xef   :  { %v1516_v23 = vadd.f32 %v1515_v22, %v1514_v18  ;;  %v1453_v24 = vpop.f32.mrf.mxu0 }
  0xf0   :  { %1753 = vtanh.f32 %v706_v20  ;;  %v614_v25 = vadd.f32 %v1452_v21, %v152_v62  ;;  %v1517_v26 = vpop.f32.mrf.mxu1 }
  0xf1   :  { %v1454_v27 = vpop.f32.mrf.mxu0 }
  0xf2   :  { %v711_v28 = vadd.f32 %v1516_v23, %v614_v25  ;;  %v1455_v29 = vadd.f32 %v1454_v27, %v1453_v24  ;;  %v1518_v30 = vpop.f32.mrf.mxu1 }
  0xf3   :  { %v1519_v31 = vadd.f32 %v1518_v30, %v1517_v26  ;;  %v1456_v32 = vpop.f32.mrf.mxu0 }
  0xf4   :  { %v617_v33 = vadd.f32 %v1455_v29, %v157_v1  ;;  %v1520_v34 = vpop.f32.mrf.mxu1  ;;  %1755 = vtanh.f32 %v711_v28 }
  0xf5   :  { %v1457_v35 = vpop.f32.mrf.mxu0 }
  0xf6   :  { %v714_v36 = vadd.f32 %v1519_v31, %v617_v33  ;;  %v1458_v37 = vadd.f32 %v1457_v35, %v1456_v32  ;;  %v1521_v38 = vpop.f32.mrf.mxu1 }
  0xf7   :  { %v2217_v39 = vpop.f32.mrf.mxu0  ;;  %v1522_v41 = vadd.f32 %v1521_v38, %v1520_v34 }
  0xf8   :  { %1757 = vtanh.f32 %v714_v36  ;;  %v622_v40 = vadd.f32 %v1458_v37, %v162_v60  ;;  %v2219_v42 = vpop.f32.mrf.mxu1 }
  0xf9   :  { %2406 = vst [vmem:[#allocation2_spill] sm:$0xff] %v2219_v42  ;;  %v2221_v43 = vpop.f32.mrf.mxu0  ;;  %v1752_v47 = vpop.eup %1751 }
  0xfa   :  { %v2223_v44 = vadd.f32 %v1522_v41, %v622_v40  ;;  %v2225_v45 = vpop.f32.mrf.mxu1 }
  0xfb   :  { %2408 = vst [vmem:[#allocation4_spill] sm:$0xff] %v2225_v45  ;;  %v2227_v46 = vpop.f32.mrf.mxu0 }
  0xfc   :  { %2407 = vst [vmem:[#allocation3_spill] sm:$0xff] %v2223_v44  ;;  %v2229_v48 = vpop.f32.mrf.mxu1 }
  0xfd   :  { %v1754_v58 = vpop.eup %1753  ;;  %v2231_v62 = vpop.f32.mrf.mxu0 }
  0xfe   :  { %v2233_v63 = vpop.f32.mrf.mxu1  ;;  %v2235_v60 = vpack.c.bf16 %v1754_v58, %v1752_v47 }
  0xff   :  { %v2237_v0 = vpop.f32.mrf.mxu0 }
 0x100   :  { %2409 = vst [vmem:[#allocation5_spill] sm:$0xff] %v2235_v60  ;;  %v2239_v1 = vpop.f32.mrf.mxu1 }
 0x101   :  { %v1466_v2 = vpop.f32.mrf.mxu0  ;;  %v1756_v5 = vpop.eup %1755 }
 0x102   :  { %v2241_v3 = vpop.f32.mrf.mxu1 }
 0x103   :  { %v1468_v4 = vpop.f32.mrf.mxu0 }
 0x104   :  { %v2243_v6 = vpop.f32.mrf.mxu1 }
 0x105   :  { %v1758_v7 = vpop.eup %1757  ;;  %v1469_v8 = vpop.f32.mrf.mxu0 }
 0x106   :  { %v2245_v9 = vpop.f32.mrf.mxu1  ;;  %v2247_v10 = vpack.c.bf16 %v1758_v7, %v1756_v5 }
 0x107   :  { %v1471_v11 = vpop.f32.mrf.mxu0 }
 0x108   :  { %2410 = vst [vmem:[#allocation6_spill] sm:$0xff] %v2247_v10  ;;  %v1535_v12 = vpop.f32.mrf.mxu1 }
 0x109   :  { %v1472_v13 = vpop.f32.mrf.mxu0 }
 0x10a   :  { %v1536_v14 = vpop.f32.mrf.mxu1  ;;  %v1473_v42 = vadd.f32 %v1472_v13, %v1471_v11 }
 0x10b   :  { %v1474_v15 = vpop.f32.mrf.mxu0 }
 0x10c   :  { %v1538_v16 = vpop.f32.mrf.mxu1 }
 0x10d   :  { %v1475_v17 = vpop.f32.mrf.mxu0 }
 0x10e   :  { %v1539_v18 = vpop.f32.mrf.mxu1  ;;  %v1476_v7 = vadd.f32 %v1475_v17, %v1474_v15 }
 0x10f   :  { %v1477_v19 = vpop.f32.mrf.mxu0  ;;  %v1540_v11 = vadd.f32 %v1539_v18, %v1538_v16 }
 0x110   :  { %v1541_v20 = vpop.f32.mrf.mxu1 }
 0x111   :  { %v1478_v21 = vpop.f32.mrf.mxu0 }
 0x112   :  { %v1542_v22 = vpop.f32.mrf.mxu1  ;;  %v1479_v41 = vadd.f32 %v1478_v21, %v1477_v19  ;;  %v1470_v21 = vadd.f32 %v1469_v8, %v1468_v4 }
 0x113   :  { %v1480_v23 = vpop.f32.mrf.mxu0 }
 0x114   :  { %v1544_v24 = vpop.f32.mrf.mxu1 }
 0x115   :  { %v1481_v25 = vpop.f32.mrf.mxu0 }
 0x116   :  { %v1545_v26 = vpop.f32.mrf.mxu1  ;;  %v1482_v35 = vadd.f32 %v1481_v25, %v1480_v23 }
 0x117   :  { %v1483_v27 = vpop.f32.mrf.mxu0  ;;  %v1546_v25 = vadd.f32 %v1545_v26, %v1544_v24 }
 0x118   :  { %v1547_v28 = vpop.f32.mrf.mxu1 }
 0x119   :  { %v1484_v29 = vpop.f32.mrf.mxu0 }
 0x11a   :  { %v1485_v30 = vadd.f32 %v1484_v29, %v1483_v27  ;;  %v1548_v31 = vpop.f32.mrf.mxu1  ;;  %v654_v27 = vadd.f32 %v1482_v35, %v2194_v50  ;;  %v1467_v50 = vadd.f32 %v1466_v2, %v2237_v0  ;;  %v1534_v0 = vadd.f32 %v2245_v9, %v2243_v6  ;;  %v2414_v35 = vld [vmem:[#allocation6_spill] sm:$0xff] }
 0x11b   :  { %v1486_v32 = vpop.f32.mrf.mxu0  ;;  %v1549_v47 = vadd.f32 %v1548_v31, %v1547_v28  ;;  %v1543_v28 = vadd.f32 %v1542_v22, %v1541_v20  ;;  %v1528_v2 = vadd.f32 %v2233_v63, %v2229_v48  ;;  %v2413_v48 = vld [vmem:[#allocation3_spill] sm:$0xff] }
 0x11c   :  { %v1550_v33 = vpop.f32.mrf.mxu1  ;;  %v657_v36 = vadd.f32 %v1485_v30, %v2198_v52  ;;  %v649_v52 = vadd.f32 %v1479_v41, %v2202_v54  ;;  %v751_v15 = vadd.f32 %v1546_v25, %v654_v27  ;;  %v1464_v54 = vadd.f32 %v2231_v62, %v2227_v46  ;;  %v1739_v41 = vld [vmem:[%s2401_s3 + $0x20] sm:$0xff]   ;;  %v899_v25 = vpop.permute.xlu1 %898 }
 0x11d   :  { %v1487_v34 = vpop.f32.mrf.mxu0  ;;  %v633_v4 = vadd.f32 %v1467_v50, %v2213_v59  ;;  %v1531_v46 = vadd.f32 %v2241_v3, %v2239_v1  ;;  %v2411_v59 = vld [vmem:[#allocation2_spill] sm:$0xff] }
 0x11e   :  { %v1488_v37 = vadd.f32 %v1487_v34, %v1486_v32  ;;  %v1551_v38 = vpop.f32.mrf.mxu1  ;;  %v754_v29 = vadd.f32 %v1549_v47, %v657_v36  ;;  %v2415_v36 = vld [vmem:[#allocation5_spill] sm:$0xff]  ;;  %v1740_v47 = vld [vmem:[%s2401_s3 + $0x28] sm:$0xff]  }
 0x11f   :  { %v1489_v40 = vpop.f32.mrf.mxu0  ;;  %v1552_v60 = vadd.f32 %v1551_v38, %v1550_v33  ;;  %v1737_v38 = vld [vmem:[%s2401_s3 + $0x10] sm:$0xff]  }
 0x120   :  { %v662_v58 = vadd.f32 %v1488_v37, %v2192_v49  ;;  %v1553_v5 = vpop.f32.mrf.mxu1  ;;  %v646_v49 = vadd.f32 %v1476_v7, %v2200_v53  ;;  %1759 = vtanh.f32 %v754_v29  ;;  %v1461_v53 = vadd.f32 %v2221_v43, %v2217_v39  ;;  %v2412_v43 = vld [vmem:[#allocation4_spill] sm:$0xff]  ;;  %v1736_v37 = vld [vmem:[%s2401_s3 + $0x8] sm:$0xff]   ;;  %v1743_v7 = vld [vmem:[%s2402_s5] sm:$0xff]  }
 0x121   :  { %v1490_v10 = vpop.f32.mrf.mxu0  ;;  %v730_v39 = vadd.f32 %v1531_v46, %v633_v4  ;;  %v1525_v8 = vadd.f32 %v2412_v43, %v2411_v59  ;;  %1636 = vmatprep.mubr.bf16.mxu1 %v1743_v7 }
 0x122   :  { %v1491_v44 = vadd.f32 %v1490_v10, %v1489_v40  ;;  %v1554_v45 = vpop.f32.mrf.mxu1  ;;  %v759_v23 = vadd.f32 %v1552_v60, %v662_v58  ;;  %v641_v10 = vadd.f32 %v1473_v42, %v2206_v56  ;;  %v746_v60 = vadd.f32 %v1543_v28, %v649_v52  ;;  %v1738_v40 = vld [vmem:[%s2401_s3 + $0x18] sm:$0xff]   ;;  %v1741_v58 = vld [vmem:[%s2401_s3 + $0x30] sm:$0xff]   ;;  %v889_v28 = vpop.permute.xlu1 %888 }
 0x123   :  { %v1555_v19 = vadd.f32 %v1554_v45, %v1553_v5  ;;  %v743_v45 = vadd.f32 %v1540_v11, %v646_v49  ;;  %v630_v42 = vadd.f32 %v1464_v54, %v2208_v57  ;;  %v1742_v5 = vld [vmem:[%s2401_s3 + $0x38] sm:$0xff]  }
 0x124   :  { %v665_v30 = vadd.f32 %v1491_v44, %v2196_v51  ;;  %1761 = vtanh.f32 %v759_v23  ;;  %v638_v51 = vadd.f32 %v1470_v21, %v2204_v55  ;;  %v1537_v44 = vadd.f32 %v1536_v14, %v1535_v12 }
 0x125   :  { %v625_v55 = vadd.f32 %v1461_v53, %v2215_v61  ;;  %v727_v6 = vadd.f32 %v1528_v2, %v630_v42 }
 0x126   :  { %v762_v17 = vadd.f32 %v1555_v19, %v665_v30  ;;  %v738_v56 = vadd.f32 %v1537_v44, %v641_v10  ;;  %v735_v62 = vadd.f32 %v1534_v0, %v638_v51  ;;  %v894_v19 = vpop.permute.xlu0 %893  ;;  %v879_v11 = vpop.permute.xlu1 %878 }
 0x127   :  { %v722_v57 = vadd.f32 %v1525_v8, %v625_v55 }
 0x128   :  { %1763 = vtanh.f32 %v762_v17 }
 0x129   :  { %1765 = vtanh.f32 %v751_v15 }
 0x12a   :  { %1767 = vtanh.f32 %v746_v60  ;;  %v884_v17 = vpop.permute.xlu0 %883 }
 0x12b   :  { %1769 = vtanh.f32 %v743_v45  ;;  %v869_v45 = vpop.permute.xlu1 %868 }
 0x12c   :  { %1771 = vtanh.f32 %v738_v56 }
 0x12d   :  { %1773 = vtanh.f32 %v735_v62  ;;  %v1760_v9 = vpop.eup %1759 }
 0x12e   :  { %1775 = vtanh.f32 %v730_v39  ;;  %v874_v54 = vpop.permute.xlu0 %873 }
 0x12f   :  { %1777 = vtanh.f32 %v727_v6  ;;  %v859_v39 = vpop.permute.xlu1 %858 }
 0x130   :  { %1779 = vtanh.f32 %v722_v57 }
 0x131   :  { %v1762_v12 = vpop.eup %1761  ;;  %1781 = vtanh.f32 %v2413_v48 }
 0x132   :  { %v864_v0 = vpop.permute.xlu0 %863 }
 0x135   :  { %v1764_v13 = vpop.eup %1763 }
 0x136   :  { %v804_v1 = vpack.c.bf16 %v1764_v13, %v1762_v12  ;;  %v1766_v3 = vpop.eup %1765  ;;  %v854_v43 = vpop.permute.xlu0 %853 }
 0x137   :  { %v803_v61 = vpack.c.bf16 %v1760_v9, %v1766_v3  ;;  %v1768_v14 = vpop.eup %1767  ;;  %v849_v9 = vpop.permute.xlu1 %848 }
 0x138   :  { %1588 = vmatprep.subr.bf16.mxu0 %v804_v1  ;;  %v1770_v63 = vpop.eup %1769 }
 0x139   :  { %1589 = vmatpush3.bf16.msra.mxu0 %v804_v1  ;;  %v802_v16 = vpack.c.bf16 %v1768_v14, %v1770_v63  ;;  %v1772_v18 = vpop.eup %1771 }
 0x13a   :  { %1590 = vmatprep.subr.bf16.mxu0 %v803_v61  ;;  %v1774_v20 = vpop.eup %1773  ;;  %v844_v57 = vpop.permute.xlu0 %843 }
 0x13b   :  { %v801_v22 = vpack.c.bf16 %v1772_v18, %v1774_v20  ;;  %v1776_v24 = vpop.eup %1775  ;;  %v839_v14 = vpop.permute.xlu1 %838 }
 0x13c   :  { %v1778_v26 = vpop.eup %1777 }
 0x13d   :  { %1591 = vmatpush3.bf16.msra.mxu0 %v803_v61  ;;  %v800_v31 = vpack.c.bf16 %v1776_v24, %v1778_v26  ;;  %v1780_v32 = vpop.eup %1779 }
 0x13e   :  { %1592 = vmatprep.subr.bf16.mxu0 %v802_v16  ;;  %v1782_v33 = vpop.eup %1781  ;;  %v834_v20 = vpop.permute.xlu0 %833 }
 0x13f   :  { %v799_v34 = vpack.c.bf16 %v1780_v32, %v1782_v33  ;;  %v829_v33 = vpop.permute.xlu1 %828 }
 0x141   :  { %1593 = vmatpush3.bf16.msra.mxu0 %v802_v16 }
 0x142   :  { %1594 = vmatprep.subr.bf16.mxu0 %v801_v22 }
 0x145   :  { %1595 = vmatpush3.bf16.msra.mxu0 %v801_v22 }
 0x146   :  { %1596 = vmatprep.subr.bf16.mxu0 %v800_v31 }
 0x149   :  { %1597 = vmatpush3.bf16.msra.mxu0 %v800_v31 }
 0x14a   :  { %1598 = vmatprep.subr.bf16.mxu0 %v799_v34 }
 0x14d   :  { %1599 = vmatpush3.bf16.msra.mxu0 %v799_v34 }
 0x14e   :  { %1600 = vmatprep.subr.bf16.mxu0 %v2414_v35 }
 0x151   :  { %1601 = vmatpush3.bf16.msra.mxu0 %v2414_v35 }
 0x152   :  { %1602 = vmatprep.subr.bf16.mxu0 %v2415_v36 }
 0x155   :  { %1603 = vmatpush3.bf16.msra.mxu0 %v2415_v36 }
 0x158   :  { %1605 = vmatmul.mubr.bf16.vlgmr.msra.gmra.mxu0 %v1736_v37  ;;  %v824_v37 = vpop.permute.xlu0 %823 }
 0x159   :  { %1608 = vmatprep.mubr.bf16.mxu0 %v1737_v38 }
 0x160   :  { %1609 = vmatmul.mubr.bf16.gmra.mxu0 %v1738_v40 }
 0x161   :  { %1612 = vmatprep.mubr.bf16.mxu0 %v1739_v41 }
 0x168   :  { %1613 = vmatmul.mubr.bf16.gmra.mxu0 %v1740_v47 }
 0x169   :  { %1616 = vmatprep.mubr.bf16.mxu0 %v1741_v58 }
 0x170   :  { %1617 = vmatmul.mubr.bf16.gmra.mxu0 %v1742_v5 }
 0x218   :  { %v2302_v27 = vpop.f32.mrf.mxu0 }
 0x219   :  { %v992_v31 = vadd.f32 %v2302_v27, %v834_v20 }
 0x21a   :  { %v2304_v29 = vpop.f32.mrf.mxu0 }
 0x21b   :  { %v984_v38 = vadd.f32 %v2304_v29, %v824_v37 }
 0x21c   :  { %v1607_v23 = vpop.f32.mrf.mxu0 }
 0x21d   :  { %v995_v22 = vadd.f32 %v1607_v23, %v839_v14 }
 0x21e   :  { %v2306_v52 = vpop.f32.mrf.mxu0 }
 0x21f   :  { %v987_v34 = vadd.f32 %v2306_v52, %v829_v33 }
 0x220   :  { %v1610_v30 = vpop.f32.mrf.mxu0 }
 0x221   :  { %v1008_v13 = vadd.f32 %v1610_v30, %v854_v43 }
 0x222   :  { %v999_v21 = vpop.f32.mrf.mxu0 }
 0x223   :  { %v1000_v63 = vadd.f32 %v999_v21, %v844_v57 }
 0x224   :  { %v1611_v49 = vpop.f32.mrf.mxu0 }
 0x225   :  { %v1011_v12 = vadd.f32 %v1611_v49, %v859_v39  ;;  %v1744_v49 = vld [vmem:[%s2402_s5 + $0x8] sm:$0xff]  }
 0x226   :  { %v1002_v15 = vpop.f32.mrf.mxu0 }
 0x227   :  { %v1003_v3 = vadd.f32 %v1002_v15, %v849_v9  ;;  %v1746_v15 = vld [vmem:[%s2402_s5 + $0x18] sm:$0xff]  }
 0x228   :  { %v1614_v50 = vpop.f32.mrf.mxu0 }
 0x229   :  { %v1024_v59 = vadd.f32 %v1614_v50, %v874_v54  ;;  %v1748_v50 = vld [vmem:[%s2402_s5 + $0x28] sm:$0xff]   ;;  %v1110_v54 = vpop.permute.xlu1 %1109 }
 0x22a   :  { %v1015_v10 = vpop.f32.mrf.mxu0 }
 0x22b   :  { %v1016_v6 = vadd.f32 %v1015_v10, %v864_v0  ;;  %v1749_v10 = vld [vmem:[%s2402_s5 + $0x30] sm:$0xff]  }
 0x22c   :  { %v1615_v60 = vpop.f32.mrf.mxu0 }
 0x22d   :  { %v1027_v55 = vadd.f32 %v1615_v60, %v879_v11  ;;  %v1750_v11 = vld [vmem:[%s2402_s5 + $0x38] sm:$0xff]   ;;  %v1105_v60 = vpop.permute.xlu0 %1104 }
 0x22e   :  { %v1018_v51 = vpop.f32.mrf.mxu0 }
 0x22f   :  { %v1019_v8 = vadd.f32 %v1018_v51, %v869_v45 }
 0x230   :  { %v1618_v44 = vpop.f32.mrf.mxu0 }
 0x231   :  { %v1040_v53 = vadd.f32 %v1618_v44, %v894_v19  ;;  %v1115_v51 = vpop.permute.xlu0 %1114  ;;  %v1120_v44 = vpop.permute.xlu1 %1119 }
 0x232   :  { %v1031_v4 = vpop.f32.mrf.mxu0 }
 0x233   :  { %v1032_v56 = vadd.f32 %v1031_v4, %v884_v17  ;;  %1783 = vtanh.f32 %v1040_v53  ;;  %v1747_v17 = vld [vmem:[%s2402_s5 + $0x20] sm:$0xff]  }
 0x234   :  { %v1619_v42 = vpop.f32.mrf.mxu0 }
 0x235   :  { %v1043_v46 = vadd.f32 %v1619_v42, %v899_v25  ;;  %v1125_v45 = vpop.permute.xlu0 %1124  ;;  %v1130_v53 = vpop.permute.xlu1 %1129 }
 0x236   :  { %v1034_v62 = vpop.f32.mrf.mxu0 }
 0x237   :  { %1785 = vtanh.f32 %v1043_v46  ;;  %v1035_v2 = vadd.f32 %v1034_v62, %v889_v28  ;;  %v1745_v28 = vld [vmem:[%s2402_s5 + $0x10] sm:$0xff]  }
 0x238   :  { %1787 = vtanh.f32 %v1032_v56 }
 0x239   :  { %1789 = vtanh.f32 %v1035_v2  ;;  %v1135_v4 = vpop.permute.xlu0 %1134  ;;  %v1140_v62 = vpop.permute.xlu1 %1139 }
 0x23a   :  { %1791 = vtanh.f32 %v1027_v55 }
 0x23b   :  { %1793 = vtanh.f32 %v1024_v59 }
 0x23c   :  { %1795 = vtanh.f32 %v1019_v8 }
 0x23d   :  { %1797 = vtanh.f32 %v1016_v6  ;;  %v1145_v39 = vpop.permute.xlu0 %1144  ;;  %v1150_v9 = vpop.permute.xlu1 %1149 }
 0x23e   :  { %1799 = vtanh.f32 %v1011_v12 }
 0x23f   :  { %1801 = vtanh.f32 %v1008_v13 }
 0x240   :  { %v1784_v1 = vpop.eup %1783  ;;  %1803 = vtanh.f32 %v1003_v3 }
 0x241   :  { %1805 = vtanh.f32 %v1000_v63  ;;  %v1155_v13 = vpop.permute.xlu0 %1154 }
 0x242   :  { %1807 = vtanh.f32 %v995_v22 }
 0x243   :  { %1809 = vtanh.f32 %v992_v31 }
 0x244   :  { %v1786_v61 = vpop.eup %1785  ;;  %1811 = vtanh.f32 %v987_v34 }
 0x245   :  { %v1788_v48 = vpop.eup %1787  ;;  %v1085_v16 = vpack.c.bf16 %v1786_v61, %v1784_v1  ;;  %1813 = vtanh.f32 %v984_v38 }
 0x246   :  { %v1790_v18 = vpop.eup %1789 }
 0x247   :  { %1620 = vmatprep.subr.bf16.mxu1 %v1085_v16  ;;  %v1084_v24 = vpack.c.bf16 %v1790_v18, %v1788_v48  ;;  %v1792_v26 = vpop.eup %1791  ;;  %v1160_v48 = vpop.permute.xlu1 %1159 }
 0x248   :  { %1621 = vmatpush3.bf16.msra.mxu1 %v1085_v16  ;;  %v1794_v32 = vpop.eup %1793  ;;  %v1165_v18 = vpop.permute.xlu0 %1164 }
 0x249   :  { %1622 = vmatprep.subr.bf16.mxu1 %v1084_v24  ;;  %v1083_v35 = vpack.c.bf16 %v1792_v26, %v1794_v32  ;;  %v1796_v36 = vpop.eup %1795 }
 0x24a   :  { %v1798_v40 = vpop.eup %1797 }
 0x24b   :  { %v1082_v41 = vpack.c.bf16 %v1796_v36, %v1798_v40  ;;  %v1800_v47 = vpop.eup %1799  ;;  %v1170_v31 = vpop.permute.xlu1 %1169 }
 0x24c   :  { %1623 = vmatpush3.bf16.msra.mxu1 %v1084_v24  ;;  %v1802_v58 = vpop.eup %1801  ;;  %v1175_v34 = vpop.permute.xlu0 %1174 }
 0x24d   :  { %1624 = vmatprep.subr.bf16.mxu1 %v1083_v35  ;;  %v1081_v5 = vpack.c.bf16 %v1800_v47, %v1802_v58  ;;  %v1804_v7 = vpop.eup %1803 }
 0x24e   :  { %v1806_v27 = vpop.eup %1805 }
 0x24f   :  { %v1080_v23 = vpack.c.bf16 %v1804_v7, %v1806_v27  ;;  %v1808_v52 = vpop.eup %1807  ;;  %v1180_v40 = vpop.permute.xlu1 %1179 }
 0x250   :  { %1625 = vmatpush3.bf16.msra.mxu1 %v1083_v35  ;;  %v1810_v25 = vpop.eup %1809 }
 0x251   :  { %1626 = vmatprep.subr.bf16.mxu1 %v1082_v41  ;;  %v1079_v29 = vpack.c.bf16 %v1808_v52, %v1810_v25  ;;  %v1812_v30 = vpop.eup %1811 }
 0x252   :  { %v1814_v19 = vpop.eup %1813 }
 0x253   :  { %v1078_v21 = vpack.c.bf16 %v1812_v30, %v1814_v19 }
 0x254   :  { %1627 = vmatpush3.bf16.msra.mxu1 %v1082_v41 }
 0x255   :  { %1628 = vmatprep.subr.bf16.mxu1 %v1081_v5 }
 0x258   :  { %1629 = vmatpush3.bf16.msra.mxu1 %v1081_v5 }
 0x259   :  { %1630 = vmatprep.subr.bf16.mxu1 %v1080_v23 }
 0x25c   :  { %1631 = vmatpush3.bf16.msra.mxu1 %v1080_v23 }
 0x25d   :  { %1632 = vmatprep.subr.bf16.mxu1 %v1079_v29 }
 0x260   :  { %1633 = vmatpush3.bf16.msra.mxu1 %v1079_v29 }
 0x261   :  { %1634 = vmatprep.subr.bf16.mxu1 %v1078_v21 }
 0x264   :  { %1635 = vmatpush3.bf16.msra.mxu1 %v1078_v21 }
 0x267   :  { %1637 = vmatmul.mubr.bf16.vlgmr.msra.gmra.mxu1 %v1744_v49 }
 0x268   :  { %1640 = vmatprep.mubr.bf16.mxu1 %v1745_v28 }
 0x26f   :  { %1641 = vmatmul.mubr.bf16.gmra.mxu1 %v1746_v15 }
 0x270   :  { %1644 = vmatprep.mubr.bf16.mxu1 %v1747_v17 }
 0x277   :  { %1645 = vmatmul.mubr.bf16.gmra.mxu1 %v1748_v50 }
 0x278   :  { %1648 = vmatprep.mubr.bf16.mxu1 %v1749_v10 }
 0x27f   :  { %1649 = vmatmul.mubr.bf16.gmra.mxu1 %v1750_v11 }
 0x327   :  { %v1638_v0 = vpop.f32.mrf.mxu1 }
 0x328   :  { %v1273_v56 = vadd.f32 %v1638_v0, %v1115_v51 }
 0x329   :  { %v1264_v42 = vpop.f32.mrf.mxu1 }
 0x32a   :  { %1330 = vst.msk [vmem:[%s2403_s7 + $0x10] sm:$0xff] %vm1327_vm0, %v1273_v56  ;;  %v1265_v46 = vadd.f32 %v1264_v42, %v1105_v60 }
 0x32b   :  { %v1639_v55 = vpop.f32.mrf.mxu1 }
 0x32c   :  { %1328 = vst.msk [vmem:[%s2403_s7] sm:$0xff] %vm1327_vm0, %v1265_v46  ;;  %v1276_v2 = vadd.f32 %v1639_v55, %v1120_v44 }
 0x32d   :  { %v1267_v59 = vpop.f32.mrf.mxu1 }
 0x32e   :  { %1331 = vst.msk [vmem:[%s2403_s7 + $0x18] sm:$0xff] %vm1327_vm0, %v1276_v2  ;;  %v1268_v43 = vadd.f32 %v1267_v59, %v1110_v54 }
 0x32f   :  { %v1642_v8 = vpop.f32.mrf.mxu1 }
 0x330   :  { %1329 = vst.msk [vmem:[%s2403_s7 + $0x8] sm:$0xff] %vm1327_vm0, %v1268_v43  ;;  %v1289_v6 = vadd.f32 %v1642_v8, %v1135_v4 }
 0x331   :  { %v1280_v12 = vpop.f32.mrf.mxu1 }
 0x332   :  { %1334 = vst.msk [vmem:[%s2403_s7 + $0x30] sm:$0xff] %vm1327_vm0, %v1289_v6  ;;  %v1281_v57 = vadd.f32 %v1280_v12, %v1125_v45 }
 0x333   :  { %v1643_v1 = vpop.f32.mrf.mxu1 }
 0x334   :  { %1332 = vst.msk [vmem:[%s2403_s7 + $0x20] sm:$0xff] %vm1327_vm0, %v1281_v57  ;;  %v1292_v3 = vadd.f32 %v1643_v1, %v1140_v62 }
 0x335   :  { %v1283_v61 = vpop.f32.mrf.mxu1 }
 0x336   :  { %1335 = vst.msk [vmem:[%s2403_s7 + $0x38] sm:$0xff] %vm1327_vm0, %v1292_v3  ;;  %v1284_v14 = vadd.f32 %v1283_v61, %v1130_v53 }
 0x337   :  { %v1646_v63 = vpop.f32.mrf.mxu1 }
 0x338   :  { %1333 = vst.msk [vmem:[%s2403_s7 + $0x28] sm:$0xff] %vm1327_vm0, %v1284_v14  ;;  %v1305_v16 = vadd.f32 %v1646_v63, %v1155_v13 }
 0x339   :  { %v1296_v20 = vpop.f32.mrf.mxu1 }
 0x33a   :  { %1338 = vst.msk [vmem:[%s2403_s7 + $0x50] sm:$0xff] %vm1327_vm0, %v1305_v16  ;;  %v1297_v22 = vadd.f32 %v1296_v20, %v1145_v39 }
 0x33b   :  { %v1647_v24 = vpop.f32.mrf.mxu1 }
 0x33c   :  { %1336 = vst.msk [vmem:[%s2403_s7 + $0x40] sm:$0xff] %vm1327_vm0, %v1297_v22  ;;  %v1308_v26 = vadd.f32 %v1647_v24, %v1160_v48 }
 0x33d   :  { %v1299_v32 = vpop.f32.mrf.mxu1 }
 0x33e   :  { %1339 = vst.msk [vmem:[%s2403_s7 + $0x58] sm:$0xff] %vm1327_vm0, %v1308_v26  ;;  %v1300_v33 = vadd.f32 %v1299_v32, %v1150_v9 }
 0x33f   :  { %v1650_v35 = vpop.f32.mrf.mxu1 }
 0x340   :  { %1337 = vst.msk [vmem:[%s2403_s7 + $0x48] sm:$0xff] %vm1327_vm0, %v1300_v33  ;;  %v1321_v36 = vadd.f32 %v1650_v35, %v1175_v34 }
 0x341   :  { %v1312_v37 = vpop.f32.mrf.mxu1 }
 0x342   :  { %1342 = vst.msk [vmem:[%s2403_s7 + $0x70] sm:$0xff] %vm1327_vm0, %v1321_v36  ;;  %v1313_v38 = vadd.f32 %v1312_v37, %v1165_v18 }
 0x343   :  { %v1651_v41 = vpop.f32.mrf.mxu1 }
 0x344   :  { %1340 = vst.msk [vmem:[%s2403_s7 + $0x60] sm:$0xff] %vm1327_vm0, %v1313_v38  ;;  %v1324_v47 = vadd.f32 %v1651_v41, %v1180_v40 }
 0x345   :  { %v1315_v58 = vpop.f32.mrf.mxu1 }
 0x346   :  { %1343 = vst.msk [vmem:[%s2403_s7 + $0x78] sm:$0xff] %vm1327_vm0, %v1324_v47  ;;  %v1316_v5 = vadd.f32 %v1315_v58, %v1170_v31 }
 0x348   :  { %1341 = vst.msk [vmem:[%s2403_s7 + $0x68] sm:$0xff] %vm1327_vm0, %v1316_v5 }

</bundles_post_ra>
